<compile_context>
chip_gen: v7x
topology: tpu7x:2x2x1
jax: 0.10.0
libtpu: 0.0.40
codegen_flags: <defaults>
</compile_context>

<pallas_src>
import functools

import jax
import jax.numpy as jnp
from jax.experimental import pallas as pl
from jax.experimental.pallas import tpu as pltpu

EPS = 1e-5


# --------------------------- Pallas kernels ---------------------------------

def _conv1_att_kernel(x0_ref, x1_ref, x2_ref, mask_ref, wt_ref, bcat_ref,
                      wa2_ref, ba2_ref, z1_ref, att_ref, st_ref, acc_ref,
                      *, Wp, C_out):
    """Fused conv1 + attention conv3 + attention conv1x1 + sigmoid(+1).

    Inputs are three neighbouring padded depth planes of x in (C_in, S) layout
    (S = (H+2)*(W+2) spatial lanes).  Also emits masked partial BN1 statistics
    (sum / sumsq over valid voxels of this plane).
    """
    S = acc_ref.shape[1]
    acc_ref[...] = jnp.zeros_like(acc_ref)

    views = (x0_ref[0, 0], x1_ref[0, 0], x2_ref[0, 0])        # (C_in, S) bf16
    for kd in range(3):
        xv = views[kd]
        for kh in range(3):
            for kw in range(3):
                o = kh * Wp + kw                               # lane shift >= 0
                wk = wt_ref[kd * 9 + kh * 3 + kw]              # (2*C_out, C_in)
                acc_ref[:, 0:S - o] += jnp.dot(
                    wk, xv[:, o:S], preferred_element_type=jnp.float32)

    mask = mask_ref[...]                                       # (1, S) 0/1
    z1 = acc_ref[0:C_out, :] + bcat_ref[0:C_out, :]            # conv1 pre-BN
    a1 = jnp.maximum(acc_ref[C_out:, :] + bcat_ref[C_out:, :], 0.0)

    # attention: 1x1 conv + sigmoid + 1 (EUP exp + approx reciprocal)
    att = jnp.dot(wa2_ref[...], a1.astype(jnp.bfloat16),
                  preferred_element_type=jnp.float32) + ba2_ref[...]
    att = pl.reciprocal(1.0 + jnp.exp(-att), approx=True) + 1.0

    # masked partial BN1 statistics (valid voxels only)
    z1m = z1 * mask
    st_ref[0, 0, :, 0:1] = jnp.sum(z1m, axis=1, keepdims=True)
    st_ref[0, 0, :, 1:2] = jnp.sum(z1 * z1m, axis=1, keepdims=True)

    z1_ref[0, 0] = z1.astype(z1_ref.dtype)
    att_ref[0, 0] = att.astype(att_ref.dtype)


def _conv2_kernel(zp_ref, zc_ref, zn_ref, mask_ref, sc_ref, sh_ref, wt_ref,
                  b2_ref, z2_ref, st_ref, acc_ref, *, Wp):
    """conv2 with BN1+ReLU fused into its input taps; emits partial BN2 stats."""
    S = acc_ref.shape[1]
    d = pl.program_id(1)
    nd = pl.num_programs(1)

    mask = mask_ref[...]                                       # (1, S)
    sc = sc_ref[...]                                           # (C_out, 1)
    sh = sh_ref[...]

    def h1_of(view_ref):
        # Fused BN1 (batch stats) + ReLU; the mask zeroes invalid lanes which
        # also implements conv2's zero padding ring.
        v = view_ref[0, 0].astype(jnp.float32)
        return (jnp.maximum(v * sc + sh, 0.0) * mask).astype(jnp.bfloat16)

    acc_ref[...] = jnp.zeros_like(acc_ref)

    def taps(kd, h):
        for kh in range(3):
            for kw in range(3):
                o = (kh - 1) * Wp + (kw - 1)                   # signed lane shift
                wk = wt_ref[kd * 9 + kh * 3 + kw]              # (C_out, C_out)
                if o >= 0:
                    acc_ref[:, 0:S - o] += jnp.dot(
                        wk, h[:, o:S], preferred_element_type=jnp.float32)
                else:
                    a = -o
                    acc_ref[:, a:S] += jnp.dot(
                        wk, h[:, 0:S - a], preferred_element_type=jnp.float32)

    taps(1, h1_of(zc_ref))                 # centre plane always contributes

    @pl.when(d > 0)                        # kd = 0 -> plane d-1 exists
    def _():
        taps(0, h1_of(zp_ref))

    @pl.when(d < nd - 1)                   # kd = 2 -> plane d+1 exists
    def _():
        taps(2, h1_of(zn_ref))

    z2 = acc_ref[...] + b2_ref[...]
    z2m = z2 * mask
    st_ref[0, 0, :, 0:1] = jnp.sum(z2m, axis=1, keepdims=True)
    st_ref[0, 0, :, 1:2] = jnp.sum(z2 * z2m, axis=1, keepdims=True)
    z2_ref[0, 0] = z2.astype(z2_ref.dtype)


def _tail_kernel(z2_ref, att_ref, sc_ref, sh_ref, y_ref):
    """y = (sigmoid(att-conv)+1) * relu(BN2(z2)), tiled over (N, D)."""
    z2 = z2_ref[0, 0].astype(jnp.float32)
    x1 = jnp.maximum(z2 * sc_ref[...] + sh_ref[...], 0.0)
    y_ref[0, 0] = att_ref[0, 0].astype(jnp.float32) * x1


# --------------------------- pallas_call wrappers ----------------------------

def _cparams():
    # explicit budget; safe on v5e/v6e (128 MiB) and v7x (64 MiB physical)
    return pltpu.CompilerParams(
        dimension_semantics=("parallel", "parallel"),
        vmem_limit_bytes=32 * 1024 * 1024)


def conv1_att(xp, mask, wt1, bcat, wa2, ba2, *, D, Wp, C_out):
    N = xp.shape[0]
    C_in = xp.shape[2]
    S = xp.shape[3]
    kernel = functools.partial(_conv1_att_kernel, Wp=Wp, C_out=C_out)
    out_shape = (
        jax.ShapeDtypeStruct((N, D, C_out, S), jnp.bfloat16),   # z1 (pre-BN)
        jax.ShapeDtypeStruct((N, D, C_out, S), jnp.bfloat16),   # attention x2
        jax.ShapeDtypeStruct((N, D, C_out, 2), jnp.float32),    # BN1 partials
    )
    return pl.pallas_call(
        kernel,
        out_shape=out_shape,
        grid=(N, D),
        in_specs=[
            pl.BlockSpec((1, 1, C_in, S), lambda n, d: (n, d, 0, 0)),
            pl.BlockSpec((1, 1, C_in, S), lambda n, d: (n, d + 1, 0, 0)),
            pl.BlockSpec((1, 1, C_in, S), lambda n, d: (n, d + 2, 0, 0)),
            pl.BlockSpec((1, S), lambda n, d: (0, 0)),
            pl.BlockSpec((27, 2 * C_out, C_in), lambda n, d: (0, 0, 0)),
            pl.BlockSpec((2 * C_out, 1), lambda n, d: (0, 0)),
            pl.BlockSpec((C_out, C_out), lambda n, d: (0, 0)),
            pl.BlockSpec((C_out, 1), lambda n, d: (0, 0)),
        ],
        out_specs=(
            pl.BlockSpec((1, 1, C_out, S), lambda n, d: (n, d, 0, 0)),
            pl.BlockSpec((1, 1, C_out, S), lambda n, d: (n, d, 0, 0)),
            pl.BlockSpec((1, 1, C_out, 2), lambda n, d: (n, d, 0, 0)),
        ),
        scratch_shapes=[pltpu.VMEM((2 * C_out, S), jnp.float32)],
        compiler_params=_cparams(),
    )(xp, xp, xp, mask, wt1, bcat, wa2, ba2)


def conv2(z1, mask, scale1, shift1, wt2, b2, *, Wp):
    N, D, C_out, S = z1.shape
    kernel = functools.partial(_conv2_kernel, Wp=Wp)
    out_shape = (
        jax.ShapeDtypeStruct((N, D, C_out, S), jnp.bfloat16),   # z2 (pre-BN)
        jax.ShapeDtypeStruct((N, D, C_out, 2), jnp.float32),    # BN2 partials
    )
    return pl.pallas_call(
        kernel,
        out_shape=out_shape,
        grid=(N, D),
        in_specs=[
            pl.BlockSpec((1, 1, C_out, S),
                         lambda n, d: (n, jnp.maximum(d - 1, 0), 0, 0)),
            pl.BlockSpec((1, 1, C_out, S), lambda n, d: (n, d, 0, 0)),
            pl.BlockSpec((1, 1, C_out, S),
                         lambda n, d: (n, jnp.minimum(d + 1, D - 1), 0, 0)),
            pl.BlockSpec((1, S), lambda n, d: (0, 0)),
            pl.BlockSpec((C_out, 1), lambda n, d: (0, 0)),
            pl.BlockSpec((C_out, 1), lambda n, d: (0, 0)),
            pl.BlockSpec((27, C_out, C_out), lambda n, d: (0, 0, 0)),
            pl.BlockSpec((C_out, 1), lambda n, d: (0, 0)),
        ],
        out_specs=(
            pl.BlockSpec((1, 1, C_out, S), lambda n, d: (n, d, 0, 0)),
            pl.BlockSpec((1, 1, C_out, 2), lambda n, d: (n, d, 0, 0)),
        ),
        scratch_shapes=[pltpu.VMEM((C_out, S), jnp.float32)],
        compiler_params=_cparams(),
    )(z1, z1, z1, mask, scale1, shift1, wt2, b2)


def bn_att_tail(z2, att, scale2, shift2):
    N, D, C_out, S = z2.shape
    return pl.pallas_call(
        _tail_kernel,
        out_shape=jax.ShapeDtypeStruct((N, D, C_out, S), jnp.float32),
        grid=(N, D),
        in_specs=[
            pl.BlockSpec((1, 1, C_out, S), lambda n, d: (n, d, 0, 0)),
            pl.BlockSpec((1, 1, C_out, S), lambda n, d: (n, d, 0, 0)),
            pl.BlockSpec((C_out, 1), lambda n, d: (0, 0)),
            pl.BlockSpec((C_out, 1), lambda n, d: (0, 0)),
        ],
        out_specs=pl.BlockSpec((1, 1, C_out, S), lambda n, d: (n, d, 0, 0)),
        compiler_params=_cparams(),
    )(z2, att, scale2, shift2)


# --------------------------- forward pass (glue) -----------------------------

def _att_double_conv(x, params, se=False):
    """x: (N, C_in, D, H, W) float32 -> (N, C_out, D, H, W) float32."""
    N, C_in, D, H, W = x.shape
    C_out = params["w1"].shape[0]
    Hp, Wp = H + 2, W + 2
    S = Hp * Wp

    # channels-on-sublanes / padded-spatial-on-lanes layout (bf16 MXU operand)
    xt = jnp.transpose(x, (0, 2, 1, 3, 4))                     # (N, D, C, H, W)
    xp = jnp.pad(xt, ((0, 0), (1, 1), (0, 0), (1, 1), (1, 1)))
    xp = xp.reshape(N, D + 2, C_in, S).astype(jnp.bfloat16)

    # validity mask of the padded-plane lanes (h < H and w < W)
    rows = jnp.arange(S, dtype=jnp.int32)
    mask = (((rows // Wp) < H) & ((rows % Wp) < W)).astype(jnp.float32)
    mask = mask.reshape(1, S)

    # weights: tap-major (27, C_rows, C_contract), bf16 MXU operands
    def wtaps(w):
        co, ci = w.shape[0], w.shape[1]
        return jnp.transpose(w.reshape(co, ci, 27), (2, 0, 1))

    wt1 = jnp.concatenate([wtaps(params["w1"]), wtaps(params["wa1"])],
                          axis=1).astype(jnp.bfloat16)          # (27, 2C, C_in)
    bcat = jnp.concatenate([params["b1"], params["ba1"]]).reshape(2 * C_out, 1)
    wa2 = params["wa2"].reshape(C_out, C_out).astype(jnp.bfloat16)
    ba2 = params["ba2"].reshape(C_out, 1)
    wt2 = wtaps(params["w2"]).astype(jnp.bfloat16)              # (27, C, C)
    b2 = params["b2"].reshape(C_out, 1)

    # stage 1: fused conv1 + attention branch + masked partial BN1 stats
    z1, att, st1 = conv1_att(xp, mask, wt1, bcat, wa2, ba2,
                             D=D, Wp=Wp, C_out=C_out)

    cnt = float(N * D * H * W)

    def bn_affine(stats, gamma, beta):
        # tiny cross-tile reduction of per-tile sum/sumsq (done in glue)
        s = jnp.sum(stats, axis=(0, 1))                         # (C_out, 2)
        mean = s[:, 0] / cnt
        var = s[:, 1] / cnt - mean * mean                       # biased, train-mode
        scale = gamma * jax.lax.rsqrt(var + EPS)
        return scale.reshape(C_out, 1), (beta - mean * scale).reshape(C_out, 1)

    scale1, shift1 = bn_affine(st1, params["g1"], params["be1"])

    # stage 2: conv2 with BN1+ReLU fused into its taps + partial BN2 stats
    z2, st2 = conv2(z1, mask, scale1, shift1, wt2, b2, Wp=Wp)
    scale2, shift2 = bn_affine(st2, params["g2"], params["be2"])

    # stage 3: y = (sigmoid(att)+1) * relu(BN2(z2)), tiled over (N, D)
    y = bn_att_tail(z2, att, scale2, shift2)                    # (N, D, C, S)

    # extract valid voxels and move to NCDHW
    y = y.reshape(N, D, C_out, Hp, Wp)[:, :, :, :H, :W]
    y = jnp.transpose(y, (0, 2, 1, 3, 4))                       # (N, C, D, H, W)

    if se:
        # TODO(synk): SEBlock squeeze-excite is tiny (N x C) work; kept in JAX glue.
        m = jnp.mean(y, axis=(2, 3, 4))
        h = jax.nn.relu(m @ params["wf1"].T + params["bf1"])
        s = jax.nn.sigmoid(h @ params["wf2"].T + params["bf2"])
        y = y * s[:, :, None, None, None]
    return y


att_double_conv = jax.jit(_att_double_conv, static_argnames=("se",))


# --------------------------- pure-JAX reference ------------------------------

def reference(x, params, se=False):
    dn = ("NCDHW", "OIDHW", "NCDHW")

    def conv3d(x, w, b, pad):
        out = jax.lax.conv_general_dilated(
            x, w, window_strides=(1, 1, 1), padding=[(pad, pad)] * 3,
            dimension_numbers=dn)
        return out + b[None, :, None, None, None]

    def bn(x, g, b):
        mean = jnp.mean(x, axis=(0, 2, 3, 4), keepdims=True)
        var = jnp.mean((x - mean) ** 2, axis=(0, 2, 3, 4), keepdims=True)
        return ((x - mean) * jax.lax.rsqrt(var + EPS)
                * g[None, :, None, None, None] + b[None, :, None, None, None])

    z1 = conv3d(x, params["w1"], params["b1"], 1)
    h1 = jax.nn.relu(bn(z1, params["g1"], params["be1"]))
    z2 = conv3d(h1, params["w2"], params["b2"], 1)
    x1 = jax.nn.relu(bn(z2, params["g2"], params["be2"]))
    a1 = jax.nn.relu(conv3d(x, params["wa1"], params["ba1"], 1))
    x2 = jax.nn.sigmoid(conv3d(a1, params["wa2"], params["ba2"], 0)) + 1.0
    y = x2 * x1
    if se:
        m = jnp.mean(y, axis=(2, 3, 4))
        h = jax.nn.relu(m @ params["wf1"].T + params["bf1"])
        s = jax.nn.sigmoid(h @ params["wf2"].T + params["bf2"])
        y = y * s[:, :, None, None, None]
    return y


# --------------------------- parameters --------------------------------------

def init_params(key, c_in, c_out, r=4):
    ks = jax.random.split(key, 16)
    hid = round(c_out / r)

    def n(k, shape, s=0.1):
        return s * jax.random.normal(k, shape, jnp.float32)

    return {
        # DoubleConv
        "w1": n(ks[0], (c_out, c_in, 3, 3, 3)), "b1": n(ks[1], (c_out,)),
        "g1": 1.0 + n(ks[2], (c_out,)), "be1": n(ks[3], (c_out,)),
        "w2": n(ks[4], (c_out, c_out, 3, 3, 3)), "b2": n(ks[5], (c_out,)),
        "g2": 1.0 + n(ks[6], (c_out,)), "be2": n(ks[7], (c_out,)),
        # Attention
        "wa1": n(ks[8], (c_out, c_in, 3, 3, 3)), "ba1": n(ks[9], (c_out,)),
        "wa2": n(ks[10], (c_out, c_out, 1, 1, 1)), "ba2": n(ks[11], (c_out,)),
        # SEBlock
        "wf1": n(ks[12], (hid, c_out)), "bf1": n(ks[13], (hid,)),
        "wf2": n(ks[14], (c_out, hid)), "bf2": n(ks[15], (c_out,)),
    }


# --------------------------- main ---------------------------------------------

if __name__ == "__main__":
    key = jax.random.PRNGKey(0)
    kp, kx = jax.random.split(key)
    N, C_in, C_out, D, H, W = 2, 4, 8, 8, 8, 8
    params = init_params(kp, C_in, C_out)
    x = jax.random.normal(kx, (N, C_in, D, H, W), jnp.float32)

    # bf16 MXU operands / bf16 intermediate storage -> slightly looser tolerance
    # than a pure-f32 pipeline.
    ATOL, RTOL = 7.5e-2, 7.5e-2

    # se=False (module default)
    y = jax.block_until_ready(att_double_conv(x, params, se=False))
    assert y.shape == (N, C_out, D, H, W)
    y_ref = reference(x, params, se=False)
    assert jnp.allclose(y, y_ref, atol=ATOL, rtol=RTOL), \
        f"mismatch (se=False): max abs err {float(jnp.max(jnp.abs(y - y_ref)))}"

    # se=True path
    y_se = jax.block_until_ready(att_double_conv(x, params, se=True))
    y_se_ref = reference(x, params, se=True)
    assert jnp.allclose(y_se, y_se_ref, atol=ATOL, rtol=RTOL), \
        f"mismatch (se=True): max abs err {float(jnp.max(jnp.abs(y_se - y_se_ref)))}"

    print("KERNEL_OK")
</pallas_src>

<mosaic_0001>
module attributes {stable_mosaic.version = 11 : i64} {
  func.func @_conv1_att_kernel(%arg0: i32, %arg1: i32, %arg2: memref<1x1x4x100xbf16, #tpu.memory_space<vmem>>, %arg3: memref<1x1x4x100xbf16, #tpu.memory_space<vmem>>, %arg4: memref<1x1x4x100xbf16, #tpu.memory_space<vmem>>, %arg5: memref<1x100xf32, #tpu.memory_space<vmem>>, %arg6: memref<27x16x4xbf16, #tpu.memory_space<vmem>>, %arg7: memref<16x1xf32, #tpu.memory_space<vmem>>, %arg8: memref<8x8xbf16, #tpu.memory_space<vmem>>, %arg9: memref<8x1xf32, #tpu.memory_space<vmem>>, %arg10: memref<1x1x8x100xbf16, #tpu.memory_space<vmem>>, %arg11: memref<1x1x8x100xbf16, #tpu.memory_space<vmem>>, %arg12: memref<1x1x8x2xf32, #tpu.memory_space<vmem>>, %arg13: memref<16x100xf32, #tpu.memory_space<vmem>>) attributes {dimension_semantics = [#tpu.dimension_semantics<parallel>, #tpu.dimension_semantics<parallel>], iteration_bounds = array<i64: 2, 8>, scalar_prefetch = 0 : i64, scratch_operands = 1 : i64, tpu.core_type = #tpu.core_type<tc>, window_params = [{transform_indices = @transform_0, window_bounds = array<i64: 1, 1, 4, 100>}, {transform_indices = @transform_1, window_bounds = array<i64: 1, 1, 4, 100>}, {transform_indices = @transform_2, window_bounds = array<i64: 1, 1, 4, 100>}, {pipeline_mode = #tpu.pipeline_mode<synchronous>, transform_indices = @transform_3, window_bounds = array<i64: 1, 100>}, {pipeline_mode = #tpu.pipeline_mode<synchronous>, transform_indices = @transform_4, window_bounds = array<i64: 27, 16, 4>}, {pipeline_mode = #tpu.pipeline_mode<synchronous>, transform_indices = @transform_5, window_bounds = array<i64: 16, 1>}, {pipeline_mode = #tpu.pipeline_mode<synchronous>, transform_indices = @transform_6, window_bounds = array<i64: 8, 8>}, {pipeline_mode = #tpu.pipeline_mode<synchronous>, transform_indices = @transform_7, window_bounds = array<i64: 8, 1>}, {transform_indices = @transform_8, window_bounds = array<i64: 1, 1, 8, 100>}, {transform_indices = @transform_9, window_bounds = array<i64: 1, 1, 8, 100>}, {transform_indices = @transform_10, window_bounds = array<i64: 1, 1, 8, 2>}]} {
    %cst = arith.constant 0.000000e+00 : f32
    %0 = vector.broadcast %cst : f32 to vector<16x100xf32>
    %c0 = arith.constant 0 : index
    %c0_0 = arith.constant 0 : index
    %1 = vector.load %arg13[%c0, %c0_0] : memref<16x100xf32, #tpu.memory_space<vmem>>, vector<16x100xf32>
    tpu.vector_store %arg13[%c0, %c0_0], %0 {strides = array<i32>} : memref<16x100xf32, #tpu.memory_space<vmem>>, vector<16x100xf32>,
    %c0_1 = arith.constant 0 : index
    %c0_2 = arith.constant 0 : index
    %c0_3 = arith.constant 0 : index
    %c0_4 = arith.constant 0 : index
    %2 = vector.load %arg2[%c0_1, %c0_2, %c0_3, %c0_4] : memref<1x1x4x100xbf16, #tpu.memory_space<vmem>>, vector<1x1x4x100xbf16>
    %3 = vector.shape_cast %2 : vector<1x1x4x100xbf16> to vector<4x100xbf16>
    %c0_5 = arith.constant 0 : index
    %c0_6 = arith.constant 0 : index
    %c0_7 = arith.constant 0 : index
    %c0_8 = arith.constant 0 : index
    %4 = vector.load %arg3[%c0_5, %c0_6, %c0_7, %c0_8] : memref<1x1x4x100xbf16, #tpu.memory_space<vmem>>, vector<1x1x4x100xbf16>
    %5 = vector.shape_cast %4 : vector<1x1x4x100xbf16> to vector<4x100xbf16>
    %c0_9 = arith.constant 0 : index
    %c0_10 = arith.constant 0 : index
    %c0_11 = arith.constant 0 : index
    %c0_12 = arith.constant 0 : index
    %6 = vector.load %arg4[%c0_9, %c0_10, %c0_11, %c0_12] : memref<1x1x4x100xbf16, #tpu.memory_space<vmem>>, vector<1x1x4x100xbf16>
    %7 = vector.shape_cast %6 : vector<1x1x4x100xbf16> to vector<4x100xbf16>
    %c0_13 = arith.constant 0 : index
    %c0_14 = arith.constant 0 : index
    %c0_15 = arith.constant 0 : index
    %8 = vector.load %arg6[%c0_13, %c0_14, %c0_15] : memref<27x16x4xbf16, #tpu.memory_space<vmem>>, vector<1x16x4xbf16>
    %9 = vector.shape_cast %8 : vector<1x16x4xbf16> to vector<16x4xbf16>
    %c0_16 = arith.constant 0 : index
    %c0_17 = arith.constant 0 : index
    %10 = vector.load %arg13[%c0_16, %c0_17] : memref<16x100xf32, #tpu.memory_space<vmem>>, vector<16x100xf32>
    %cst_18 = arith.constant dense<0.000000e+00> : vector<16x100xf32>
    %11 = tpu.matmul %9, %3, %cst_18 {dimension_numbers = #tpu.dot_dimension_numbers<[1], [0], [0], [1], [0, 0, 1, 1], [], []>} : vector<16x4xbf16>, vector<4x100xbf16>, vector<16x100xf32> -> vector<16x100xf32>
    %12 = arith.addf %10, %11 : vector<16x100xf32>
    %c0_19 = arith.constant 0 : index
    %c0_20 = arith.constant 0 : index
    %13 = vector.load %arg13[%c0_19, %c0_20] : memref<16x100xf32, #tpu.memory_space<vmem>>, vector<16x100xf32>
    tpu.vector_store %arg13[%c0_19, %c0_20], %12 {strides = array<i32>} : memref<16x100xf32, #tpu.memory_space<vmem>>, vector<16x100xf32>,
    %c1 = arith.constant 1 : index
    %c0_21 = arith.constant 0 : index
    %c0_22 = arith.constant 0 : index
    %14 = vector.load %arg6[%c1, %c0_21, %c0_22] : memref<27x16x4xbf16, #tpu.memory_space<vmem>>, vector<1x16x4xbf16>
    %15 = vector.shape_cast %14 : vector<1x16x4xbf16> to vector<16x4xbf16>
    %c0_23 = arith.constant 0 : index
    %c0_24 = arith.constant 0 : index
    %16 = vector.load %arg13[%c0_23, %c0_24] : memref<16x100xf32, #tpu.memory_space<vmem>>, vector<16x99xf32>
    %17 = vector.extract_strided_slice %3 {offsets = [0, 1], sizes = [4, 99], strides = [1, 1]} : vector<4x100xbf16> to vector<4x99xbf16>
    %cst_25 = arith.constant dense<0.000000e+00> : vector<16x99xf32>
    %18 = tpu.matmul %15, %17, %cst_25 {dimension_numbers = #tpu.dot_dimension_numbers<[1], [0], [0], [1], [0, 0, 1, 1], [], []>} : vector<16x4xbf16>, vector<4x99xbf16>, vector<16x99xf32> -> vector<16x99xf32>
    %19 = arith.addf %16, %18 : vector<16x99xf32>
    %c0_26 = arith.constant 0 : index
    %c0_27 = arith.constant 0 : index
    %20 = vector.load %arg13[%c0_26, %c0_27] : memref<16x100xf32, #tpu.memory_space<vmem>>, vector<16x99xf32>
    tpu.vector_store %arg13[%c0_26, %c0_27], %19 {strides = array<i32>} : memref<16x100xf32, #tpu.memory_space<vmem>>, vector<16x99xf32>,
    %c2 = arith.constant 2 : index
    %c0_28 = arith.constant 0 : index
    %c0_29 = arith.constant 0 : index
    %21 = vector.load %arg6[%c2, %c0_28, %c0_29] : memref<27x16x4xbf16, #tpu.memory_space<vmem>>, vector<1x16x4xbf16>
    %22 = vector.shape_cast %21 : vector<1x16x4xbf16> to vector<16x4xbf16>
    %c0_30 = arith.constant 0 : index
    %c0_31 = arith.constant 0 : index
    %23 = vector.load %arg13[%c0_30, %c0_31] : memref<16x100xf32, #tpu.memory_space<vmem>>, vector<16x98xf32>
    %24 = vector.extract_strided_slice %3 {offsets = [0, 2], sizes = [4, 98], strides = [1, 1]} : vector<4x100xbf16> to vector<4x98xbf16>
    %cst_32 = arith.constant dense<0.000000e+00> : vector<16x98xf32>
    %25 = tpu.matmul %22, %24, %cst_32 {dimension_numbers = #tpu.dot_dimension_numbers<[1], [0], [0], [1], [0, 0, 1, 1], [], []>} : vector<16x4xbf16>, vector<4x98xbf16>, vector<16x98xf32> -> vector<16x98xf32>
    %26 = arith.addf %23, %25 : vector<16x98xf32>
    %c0_33 = arith.constant 0 : index
    %c0_34 = arith.constant 0 : index
    %27 = vector.load %arg13[%c0_33, %c0_34] : memref<16x100xf32, #tpu.memory_space<vmem>>, vector<16x98xf32>
    tpu.vector_store %arg13[%c0_33, %c0_34], %26 {strides = array<i32>} : memref<16x100xf32, #tpu.memory_space<vmem>>, vector<16x98xf32>,
    %c3 = arith.constant 3 : index
    %c0_35 = arith.constant 0 : index
    %c0_36 = arith.constant 0 : index
    %28 = vector.load %arg6[%c3, %c0_35, %c0_36] : memref<27x16x4xbf16, #tpu.memory_space<vmem>>, vector<1x16x4xbf16>
    %29 = vector.shape_cast %28 : vector<1x16x4xbf16> to vector<16x4xbf16>
    %c0_37 = arith.constant 0 : index
    %c0_38 = arith.constant 0 : index
    %30 = vector.load %arg13[%c0_37, %c0_38] : memref<16x100xf32, #tpu.memory_space<vmem>>, vector<16x90xf32>
    %31 = vector.extract_strided_slice %3 {offsets = [0, 10], sizes = [4, 90], strides = [1, 1]} : vector<4x100xbf16> to vector<4x90xbf16>
    %cst_39 = arith.constant dense<0.000000e+00> : vector<16x90xf32>
    %32 = tpu.matmul %29, %31, %cst_39 {dimension_numbers = #tpu.dot_dimension_numbers<[1], [0], [0], [1], [0, 0, 1, 1], [], []>} : vector<16x4xbf16>, vector<4x90xbf16>, vector<16x90xf32> -> vector<16x90xf32>
    %33 = arith.addf %30, %32 : vector<16x90xf32>
    %c0_40 = arith.constant 0 : index
    %c0_41 = arith.constant 0 : index
    %34 = vector.load %arg13[%c0_40, %c0_41] : memref<16x100xf32, #tpu.memory_space<vmem>>, vector<16x90xf32>
    tpu.vector_store %arg13[%c0_40, %c0_41], %33 {strides = array<i32>} : memref<16x100xf32, #tpu.memory_space<vmem>>, vector<16x90xf32>,
    %c4 = arith.constant 4 : index
    %c0_42 = arith.constant 0 : index
    %c0_43 = arith.constant 0 : index
    %35 = vector.load %arg6[%c4, %c0_42, %c0_43] : memref<27x16x4xbf16, #tpu.memory_space<vmem>>, vector<1x16x4xbf16>
    %36 = vector.shape_cast %35 : vector<1x16x4xbf16> to vector<16x4xbf16>
    %c0_44 = arith.constant 0 : index
    %c0_45 = arith.constant 0 : index
    %37 = vector.load %arg13[%c0_44, %c0_45] : memref<16x100xf32, #tpu.memory_space<vmem>>, vector<16x89xf32>
    %38 = vector.extract_strided_slice %3 {offsets = [0, 11], sizes = [4, 89], strides = [1, 1]} : vector<4x100xbf16> to vector<4x89xbf16>
    %cst_46 = arith.constant dense<0.000000e+00> : vector<16x89xf32>
    %39 = tpu.matmul %36, %38, %cst_46 {dimension_numbers = #tpu.dot_dimension_numbers<[1], [0], [0], [1], [0, 0, 1, 1], [], []>} : vector<16x4xbf16>, vector<4x89xbf16>, vector<16x89xf32> -> vector<16x89xf32>
    %40 = arith.addf %37, %39 : vector<16x89xf32>
    %c0_47 = arith.constant 0 : index
    %c0_48 = arith.constant 0 : index
    %41 = vector.load %arg13[%c0_47, %c0_48] : memref<16x100xf32, #tpu.memory_space<vmem>>, vector<16x89xf32>
    tpu.vector_store %arg13[%c0_47, %c0_48], %40 {strides = array<i32>} : memref<16x100xf32, #tpu.memory_space<vmem>>, vector<16x89xf32>,
    %c5 = arith.constant 5 : index
    %c0_49 = arith.constant 0 : index
    %c0_50 = arith.constant 0 : index
    %42 = vector.load %arg6[%c5, %c0_49, %c0_50] : memref<27x16x4xbf16, #tpu.memory_space<vmem>>, vector<1x16x4xbf16>
    %43 = vector.shape_cast %42 : vector<1x16x4xbf16> to vector<16x4xbf16>
    %c0_51 = arith.constant 0 : index
    %c0_52 = arith.constant 0 : index
    %44 = vector.load %arg13[%c0_51, %c0_52] : memref<16x100xf32, #tpu.memory_space<vmem>>, vector<16x88xf32>
    %45 = vector.extract_strided_slice %3 {offsets = [0, 12], sizes = [4, 88], strides = [1, 1]} : vector<4x100xbf16> to vector<4x88xbf16>
    %cst_53 = arith.constant dense<0.000000e+00> : vector<16x88xf32>
    %46 = tpu.matmul %43, %45, %cst_53 {dimension_numbers = #tpu.dot_dimension_numbers<[1], [0], [0], [1], [0, 0, 1, 1], [], []>} : vector<16x4xbf16>, vector<4x88xbf16>, vector<16x88xf32> -> vector<16x88xf32>
    %47 = arith.addf %44, %46 : vector<16x88xf32>
    %c0_54 = arith.constant 0 : index
    %c0_55 = arith.constant 0 : index
    %48 = vector.load %arg13[%c0_54, %c0_55] : memref<16x100xf32, #tpu.memory_space<vmem>>, vector<16x88xf32>
    tpu.vector_store %arg13[%c0_54, %c0_55], %47 {strides = array<i32>} : memref<16x100xf32, #tpu.memory_space<vmem>>, vector<16x88xf32>,
    %c6 = arith.constant 6 : index
    %c0_56 = arith.constant 0 : index
    %c0_57 = arith.constant 0 : index
    %49 = vector.load %arg6[%c6, %c0_56, %c0_57] : memref<27x16x4xbf16, #tpu.memory_space<vmem>>, vector<1x16x4xbf16>
    %50 = vector.shape_cast %49 : vector<1x16x4xbf16> to vector<16x4xbf16>
    %c0_58 = arith.constant 0 : index
    %c0_59 = arith.constant 0 : index
    %51 = vector.load %arg13[%c0_58, %c0_59] : memref<16x100xf32, #tpu.memory_space<vmem>>, vector<16x80xf32>
    %52 = vector.extract_strided_slice %3 {offsets = [0, 20], sizes = [4, 80], strides = [1, 1]} : vector<4x100xbf16> to vector<4x80xbf16>
    %cst_60 = arith.constant dense<0.000000e+00> : vector<16x80xf32>
    %53 = tpu.matmul %50, %52, %cst_60 {dimension_numbers = #tpu.dot_dimension_numbers<[1], [0], [0], [1], [0, 0, 1, 1], [], []>} : vector<16x4xbf16>, vector<4x80xbf16>, vector<16x80xf32> -> vector<16x80xf32>
    %54 = arith.addf %51, %53 : vector<16x80xf32>
    %c0_61 = arith.constant 0 : index
    %c0_62 = arith.constant 0 : index
    %55 = vector.load %arg13[%c0_61, %c0_62] : memref<16x100xf32, #tpu.memory_space<vmem>>, vector<16x80xf32>
    tpu.vector_store %arg13[%c0_61, %c0_62], %54 {strides = array<i32>} : memref<16x100xf32, #tpu.memory_space<vmem>>, vector<16x80xf32>,
    %c7 = arith.constant 7 : index
    %c0_63 = arith.constant 0 : index
    %c0_64 = arith.constant 0 : index
    %56 = vector.load %arg6[%c7, %c0_63, %c0_64] : memref<27x16x4xbf16, #tpu.memory_space<vmem>>, vector<1x16x4xbf16>
    %57 = vector.shape_cast %56 : vector<1x16x4xbf16> to vector<16x4xbf16>
    %c0_65 = arith.constant 0 : index
    %c0_66 = arith.constant 0 : index
    %58 = vector.load %arg13[%c0_65, %c0_66] : memref<16x100xf32, #tpu.memory_space<vmem>>, vector<16x79xf32>
    %59 = vector.extract_strided_slice %3 {offsets = [0, 21], sizes = [4, 79], strides = [1, 1]} : vector<4x100xbf16> to vector<4x79xbf16>
    %cst_67 = arith.constant dense<0.000000e+00> : vector<16x79xf32>
    %60 = tpu.matmul %57, %59, %cst_67 {dimension_numbers = #tpu.dot_dimension_numbers<[1], [0], [0], [1], [0, 0, 1, 1], [], []>} : vector<16x4xbf16>, vector<4x79xbf16>, vector<16x79xf32> -> vector<16x79xf32>
    %61 = arith.addf %58, %60 : vector<16x79xf32>
    %c0_68 = arith.constant 0 : index
    %c0_69 = arith.constant 0 : index
    %62 = vector.load %arg13[%c0_68, %c0_69] : memref<16x100xf32, #tpu.memory_space<vmem>>, vector<16x79xf32>
    tpu.vector_store %arg13[%c0_68, %c0_69], %61 {strides = array<i32>} : memref<16x100xf32, #tpu.memory_space<vmem>>, vector<16x79xf32>,
    %c8 = arith.constant 8 : index
    %c0_70 = arith.constant 0 : index
    %c0_71 = arith.constant 0 : index
    %63 = vector.load %arg6[%c8, %c0_70, %c0_71] : memref<27x16x4xbf16, #tpu.memory_space<vmem>>, vector<1x16x4xbf16>
    %64 = vector.shape_cast %63 : vector<1x16x4xbf16> to vector<16x4xbf16>
    %c0_72 = arith.constant 0 : index
    %c0_73 = arith.constant 0 : index
    %65 = vector.load %arg13[%c0_72, %c0_73] : memref<16x100xf32, #tpu.memory_space<vmem>>, vector<16x78xf32>
    %66 = vector.extract_strided_slice %3 {offsets = [0, 22], sizes = [4, 78], strides = [1, 1]} : vector<4x100xbf16> to vector<4x78xbf16>
    %cst_74 = arith.constant dense<0.000000e+00> : vector<16x78xf32>
    %67 = tpu.matmul %64, %66, %cst_74 {dimension_numbers = #tpu.dot_dimension_numbers<[1], [0], [0], [1], [0, 0, 1, 1], [], []>} : vector<16x4xbf16>, vector<4x78xbf16>, vector<16x78xf32> -> vector<16x78xf32>
    %68 = arith.addf %65, %67 : vector<16x78xf32>
    %c0_75 = arith.constant 0 : index
    %c0_76 = arith.constant 0 : index
    %69 = vector.load %arg13[%c0_75, %c0_76] : memref<16x100xf32, #tpu.memory_space<vmem>>, vector<16x78xf32>
    tpu.vector_store %arg13[%c0_75, %c0_76], %68 {strides = array<i32>} : memref<16x100xf32, #tpu.memory_space<vmem>>, vector<16x78xf32>,
    %c9 = arith.constant 9 : index
    %c0_77 = arith.constant 0 : index
    %c0_78 = arith.constant 0 : index
    %70 = vector.load %arg6[%c9, %c0_77, %c0_78] : memref<27x16x4xbf16, #tpu.memory_space<vmem>>, vector<1x16x4xbf16>
    %71 = vector.shape_cast %70 : vector<1x16x4xbf16> to vector<16x4xbf16>
    %c0_79 = arith.constant 0 : index
    %c0_80 = arith.constant 0 : index
    %72 = vector.load %arg13[%c0_79, %c0_80] : memref<16x100xf32, #tpu.memory_space<vmem>>, vector<16x100xf32>
    %cst_81 = arith.constant dense<0.000000e+00> : vector<16x100xf32>
    %73 = tpu.matmul %71, %5, %cst_81 {dimension_numbers = #tpu.dot_dimension_numbers<[1], [0], [0], [1], [0, 0, 1, 1], [], []>} : vector<16x4xbf16>, vector<4x100xbf16>, vector<16x100xf32> -> vector<16x100xf32>
    %74 = arith.addf %72, %73 : vector<16x100xf32>
    %c0_82 = arith.constant 0 : index
    %c0_83 = arith.constant 0 : index
    %75 = vector.load %arg13[%c0_82, %c0_83] : memref<16x100xf32, #tpu.memory_space<vmem>>, vector<16x100xf32>
    tpu.vector_store %arg13[%c0_82, %c0_83], %74 {strides = array<i32>} : memref<16x100xf32, #tpu.memory_space<vmem>>, vector<16x100xf32>,
    %c10 = arith.constant 10 : index
    %c0_84 = arith.constant 0 : index
    %c0_85 = arith.constant 0 : index
    %76 = vector.load %arg6[%c10, %c0_84, %c0_85] : memref<27x16x4xbf16, #tpu.memory_space<vmem>>, vector<1x16x4xbf16>
    %77 = vector.shape_cast %76 : vector<1x16x4xbf16> to vector<16x4xbf16>
    %c0_86 = arith.constant 0 : index
    %c0_87 = arith.constant 0 : index
    %78 = vector.load %arg13[%c0_86, %c0_87] : memref<16x100xf32, #tpu.memory_space<vmem>>, vector<16x99xf32>
    %79 = vector.extract_strided_slice %5 {offsets = [0, 1], sizes = [4, 99], strides = [1, 1]} : vector<4x100xbf16> to vector<4x99xbf16>
    %cst_88 = arith.constant dense<0.000000e+00> : vector<16x99xf32>
    %80 = tpu.matmul %77, %79, %cst_88 {dimension_numbers = #tpu.dot_dimension_numbers<[1], [0], [0], [1], [0, 0, 1, 1], [], []>} : vector<16x4xbf16>, vector<4x99xbf16>, vector<16x99xf32> -> vector<16x99xf32>
    %81 = arith.addf %78, %80 : vector<16x99xf32>
    %c0_89 = arith.constant 0 : index
    %c0_90 = arith.constant 0 : index
    %82 = vector.load %arg13[%c0_89, %c0_90] : memref<16x100xf32, #tpu.memory_space<vmem>>, vector<16x99xf32>
    tpu.vector_store %arg13[%c0_89, %c0_90], %81 {strides = array<i32>} : memref<16x100xf32, #tpu.memory_space<vmem>>, vector<16x99xf32>,
    %c11 = arith.constant 11 : index
    %c0_91 = arith.constant 0 : index
    %c0_92 = arith.constant 0 : index
    %83 = vector.load %arg6[%c11, %c0_91, %c0_92] : memref<27x16x4xbf16, #tpu.memory_space<vmem>>, vector<1x16x4xbf16>
    %84 = vector.shape_cast %83 : vector<1x16x4xbf16> to vector<16x4xbf16>
    %c0_93 = arith.constant 0 : index
    %c0_94 = arith.constant 0 : index
    %85 = vector.load %arg13[%c0_93, %c0_94] : memref<16x100xf32, #tpu.memory_space<vmem>>, vector<16x98xf32>
    %86 = vector.extract_strided_slice %5 {offsets = [0, 2], sizes = [4, 98], strides = [1, 1]} : vector<4x100xbf16> to vector<4x98xbf16>
    %cst_95 = arith.constant dense<0.000000e+00> : vector<16x98xf32>
    %87 = tpu.matmul %84, %86, %cst_95 {dimension_numbers = #tpu.dot_dimension_numbers<[1], [0], [0], [1], [0, 0, 1, 1], [], []>} : vector<16x4xbf16>, vector<4x98xbf16>, vector<16x98xf32> -> vector<16x98xf32>
    %88 = arith.addf %85, %87 : vector<16x98xf32>
    %c0_96 = arith.constant 0 : index
    %c0_97 = arith.constant 0 : index
    %89 = vector.load %arg13[%c0_96, %c0_97] : memref<16x100xf32, #tpu.memory_space<vmem>>, vector<16x98xf32>
    tpu.vector_store %arg13[%c0_96, %c0_97], %88 {strides = array<i32>} : memref<16x100xf32, #tpu.memory_space<vmem>>, vector<16x98xf32>,
    %c12 = arith.constant 12 : index
    %c0_98 = arith.constant 0 : index
    %c0_99 = arith.constant 0 : index
    %90 = vector.load %arg6[%c12, %c0_98, %c0_99] : memref<27x16x4xbf16, #tpu.memory_space<vmem>>, vector<1x16x4xbf16>
    %91 = vector.shape_cast %90 : vector<1x16x4xbf16> to vector<16x4xbf16>
    %c0_100 = arith.constant 0 : index
    %c0_101 = arith.constant 0 : index
    %92 = vector.load %arg13[%c0_100, %c0_101] : memref<16x100xf32, #tpu.memory_space<vmem>>, vector<16x90xf32>
    %93 = vector.extract_strided_slice %5 {offsets = [0, 10], sizes = [4, 90], strides = [1, 1]} : vector<4x100xbf16> to vector<4x90xbf16>
    %cst_102 = arith.constant dense<0.000000e+00> : vector<16x90xf32>
    %94 = tpu.matmul %91, %93, %cst_102 {dimension_numbers = #tpu.dot_dimension_numbers<[1], [0], [0], [1], [0, 0, 1, 1], [], []>} : vector<16x4xbf16>, vector<4x90xbf16>, vector<16x90xf32> -> vector<16x90xf32>
    %95 = arith.addf %92, %94 : vector<16x90xf32>
    %c0_103 = arith.constant 0 : index
    %c0_104 = arith.constant 0 : index
    %96 = vector.load %arg13[%c0_103, %c0_104] : memref<16x100xf32, #tpu.memory_space<vmem>>, vector<16x90xf32>
    tpu.vector_store %arg13[%c0_103, %c0_104], %95 {strides = array<i32>} : memref<16x100xf32, #tpu.memory_space<vmem>>, vector<16x90xf32>,
    %c13 = arith.constant 13 : index
    %c0_105 = arith.constant 0 : index
    %c0_106 = arith.constant 0 : index
    %97 = vector.load %arg6[%c13, %c0_105, %c0_106] : memref<27x16x4xbf16, #tpu.memory_space<vmem>>, vector<1x16x4xbf16>
    %98 = vector.shape_cast %97 : vector<1x16x4xbf16> to vector<16x4xbf16>
    %c0_107 = arith.constant 0 : index
    %c0_108 = arith.constant 0 : index
    %99 = vector.load %arg13[%c0_107, %c0_108] : memref<16x100xf32, #tpu.memory_space<vmem>>, vector<16x89xf32>
    %100 = vector.extract_strided_slice %5 {offsets = [0, 11], sizes = [4, 89], strides = [1, 1]} : vector<4x100xbf16> to vector<4x89xbf16>
    %cst_109 = arith.constant dense<0.000000e+00> : vector<16x89xf32>
    %101 = tpu.matmul %98, %100, %cst_109 {dimension_numbers = #tpu.dot_dimension_numbers<[1], [0], [0], [1], [0, 0, 1, 1], [], []>} : vector<16x4xbf16>, vector<4x89xbf16>, vector<16x89xf32> -> vector<16x89xf32>
    %102 = arith.addf %99, %101 : vector<16x89xf32>
    %c0_110 = arith.constant 0 : index
    %c0_111 = arith.constant 0 : index
    %103 = vector.load %arg13[%c0_110, %c0_111] : memref<16x100xf32, #tpu.memory_space<vmem>>, vector<16x89xf32>
    tpu.vector_store %arg13[%c0_110, %c0_111], %102 {strides = array<i32>} : memref<16x100xf32, #tpu.memory_space<vmem>>, vector<16x89xf32>,
    %c14 = arith.constant 14 : index
    %c0_112 = arith.constant 0 : index
    %c0_113 = arith.constant 0 : index
    %104 = vector.load %arg6[%c14, %c0_112, %c0_113] : memref<27x16x4xbf16, #tpu.memory_space<vmem>>, vector<1x16x4xbf16>
    %105 = vector.shape_cast %104 : vector<1x16x4xbf16> to vector<16x4xbf16>
    %c0_114 = arith.constant 0 : index
    %c0_115 = arith.constant 0 : index
    %106 = vector.load %arg13[%c0_114, %c0_115] : memref<16x100xf32, #tpu.memory_space<vmem>>, vector<16x88xf32>
    %107 = vector.extract_strided_slice %5 {offsets = [0, 12], sizes = [4, 88], strides = [1, 1]} : vector<4x100xbf16> to vector<4x88xbf16>
    %cst_116 = arith.constant dense<0.000000e+00> : vector<16x88xf32>
    %108 = tpu.matmul %105, %107, %cst_116 {dimension_numbers = #tpu.dot_dimension_numbers<[1], [0], [0], [1], [0, 0, 1, 1], [], []>} : vector<16x4xbf16>, vector<4x88xbf16>, vector<16x88xf32> -> vector<16x88xf32>
    %109 = arith.addf %106, %108 : vector<16x88xf32>
    %c0_117 = arith.constant 0 : index
    %c0_118 = arith.constant 0 : index
    %110 = vector.load %arg13[%c0_117, %c0_118] : memref<16x100xf32, #tpu.memory_space<vmem>>, vector<16x88xf32>
    tpu.vector_store %arg13[%c0_117, %c0_118], %109 {strides = array<i32>} : memref<16x100xf32, #tpu.memory_space<vmem>>, vector<16x88xf32>,
    %c15 = arith.constant 15 : index
    %c0_119 = arith.constant 0 : index
    %c0_120 = arith.constant 0 : index
    %111 = vector.load %arg6[%c15, %c0_119, %c0_120] : memref<27x16x4xbf16, #tpu.memory_space<vmem>>, vector<1x16x4xbf16>
    %112 = vector.shape_cast %111 : vector<1x16x4xbf16> to vector<16x4xbf16>
    %c0_121 = arith.constant 0 : index
    %c0_122 = arith.constant 0 : index
    %113 = vector.load %arg13[%c0_121, %c0_122] : memref<16x100xf32, #tpu.memory_space<vmem>>, vector<16x80xf32>
    %114 = vector.extract_strided_slice %5 {offsets = [0, 20], sizes = [4, 80], strides = [1, 1]} : vector<4x100xbf16> to vector<4x80xbf16>
    %cst_123 = arith.constant dense<0.000000e+00> : vector<16x80xf32>
    %115 = tpu.matmul %112, %114, %cst_123 {dimension_numbers = #tpu.dot_dimension_numbers<[1], [0], [0], [1], [0, 0, 1, 1], [], []>} : vector<16x4xbf16>, vector<4x80xbf16>, vector<16x80xf32> -> vector<16x80xf32>
    %116 = arith.addf %113, %115 : vector<16x80xf32>
    %c0_124 = arith.constant 0 : index
    %c0_125 = arith.constant 0 : index
    %117 = vector.load %arg13[%c0_124, %c0_125] : memref<16x100xf32, #tpu.memory_space<vmem>>, vector<16x80xf32>
    tpu.vector_store %arg13[%c0_124, %c0_125], %116 {strides = array<i32>} : memref<16x100xf32, #tpu.memory_space<vmem>>, vector<16x80xf32>,
    %c16 = arith.constant 16 : index
    %c0_126 = arith.constant 0 : index
    %c0_127 = arith.constant 0 : index
    %118 = vector.load %arg6[%c16, %c0_126, %c0_127] : memref<27x16x4xbf16, #tpu.memory_space<vmem>>, vector<1x16x4xbf16>
    %119 = vector.shape_cast %118 : vector<1x16x4xbf16> to vector<16x4xbf16>
    %c0_128 = arith.constant 0 : index
    %c0_129 = arith.constant 0 : index
    %120 = vector.load %arg13[%c0_128, %c0_129] : memref<16x100xf32, #tpu.memory_space<vmem>>, vector<16x79xf32>
    %121 = vector.extract_strided_slice %5 {offsets = [0, 21], sizes = [4, 79], strides = [1, 1]} : vector<4x100xbf16> to vector<4x79xbf16>
    %cst_130 = arith.constant dense<0.000000e+00> : vector<16x79xf32>
    %122 = tpu.matmul %119, %121, %cst_130 {dimension_numbers = #tpu.dot_dimension_numbers<[1], [0], [0], [1], [0, 0, 1, 1], [], []>} : vector<16x4xbf16>, vector<4x79xbf16>, vector<16x79xf32> -> vector<16x79xf32>
    %123 = arith.addf %120, %122 : vector<16x79xf32>
    %c0_131 = arith.constant 0 : index
    %c0_132 = arith.constant 0 : index
    %124 = vector.load %arg13[%c0_131, %c0_132] : memref<16x100xf32, #tpu.memory_space<vmem>>, vector<16x79xf32>
    tpu.vector_store %arg13[%c0_131, %c0_132], %123 {strides = array<i32>} : memref<16x100xf32, #tpu.memory_space<vmem>>, vector<16x79xf32>,
    %c17 = arith.constant 17 : index
    %c0_133 = arith.constant 0 : index
    %c0_134 = arith.constant 0 : index
    %125 = vector.load %arg6[%c17, %c0_133, %c0_134] : memref<27x16x4xbf16, #tpu.memory_space<vmem>>, vector<1x16x4xbf16>
    %126 = vector.shape_cast %125 : vector<1x16x4xbf16> to vector<16x4xbf16>
    %c0_135 = arith.constant 0 : index
    %c0_136 = arith.constant 0 : index
    %127 = vector.load %arg13[%c0_135, %c0_136] : memref<16x100xf32, #tpu.memory_space<vmem>>, vector<16x78xf32>
    %128 = vector.extract_strided_slice %5 {offsets = [0, 22], sizes = [4, 78], strides = [1, 1]} : vector<4x100xbf16> to vector<4x78xbf16>
    %cst_137 = arith.constant dense<0.000000e+00> : vector<16x78xf32>
    %129 = tpu.matmul %126, %128, %cst_137 {dimension_numbers = #tpu.dot_dimension_numbers<[1], [0], [0], [1], [0, 0, 1, 1], [], []>} : vector<16x4xbf16>, vector<4x78xbf16>, vector<16x78xf32> -> vector<16x78xf32>
    %130 = arith.addf %127, %129 : vector<16x78xf32>
    %c0_138 = arith.constant 0 : index
    %c0_139 = arith.constant 0 : index
    %131 = vector.load %arg13[%c0_138, %c0_139] : memref<16x100xf32, #tpu.memory_space<vmem>>, vector<16x78xf32>
    tpu.vector_store %arg13[%c0_138, %c0_139], %130 {strides = array<i32>} : memref<16x100xf32, #tpu.memory_space<vmem>>, vector<16x78xf32>,
    %c18 = arith.constant 18 : index
    %c0_140 = arith.constant 0 : index
    %c0_141 = arith.constant 0 : index
    %132 = vector.load %arg6[%c18, %c0_140, %c0_141] : memref<27x16x4xbf16, #tpu.memory_space<vmem>>, vector<1x16x4xbf16>
    %133 = vector.shape_cast %132 : vector<1x16x4xbf16> to vector<16x4xbf16>
    %c0_142 = arith.constant 0 : index
    %c0_143 = arith.constant 0 : index
    %134 = vector.load %arg13[%c0_142, %c0_143] : memref<16x100xf32, #tpu.memory_space<vmem>>, vector<16x100xf32>
    %cst_144 = arith.constant dense<0.000000e+00> : vector<16x100xf32>
    %135 = tpu.matmul %133, %7, %cst_144 {dimension_numbers = #tpu.dot_dimension_numbers<[1], [0], [0], [1], [0, 0, 1, 1], [], []>} : vector<16x4xbf16>, vector<4x100xbf16>, vector<16x100xf32> -> vector<16x100xf32>
    %136 = arith.addf %134, %135 : vector<16x100xf32>
    %c0_145 = arith.constant 0 : index
    %c0_146 = arith.constant 0 : index
    %137 = vector.load %arg13[%c0_145, %c0_146] : memref<16x100xf32, #tpu.memory_space<vmem>>, vector<16x100xf32>
    tpu.vector_store %arg13[%c0_145, %c0_146], %136 {strides = array<i32>} : memref<16x100xf32, #tpu.memory_space<vmem>>, vector<16x100xf32>,
    %c19 = arith.constant 19 : index
    %c0_147 = arith.constant 0 : index
    %c0_148 = arith.constant 0 : index
    %138 = vector.load %arg6[%c19, %c0_147, %c0_148] : memref<27x16x4xbf16, #tpu.memory_space<vmem>>, vector<1x16x4xbf16>
    %139 = vector.shape_cast %138 : vector<1x16x4xbf16> to vector<16x4xbf16>
    %c0_149 = arith.constant 0 : index
    %c0_150 = arith.constant 0 : index
    %140 = vector.load %arg13[%c0_149, %c0_150] : memref<16x100xf32, #tpu.memory_space<vmem>>, vector<16x99xf32>
    %141 = vector.extract_strided_slice %7 {offsets = [0, 1], sizes = [4, 99], strides = [1, 1]} : vector<4x100xbf16> to vector<4x99xbf16>
    %cst_151 = arith.constant dense<0.000000e+00> : vector<16x99xf32>
    %142 = tpu.matmul %139, %141, %cst_151 {dimension_numbers = #tpu.dot_dimension_numbers<[1], [0], [0], [1], [0, 0, 1, 1], [], []>} : vector<16x4xbf16>, vector<4x99xbf16>, vector<16x99xf32> -> vector<16x99xf32>
    %143 = arith.addf %140, %142 : vector<16x99xf32>
    %c0_152 = arith.constant 0 : index
    %c0_153 = arith.constant 0 : index
    %144 = vector.load %arg13[%c0_152, %c0_153] : memref<16x100xf32, #tpu.memory_space<vmem>>, vector<16x99xf32>
    tpu.vector_store %arg13[%c0_152, %c0_153], %143 {strides = array<i32>} : memref<16x100xf32, #tpu.memory_space<vmem>>, vector<16x99xf32>,
    %c20 = arith.constant 20 : index
    %c0_154 = arith.constant 0 : index
    %c0_155 = arith.constant 0 : index
    %145 = vector.load %arg6[%c20, %c0_154, %c0_155] : memref<27x16x4xbf16, #tpu.memory_space<vmem>>, vector<1x16x4xbf16>
    %146 = vector.shape_cast %145 : vector<1x16x4xbf16> to vector<16x4xbf16>
    %c0_156 = arith.constant 0 : index
    %c0_157 = arith.constant 0 : index
    %147 = vector.load %arg13[%c0_156, %c0_157] : memref<16x100xf32, #tpu.memory_space<vmem>>, vector<16x98xf32>
    %148 = vector.extract_strided_slice %7 {offsets = [0, 2], sizes = [4, 98], strides = [1, 1]} : vector<4x100xbf16> to vector<4x98xbf16>
    %cst_158 = arith.constant dense<0.000000e+00> : vector<16x98xf32>
    %149 = tpu.matmul %146, %148, %cst_158 {dimension_numbers = #tpu.dot_dimension_numbers<[1], [0], [0], [1], [0, 0, 1, 1], [], []>} : vector<16x4xbf16>, vector<4x98xbf16>, vector<16x98xf32> -> vector<16x98xf32>
    %150 = arith.addf %147, %149 : vector<16x98xf32>
    %c0_159 = arith.constant 0 : index
    %c0_160 = arith.constant 0 : index
    %151 = vector.load %arg13[%c0_159, %c0_160] : memref<16x100xf32, #tpu.memory_space<vmem>>, vector<16x98xf32>
    tpu.vector_store %arg13[%c0_159, %c0_160], %150 {strides = array<i32>} : memref<16x100xf32, #tpu.memory_space<vmem>>, vector<16x98xf32>,
    %c21 = arith.constant 21 : index
    %c0_161 = arith.constant 0 : index
    %c0_162 = arith.constant 0 : index
    %152 = vector.load %arg6[%c21, %c0_161, %c0_162] : memref<27x16x4xbf16, #tpu.memory_space<vmem>>, vector<1x16x4xbf16>
    %153 = vector.shape_cast %152 : vector<1x16x4xbf16> to vector<16x4xbf16>
    %c0_163 = arith.constant 0 : index
    %c0_164 = arith.constant 0 : index
    %154 = vector.load %arg13[%c0_163, %c0_164] : memref<16x100xf32, #tpu.memory_space<vmem>>, vector<16x90xf32>
    %155 = vector.extract_strided_slice %7 {offsets = [0, 10], sizes = [4, 90], strides = [1, 1]} : vector<4x100xbf16> to vector<4x90xbf16>
    %cst_165 = arith.constant dense<0.000000e+00> : vector<16x90xf32>
    %156 = tpu.matmul %153, %155, %cst_165 {dimension_numbers = #tpu.dot_dimension_numbers<[1], [0], [0], [1], [0, 0, 1, 1], [], []>} : vector<16x4xbf16>, vector<4x90xbf16>, vector<16x90xf32> -> vector<16x90xf32>
    %157 = arith.addf %154, %156 : vector<16x90xf32>
    %c0_166 = arith.constant 0 : index
    %c0_167 = arith.constant 0 : index
    %158 = vector.load %arg13[%c0_166, %c0_167] : memref<16x100xf32, #tpu.memory_space<vmem>>, vector<16x90xf32>
    tpu.vector_store %arg13[%c0_166, %c0_167], %157 {strides = array<i32>} : memref<16x100xf32, #tpu.memory_space<vmem>>, vector<16x90xf32>,
    %c22 = arith.constant 22 : index
    %c0_168 = arith.constant 0 : index
    %c0_169 = arith.constant 0 : index
    %159 = vector.load %arg6[%c22, %c0_168, %c0_169] : memref<27x16x4xbf16, #tpu.memory_space<vmem>>, vector<1x16x4xbf16>
    %160 = vector.shape_cast %159 : vector<1x16x4xbf16> to vector<16x4xbf16>
    %c0_170 = arith.constant 0 : index
    %c0_171 = arith.constant 0 : index
    %161 = vector.load %arg13[%c0_170, %c0_171] : memref<16x100xf32, #tpu.memory_space<vmem>>, vector<16x89xf32>
    %162 = vector.extract_strided_slice %7 {offsets = [0, 11], sizes = [4, 89], strides = [1, 1]} : vector<4x100xbf16> to vector<4x89xbf16>
    %cst_172 = arith.constant dense<0.000000e+00> : vector<16x89xf32>
    %163 = tpu.matmul %160, %162, %cst_172 {dimension_numbers = #tpu.dot_dimension_numbers<[1], [0], [0], [1], [0, 0, 1, 1], [], []>} : vector<16x4xbf16>, vector<4x89xbf16>, vector<16x89xf32> -> vector<16x89xf32>
    %164 = arith.addf %161, %163 : vector<16x89xf32>
    %c0_173 = arith.constant 0 : index
    %c0_174 = arith.constant 0 : index
    %165 = vector.load %arg13[%c0_173, %c0_174] : memref<16x100xf32, #tpu.memory_space<vmem>>, vector<16x89xf32>
    tpu.vector_store %arg13[%c0_173, %c0_174], %164 {strides = array<i32>} : memref<16x100xf32, #tpu.memory_space<vmem>>, vector<16x89xf32>,
    %c23 = arith.constant 23 : index
    %c0_175 = arith.constant 0 : index
    %c0_176 = arith.constant 0 : index
    %166 = vector.load %arg6[%c23, %c0_175, %c0_176] : memref<27x16x4xbf16, #tpu.memory_space<vmem>>, vector<1x16x4xbf16>
    %167 = vector.shape_cast %166 : vector<1x16x4xbf16> to vector<16x4xbf16>
    %c0_177 = arith.constant 0 : index
    %c0_178 = arith.constant 0 : index
    %168 = vector.load %arg13[%c0_177, %c0_178] : memref<16x100xf32, #tpu.memory_space<vmem>>, vector<16x88xf32>
    %169 = vector.extract_strided_slice %7 {offsets = [0, 12], sizes = [4, 88], strides = [1, 1]} : vector<4x100xbf16> to vector<4x88xbf16>
    %cst_179 = arith.constant dense<0.000000e+00> : vector<16x88xf32>
    %170 = tpu.matmul %167, %169, %cst_179 {dimension_numbers = #tpu.dot_dimension_numbers<[1], [0], [0], [1], [0, 0, 1, 1], [], []>} : vector<16x4xbf16>, vector<4x88xbf16>, vector<16x88xf32> -> vector<16x88xf32>
    %171 = arith.addf %168, %170 : vector<16x88xf32>
    %c0_180 = arith.constant 0 : index
    %c0_181 = arith.constant 0 : index
    %172 = vector.load %arg13[%c0_180, %c0_181] : memref<16x100xf32, #tpu.memory_space<vmem>>, vector<16x88xf32>
    tpu.vector_store %arg13[%c0_180, %c0_181], %171 {strides = array<i32>} : memref<16x100xf32, #tpu.memory_space<vmem>>, vector<16x88xf32>,
    %c24 = arith.constant 24 : index
    %c0_182 = arith.constant 0 : index
    %c0_183 = arith.constant 0 : index
    %173 = vector.load %arg6[%c24, %c0_182, %c0_183] : memref<27x16x4xbf16, #tpu.memory_space<vmem>>, vector<1x16x4xbf16>
    %174 = vector.shape_cast %173 : vector<1x16x4xbf16> to vector<16x4xbf16>
    %c0_184 = arith.constant 0 : index
    %c0_185 = arith.constant 0 : index
    %175 = vector.load %arg13[%c0_184, %c0_185] : memref<16x100xf32, #tpu.memory_space<vmem>>, vector<16x80xf32>
    %176 = vector.extract_strided_slice %7 {offsets = [0, 20], sizes = [4, 80], strides = [1, 1]} : vector<4x100xbf16> to vector<4x80xbf16>
    %cst_186 = arith.constant dense<0.000000e+00> : vector<16x80xf32>
    %177 = tpu.matmul %174, %176, %cst_186 {dimension_numbers = #tpu.dot_dimension_numbers<[1], [0], [0], [1], [0, 0, 1, 1], [], []>} : vector<16x4xbf16>, vector<4x80xbf16>, vector<16x80xf32> -> vector<16x80xf32>
    %178 = arith.addf %175, %177 : vector<16x80xf32>
    %c0_187 = arith.constant 0 : index
    %c0_188 = arith.constant 0 : index
    %179 = vector.load %arg13[%c0_187, %c0_188] : memref<16x100xf32, #tpu.memory_space<vmem>>, vector<16x80xf32>
    tpu.vector_store %arg13[%c0_187, %c0_188], %178 {strides = array<i32>} : memref<16x100xf32, #tpu.memory_space<vmem>>, vector<16x80xf32>,
    %c25 = arith.constant 25 : index
    %c0_189 = arith.constant 0 : index
    %c0_190 = arith.constant 0 : index
    %180 = vector.load %arg6[%c25, %c0_189, %c0_190] : memref<27x16x4xbf16, #tpu.memory_space<vmem>>, vector<1x16x4xbf16>
    %181 = vector.shape_cast %180 : vector<1x16x4xbf16> to vector<16x4xbf16>
    %c0_191 = arith.constant 0 : index
    %c0_192 = arith.constant 0 : index
    %182 = vector.load %arg13[%c0_191, %c0_192] : memref<16x100xf32, #tpu.memory_space<vmem>>, vector<16x79xf32>
    %183 = vector.extract_strided_slice %7 {offsets = [0, 21], sizes = [4, 79], strides = [1, 1]} : vector<4x100xbf16> to vector<4x79xbf16>
    %cst_193 = arith.constant dense<0.000000e+00> : vector<16x79xf32>
    %184 = tpu.matmul %181, %183, %cst_193 {dimension_numbers = #tpu.dot_dimension_numbers<[1], [0], [0], [1], [0, 0, 1, 1], [], []>} : vector<16x4xbf16>, vector<4x79xbf16>, vector<16x79xf32> -> vector<16x79xf32>
    %185 = arith.addf %182, %184 : vector<16x79xf32>
    %c0_194 = arith.constant 0 : index
    %c0_195 = arith.constant 0 : index
    %186 = vector.load %arg13[%c0_194, %c0_195] : memref<16x100xf32, #tpu.memory_space<vmem>>, vector<16x79xf32>
    tpu.vector_store %arg13[%c0_194, %c0_195], %185 {strides = array<i32>} : memref<16x100xf32, #tpu.memory_space<vmem>>, vector<16x79xf32>,
    %c26 = arith.constant 26 : index
    %c0_196 = arith.constant 0 : index
    %c0_197 = arith.constant 0 : index
    %187 = vector.load %arg6[%c26, %c0_196, %c0_197] : memref<27x16x4xbf16, #tpu.memory_space<vmem>>, vector<1x16x4xbf16>
    %188 = vector.shape_cast %187 : vector<1x16x4xbf16> to vector<16x4xbf16>
    %c0_198 = arith.constant 0 : index
    %c0_199 = arith.constant 0 : index
    %189 = vector.load %arg13[%c0_198, %c0_199] : memref<16x100xf32, #tpu.memory_space<vmem>>, vector<16x78xf32>
    %190 = vector.extract_strided_slice %7 {offsets = [0, 22], sizes = [4, 78], strides = [1, 1]} : vector<4x100xbf16> to vector<4x78xbf16>
    %cst_200 = arith.constant dense<0.000000e+00> : vector<16x78xf32>
    %191 = tpu.matmul %188, %190, %cst_200 {dimension_numbers = #tpu.dot_dimension_numbers<[1], [0], [0], [1], [0, 0, 1, 1], [], []>} : vector<16x4xbf16>, vector<4x78xbf16>, vector<16x78xf32> -> vector<16x78xf32>
    %192 = arith.addf %189, %191 : vector<16x78xf32>
    %c0_201 = arith.constant 0 : index
    %c0_202 = arith.constant 0 : index
    %193 = vector.load %arg13[%c0_201, %c0_202] : memref<16x100xf32, #tpu.memory_space<vmem>>, vector<16x78xf32>
    tpu.vector_store %arg13[%c0_201, %c0_202], %192 {strides = array<i32>} : memref<16x100xf32, #tpu.memory_space<vmem>>, vector<16x78xf32>,
    %c0_203 = arith.constant 0 : index
    %c0_204 = arith.constant 0 : index
    %194 = vector.load %arg5[%c0_203, %c0_204] : memref<1x100xf32, #tpu.memory_space<vmem>>, vector<1x100xf32>
    %c0_205 = arith.constant 0 : index
    %c0_206 = arith.constant 0 : index
    %195 = vector.load %arg13[%c0_205, %c0_206] : memref<16x100xf32, #tpu.memory_space<vmem>>, vector<8x100xf32>
    %c0_207 = arith.constant 0 : index
    %c0_208 = arith.constant 0 : index
    %196 = vector.load %arg7[%c0_207, %c0_208] : memref<16x1xf32, #tpu.memory_space<vmem>>, vector<8x1xf32>
    %197 = vector.broadcast %196 : vector<8x1xf32> to vector<8x100xf32>
    %198 = arith.addf %195, %197 : vector<8x100xf32>
    %c8_209 = arith.constant 8 : index
    %c0_210 = arith.constant 0 : index
    %199 = vector.load %arg13[%c8_209, %c0_210] : memref<16x100xf32, #tpu.memory_space<vmem>>, vector<8x100xf32>
    %c8_211 = arith.constant 8 : index
    %c0_212 = arith.constant 0 : index
    %200 = vector.load %arg7[%c8_211, %c0_212] : memref<16x1xf32, #tpu.memory_space<vmem>>, vector<8x1xf32>
    %201 = vector.broadcast %200 : vector<8x1xf32> to vector<8x100xf32>
    %202 = arith.addf %199, %201 : vector<8x100xf32>
    %cst_213 = arith.constant 0.000000e+00 : f32
    %203 = vector.broadcast %cst_213 : f32 to vector<8x100xf32>
    %204 = arith.maximumf %202, %203 : vector<8x100xf32>
    %c0_214 = arith.constant 0 : index
    %c0_215 = arith.constant 0 : index
    %205 = vector.load %arg8[%c0_214, %c0_215] : memref<8x8xbf16, #tpu.memory_space<vmem>>, vector<8x8xbf16>
    %206 = arith.truncf %204 : vector<8x100xf32> to vector<8x100xbf16>
    %cst_216 = arith.constant dense<0.000000e+00> : vector<8x100xf32>
    %207 = tpu.matmul %205, %206, %cst_216 {dimension_numbers = #tpu.dot_dimension_numbers<[1], [0], [0], [1], [0, 0, 1, 1], [], []>} : vector<8x8xbf16>, vector<8x100xbf16>, vector<8x100xf32> -> vector<8x100xf32>
    %c0_217 = arith.constant 0 : index
    %c0_218 = arith.constant 0 : index
    %208 = vector.load %arg9[%c0_217, %c0_218] : memref<8x1xf32, #tpu.memory_space<vmem>>, vector<8x1xf32>
    %209 = vector.broadcast %208 : vector<8x1xf32> to vector<8x100xf32>
    %210 = arith.addf %207, %209 : vector<8x100xf32>
    %cst_219 = arith.constant 0.000000e+00 : f32
    %211 = vector.broadcast %cst_219 : f32 to vector<8x100xf32>
    %212 = arith.subf %211, %210 : vector<8x100xf32>
    %213 = math.exp %212 : vector<8x100xf32>
    %cst_220 = arith.constant 1.000000e+00 : f32
    %214 = vector.broadcast %cst_220 : f32 to vector<8x100xf32>
    %215 = arith.addf %214, %213 : vector<8x100xf32>
    %216 = tpu.reciprocal %215 {approx = true} : vector<8x100xf32> -> vector<8x100xf32>
    %cst_221 = arith.constant 1.000000e+00 : f32
    %217 = vector.broadcast %cst_221 : f32 to vector<8x100xf32>
    %218 = arith.addf %216, %217 : vector<8x100xf32>
    %219 = vector.broadcast %194 : vector<1x100xf32> to vector<8x100xf32>
    %220 = arith.mulf %198, %219 : vector<8x100xf32>
    %cst_222 = arith.constant dense<0.000000e+00> : vector<8xf32>
    %221 = vector.multi_reduction <add>, %220, %cst_222 [1] : vector<8x100xf32> to vector<8xf32>
    %222 = vector.shape_cast %221 : vector<8xf32> to vector<8x1xf32>
    %c0_223 = arith.constant 0 : index
    %c0_224 = arith.constant 0 : index
    %c0_225 = arith.constant 0 : index
    %c0_226 = arith.constant 0 : index
    %223 = vector.load %arg12[%c0_223, %c0_224, %c0_225, %c0_226] : memref<1x1x8x2xf32, #tpu.memory_space<vmem>>, vector<1x1x8x1xf32>
    %224 = vector.shape_cast %223 : vector<1x1x8x1xf32> to vector<8x1xf32>
    %225 = vector.shape_cast %222 : vector<8x1xf32> to vector<1x1x8x1xf32>
    tpu.vector_store %arg12[%c0_223, %c0_224, %c0_225, %c0_226], %225 {strides = array<i32>} : memref<1x1x8x2xf32, #tpu.memory_space<vmem>>, vector<1x1x8x1xf32>,
    %226 = arith.mulf %198, %220 : vector<8x100xf32>
    %cst_227 = arith.constant dense<0.000000e+00> : vector<8xf32>
    %227 = vector.multi_reduction <add>, %226, %cst_227 [1] : vector<8x100xf32> to vector<8xf32>
    %228 = vector.shape_cast %227 : vector<8xf32> to vector<8x1xf32>
    %c0_228 = arith.constant 0 : index
    %c0_229 = arith.constant 0 : index
    %c0_230 = arith.constant 0 : index
    %c1_231 = arith.constant 1 : index
    %229 = vector.load %arg12[%c0_228, %c0_229, %c0_230, %c1_231] : memref<1x1x8x2xf32, #tpu.memory_space<vmem>>, vector<1x1x8x1xf32>
    %230 = vector.shape_cast %229 : vector<1x1x8x1xf32> to vector<8x1xf32>
    %231 = vector.shape_cast %228 : vector<8x1xf32> to vector<1x1x8x1xf32>
    tpu.vector_store %arg12[%c0_228, %c0_229, %c0_230, %c1_231], %231 {strides = array<i32>} : memref<1x1x8x2xf32, #tpu.memory_space<vmem>>, vector<1x1x8x1xf32>,
    %232 = arith.truncf %198 : vector<8x100xf32> to vector<8x100xbf16>
    %c0_232 = arith.constant 0 : index
    %c0_233 = arith.constant 0 : index
    %c0_234 = arith.constant 0 : index
    %c0_235 = arith.constant 0 : index
    %233 = vector.load %arg10[%c0_232, %c0_233, %c0_234, %c0_235] : memref<1x1x8x100xbf16, #tpu.memory_space<vmem>>, vector<1x1x8x100xbf16>
    %234 = vector.shape_cast %233 : vector<1x1x8x100xbf16> to vector<8x100xbf16>
    %235 = vector.shape_cast %232 : vector<8x100xbf16> to vector<1x1x8x100xbf16>
    tpu.vector_store %arg10[%c0_232, %c0_233, %c0_234, %c0_235], %235 {strides = array<i32>} : memref<1x1x8x100xbf16, #tpu.memory_space<vmem>>, vector<1x1x8x100xbf16>,
    %236 = arith.truncf %218 : vector<8x100xf32> to vector<8x100xbf16>
    %c0_236 = arith.constant 0 : index
    %c0_237 = arith.constant 0 : index
    %c0_238 = arith.constant 0 : index
    %c0_239 = arith.constant 0 : index
    %237 = vector.load %arg11[%c0_236, %c0_237, %c0_238, %c0_239] : memref<1x1x8x100xbf16, #tpu.memory_space<vmem>>, vector<1x1x8x100xbf16>
    %238 = vector.shape_cast %237 : vector<1x1x8x100xbf16> to vector<8x100xbf16>
    %239 = vector.shape_cast %236 : vector<8x100xbf16> to vector<1x1x8x100xbf16>
    tpu.vector_store %arg11[%c0_236, %c0_237, %c0_238, %c0_239], %239 {strides = array<i32>} : memref<1x1x8x100xbf16, #tpu.memory_space<vmem>>, vector<1x1x8x100xbf16>,
    return
  }
  func.func @transform_0(%arg0: i32, %arg1: i32) -> (i32, i32, i32, i32) {
    %c0_i32 = arith.constant 0 : i32
    %c0_i32_0 = arith.constant 0 : i32
    %c0_i32_1 = arith.constant 0 : i32
    return %arg0, %arg1, %c0_i32, %c0_i32_0 : i32, i32, i32, i32
  }
  func.func @transform_1(%arg0: i32, %arg1: i32) -> (i32, i32, i32, i32) {
    %c1_i32 = arith.constant 1 : i32
    %0 = arith.addi %arg1, %c1_i32 : i32
    %c0_i32 = arith.constant 0 : i32
    %c0_i32_0 = arith.constant 0 : i32
    %c0_i32_1 = arith.constant 0 : i32
    return %arg0, %0, %c0_i32, %c0_i32_0 : i32, i32, i32, i32
  }
  func.func @transform_2(%arg0: i32, %arg1: i32) -> (i32, i32, i32, i32) {
    %c2_i32 = arith.constant 2 : i32
    %0 = arith.addi %arg1, %c2_i32 : i32
    %c0_i32 = arith.constant 0 : i32
    %c0_i32_0 = arith.constant 0 : i32
    %c0_i32_1 = arith.constant 0 : i32
    return %arg0, %0, %c0_i32, %c0_i32_0 : i32, i32, i32, i32
  }
  func.func @transform_3(%arg0: i32, %arg1: i32) -> (i32, i32) {
    %c0_i32 = arith.constant 0 : i32
    %c0_i32_0 = arith.constant 0 : i32
    %c0_i32_1 = arith.constant 0 : i32
    return %c0_i32, %c0_i32_0 : i32, i32
  }
  func.func @transform_4(%arg0: i32, %arg1: i32) -> (i32, i32, i32) {
    %c0_i32 = arith.constant 0 : i32
    %c0_i32_0 = arith.constant 0 : i32
    %c0_i32_1 = arith.constant 0 : i32
    %c0_i32_2 = arith.constant 0 : i32
    return %c0_i32, %c0_i32_0, %c0_i32_1 : i32, i32, i32
  }
  func.func @transform_5(%arg0: i32, %arg1: i32) -> (i32, i32) {
    %c0_i32 = arith.constant 0 : i32
    %c0_i32_0 = arith.constant 0 : i32
    %c0_i32_1 = arith.constant 0 : i32
    return %c0_i32, %c0_i32_0 : i32, i32
  }
  func.func @transform_6(%arg0: i32, %arg1: i32) -> (i32, i32) {
    %c0_i32 = arith.constant 0 : i32
    %c0_i32_0 = arith.constant 0 : i32
    %c0_i32_1 = arith.constant 0 : i32
    return %c0_i32, %c0_i32_0 : i32, i32
  }
  func.func @transform_7(%arg0: i32, %arg1: i32) -> (i32, i32) {
    %c0_i32 = arith.constant 0 : i32
    %c0_i32_0 = arith.constant 0 : i32
    %c0_i32_1 = arith.constant 0 : i32
    return %c0_i32, %c0_i32_0 : i32, i32
  }
  func.func @transform_8(%arg0: i32, %arg1: i32) -> (i32, i32, i32, i32) {
    %c0_i32 = arith.constant 0 : i32
    %c0_i32_0 = arith.constant 0 : i32
    %c0_i32_1 = arith.constant 0 : i32
    return %arg0, %arg1, %c0_i32, %c0_i32_0 : i32, i32, i32, i32
  }
  func.func @transform_9(%arg0: i32, %arg1: i32) -> (i32, i32, i32, i32) {
    %c0_i32 = arith.constant 0 : i32
    %c0_i32_0 = arith.constant 0 : i32
    %c0_i32_1 = arith.constant 0 : i32
    return %arg0, %arg1, %c0_i32, %c0_i32_0 : i32, i32, i32, i32
  }
  func.func @transform_10(%arg0: i32, %arg1: i32) -> (i32, i32, i32, i32) {
    %c0_i32 = arith.constant 0 : i32
    %c0_i32_0 = arith.constant 0 : i32
    %c0_i32_1 = arith.constant 0 : i32
    return %arg0, %arg1, %c0_i32, %c0_i32_0 : i32, i32, i32, i32
  }
}

module attributes {stable_mosaic.version = 11 : i64} {
  func.func @_conv2_kernel(%arg0: i32, %arg1: i32, %arg2: memref<1x1x8x100xbf16, #tpu.memory_space<vmem>>, %arg3: memref<1x1x8x100xbf16, #tpu.memory_space<vmem>>, %arg4: memref<1x1x8x100xbf16, #tpu.memory_space<vmem>>, %arg5: memref<1x100xf32, #tpu.memory_space<vmem>>, %arg6: memref<8x1xf32, #tpu.memory_space<vmem>>, %arg7: memref<8x1xf32, #tpu.memory_space<vmem>>, %arg8: memref<27x8x8xbf16, #tpu.memory_space<vmem>>, %arg9: memref<8x1xf32, #tpu.memory_space<vmem>>, %arg10: memref<1x1x8x100xbf16, #tpu.memory_space<vmem>>, %arg11: memref<1x1x8x2xf32, #tpu.memory_space<vmem>>, %arg12: memref<8x100xf32, #tpu.memory_space<vmem>>) attributes {dimension_semantics = [#tpu.dimension_semantics<parallel>, #tpu.dimension_semantics<parallel>], iteration_bounds = array<i64: 2, 8>, scalar_prefetch = 0 : i64, scratch_operands = 1 : i64, tpu.core_type = #tpu.core_type<tc>, window_params = [{transform_indices = @transform_0, window_bounds = array<i64: 1, 1, 8, 100>}, {transform_indices = @transform_1, window_bounds = array<i64: 1, 1, 8, 100>}, {transform_indices = @transform_2, window_bounds = array<i64: 1, 1, 8, 100>}, {pipeline_mode = #tpu.pipeline_mode<synchronous>, transform_indices = @transform_3, window_bounds = array<i64: 1, 100>}, {pipeline_mode = #tpu.pipeline_mode<synchronous>, transform_indices = @transform_4, window_bounds = array<i64: 8, 1>}, {pipeline_mode = #tpu.pipeline_mode<synchronous>, transform_indices = @transform_5, window_bounds = array<i64: 8, 1>}, {pipeline_mode = #tpu.pipeline_mode<synchronous>, transform_indices = @transform_6, window_bounds = array<i64: 27, 8, 8>}, {pipeline_mode = #tpu.pipeline_mode<synchronous>, transform_indices = @transform_7, window_bounds = array<i64: 8, 1>}, {transform_indices = @transform_8, window_bounds = array<i64: 1, 1, 8, 100>}, {transform_indices = @transform_9, window_bounds = array<i64: 1, 1, 8, 2>}]} {
    %c0 = arith.constant 0 : index
    %c0_0 = arith.constant 0 : index
    %0 = vector.load %arg5[%c0, %c0_0] : memref<1x100xf32, #tpu.memory_space<vmem>>, vector<1x100xf32>
    %c0_1 = arith.constant 0 : index
    %c0_2 = arith.constant 0 : index
    %1 = vector.load %arg6[%c0_1, %c0_2] : memref<8x1xf32, #tpu.memory_space<vmem>>, vector<8x1xf32>
    %c0_3 = arith.constant 0 : index
    %c0_4 = arith.constant 0 : index
    %2 = vector.load %arg7[%c0_3, %c0_4] : memref<8x1xf32, #tpu.memory_space<vmem>>, vector<8x1xf32>
    %cst = arith.constant 0.000000e+00 : f32
    %3 = vector.broadcast %cst : f32 to vector<8x100xf32>
    %c0_5 = arith.constant 0 : index
    %c0_6 = arith.constant 0 : index
    %4 = vector.load %arg12[%c0_5, %c0_6] : memref<8x100xf32, #tpu.memory_space<vmem>>, vector<8x100xf32>
    tpu.vector_store %arg12[%c0_5, %c0_6], %3 {strides = array<i32>} : memref<8x100xf32, #tpu.memory_space<vmem>>, vector<8x100xf32>,
    %c0_7 = arith.constant 0 : index
    %c0_8 = arith.constant 0 : index
    %c0_9 = arith.constant 0 : index
    %c0_10 = arith.constant 0 : index
    %5 = vector.load %arg3[%c0_7, %c0_8, %c0_9, %c0_10] : memref<1x1x8x100xbf16, #tpu.memory_space<vmem>>, vector<1x1x8x100xbf16>
    %6 = vector.shape_cast %5 : vector<1x1x8x100xbf16> to vector<8x100xbf16>
    %7 = arith.extf %6 : vector<8x100xbf16> to vector<8x100xf32>
    %8 = vector.broadcast %1 : vector<8x1xf32> to vector<8x100xf32>
    %9 = arith.mulf %7, %8 : vector<8x100xf32>
    %10 = vector.broadcast %2 : vector<8x1xf32> to vector<8x100xf32>
    %11 = arith.addf %9, %10 : vector<8x100xf32>
    %cst_11 = arith.constant 0.000000e+00 : f32
    %12 = vector.broadcast %cst_11 : f32 to vector<8x100xf32>
    %13 = arith.maximumf %11, %12 : vector<8x100xf32>
    %14 = vector.broadcast %0 : vector<1x100xf32> to vector<8x100xf32>
    %15 = arith.mulf %13, %14 : vector<8x100xf32>
    %16 = arith.truncf %15 : vector<8x100xf32> to vector<8x100xbf16>
    %c9 = arith.constant 9 : index
    %c0_12 = arith.constant 0 : index
    %c0_13 = arith.constant 0 : index
    %17 = vector.load %arg8[%c9, %c0_12, %c0_13] : memref<27x8x8xbf16, #tpu.memory_space<vmem>>, vector<1x8x8xbf16>
    %18 = vector.shape_cast %17 : vector<1x8x8xbf16> to vector<8x8xbf16>
    %c0_14 = arith.constant 0 : index
    %c11 = arith.constant 11 : index
    %19 = vector.load %arg12[%c0_14, %c11] : memref<8x100xf32, #tpu.memory_space<vmem>>, vector<8x89xf32>
    %20 = vector.extract_strided_slice %16 {offsets = [0, 0], sizes = [8, 89], strides = [1, 1]} : vector<8x100xbf16> to vector<8x89xbf16>
    %cst_15 = arith.constant dense<0.000000e+00> : vector<8x89xf32>
    %21 = tpu.matmul %18, %20, %cst_15 {dimension_numbers = #tpu.dot_dimension_numbers<[1], [0], [0], [1], [0, 0, 1, 1], [], []>} : vector<8x8xbf16>, vector<8x89xbf16>, vector<8x89xf32> -> vector<8x89xf32>
    %22 = arith.addf %19, %21 : vector<8x89xf32>
    %c0_16 = arith.constant 0 : index
    %c11_17 = arith.constant 11 : index
    %23 = vector.load %arg12[%c0_16, %c11_17] : memref<8x100xf32, #tpu.memory_space<vmem>>, vector<8x89xf32>
    tpu.vector_store %arg12[%c0_16, %c11_17], %22 {strides = array<i32>} : memref<8x100xf32, #tpu.memory_space<vmem>>, vector<8x89xf32>,
    %c10 = arith.constant 10 : index
    %c0_18 = arith.constant 0 : index
    %c0_19 = arith.constant 0 : index
    %24 = vector.load %arg8[%c10, %c0_18, %c0_19] : memref<27x8x8xbf16, #tpu.memory_space<vmem>>, vector<1x8x8xbf16>
    %25 = vector.shape_cast %24 : vector<1x8x8xbf16> to vector<8x8xbf16>
    %c0_20 = arith.constant 0 : index
    %c10_21 = arith.constant 10 : index
    %26 = vector.load %arg12[%c0_20, %c10_21] : memref<8x100xf32, #tpu.memory_space<vmem>>, vector<8x90xf32>
    %27 = vector.extract_strided_slice %16 {offsets = [0, 0], sizes = [8, 90], strides = [1, 1]} : vector<8x100xbf16> to vector<8x90xbf16>
    %cst_22 = arith.constant dense<0.000000e+00> : vector<8x90xf32>
    %28 = tpu.matmul %25, %27, %cst_22 {dimension_numbers = #tpu.dot_dimension_numbers<[1], [0], [0], [1], [0, 0, 1, 1], [], []>} : vector<8x8xbf16>, vector<8x90xbf16>, vector<8x90xf32> -> vector<8x90xf32>
    %29 = arith.addf %26, %28 : vector<8x90xf32>
    %c0_23 = arith.constant 0 : index
    %c10_24 = arith.constant 10 : index
    %30 = vector.load %arg12[%c0_23, %c10_24] : memref<8x100xf32, #tpu.memory_space<vmem>>, vector<8x90xf32>
    tpu.vector_store %arg12[%c0_23, %c10_24], %29 {strides = array<i32>} : memref<8x100xf32, #tpu.memory_space<vmem>>, vector<8x90xf32>,
    %c11_25 = arith.constant 11 : index
    %c0_26 = arith.constant 0 : index
    %c0_27 = arith.constant 0 : index
    %31 = vector.load %arg8[%c11_25, %c0_26, %c0_27] : memref<27x8x8xbf16, #tpu.memory_space<vmem>>, vector<1x8x8xbf16>
    %32 = vector.shape_cast %31 : vector<1x8x8xbf16> to vector<8x8xbf16>
    %c0_28 = arith.constant 0 : index
    %c9_29 = arith.constant 9 : index
    %33 = vector.load %arg12[%c0_28, %c9_29] : memref<8x100xf32, #tpu.memory_space<vmem>>, vector<8x91xf32>
    %34 = vector.extract_strided_slice %16 {offsets = [0, 0], sizes = [8, 91], strides = [1, 1]} : vector<8x100xbf16> to vector<8x91xbf16>
    %cst_30 = arith.constant dense<0.000000e+00> : vector<8x91xf32>
    %35 = tpu.matmul %32, %34, %cst_30 {dimension_numbers = #tpu.dot_dimension_numbers<[1], [0], [0], [1], [0, 0, 1, 1], [], []>} : vector<8x8xbf16>, vector<8x91xbf16>, vector<8x91xf32> -> vector<8x91xf32>
    %36 = arith.addf %33, %35 : vector<8x91xf32>
    %c0_31 = arith.constant 0 : index
    %c9_32 = arith.constant 9 : index
    %37 = vector.load %arg12[%c0_31, %c9_32] : memref<8x100xf32, #tpu.memory_space<vmem>>, vector<8x91xf32>
    tpu.vector_store %arg12[%c0_31, %c9_32], %36 {strides = array<i32>} : memref<8x100xf32, #tpu.memory_space<vmem>>, vector<8x91xf32>,
    %c12 = arith.constant 12 : index
    %c0_33 = arith.constant 0 : index
    %c0_34 = arith.constant 0 : index
    %38 = vector.load %arg8[%c12, %c0_33, %c0_34] : memref<27x8x8xbf16, #tpu.memory_space<vmem>>, vector<1x8x8xbf16>
    %39 = vector.shape_cast %38 : vector<1x8x8xbf16> to vector<8x8xbf16>
    %c0_35 = arith.constant 0 : index
    %c1 = arith.constant 1 : index
    %40 = vector.load %arg12[%c0_35, %c1] : memref<8x100xf32, #tpu.memory_space<vmem>>, vector<8x99xf32>
    %41 = vector.extract_strided_slice %16 {offsets = [0, 0], sizes = [8, 99], strides = [1, 1]} : vector<8x100xbf16> to vector<8x99xbf16>
    %cst_36 = arith.constant dense<0.000000e+00> : vector<8x99xf32>
    %42 = tpu.matmul %39, %41, %cst_36 {dimension_numbers = #tpu.dot_dimension_numbers<[1], [0], [0], [1], [0, 0, 1, 1], [], []>} : vector<8x8xbf16>, vector<8x99xbf16>, vector<8x99xf32> -> vector<8x99xf32>
    %43 = arith.addf %40, %42 : vector<8x99xf32>
    %c0_37 = arith.constant 0 : index
    %c1_38 = arith.constant 1 : index
    %44 = vector.load %arg12[%c0_37, %c1_38] : memref<8x100xf32, #tpu.memory_space<vmem>>, vector<8x99xf32>
    tpu.vector_store %arg12[%c0_37, %c1_38], %43 {strides = array<i32>} : memref<8x100xf32, #tpu.memory_space<vmem>>, vector<8x99xf32>,
    %c13 = arith.constant 13 : index
    %c0_39 = arith.constant 0 : index
    %c0_40 = arith.constant 0 : index
    %45 = vector.load %arg8[%c13, %c0_39, %c0_40] : memref<27x8x8xbf16, #tpu.memory_space<vmem>>, vector<1x8x8xbf16>
    %46 = vector.shape_cast %45 : vector<1x8x8xbf16> to vector<8x8xbf16>
    %c0_41 = arith.constant 0 : index
    %c0_42 = arith.constant 0 : index
    %47 = vector.load %arg12[%c0_41, %c0_42] : memref<8x100xf32, #tpu.memory_space<vmem>>, vector<8x100xf32>
    %cst_43 = arith.constant dense<0.000000e+00> : vector<8x100xf32>
    %48 = tpu.matmul %46, %16, %cst_43 {dimension_numbers = #tpu.dot_dimension_numbers<[1], [0], [0], [1], [0, 0, 1, 1], [], []>} : vector<8x8xbf16>, vector<8x100xbf16>, vector<8x100xf32> -> vector<8x100xf32>
    %49 = arith.addf %47, %48 : vector<8x100xf32>
    %c0_44 = arith.constant 0 : index
    %c0_45 = arith.constant 0 : index
    %50 = vector.load %arg12[%c0_44, %c0_45] : memref<8x100xf32, #tpu.memory_space<vmem>>, vector<8x100xf32>
    tpu.vector_store %arg12[%c0_44, %c0_45], %49 {strides = array<i32>} : memref<8x100xf32, #tpu.memory_space<vmem>>, vector<8x100xf32>,
    %c14 = arith.constant 14 : index
    %c0_46 = arith.constant 0 : index
    %c0_47 = arith.constant 0 : index
    %51 = vector.load %arg8[%c14, %c0_46, %c0_47] : memref<27x8x8xbf16, #tpu.memory_space<vmem>>, vector<1x8x8xbf16>
    %52 = vector.shape_cast %51 : vector<1x8x8xbf16> to vector<8x8xbf16>
    %c0_48 = arith.constant 0 : index
    %c0_49 = arith.constant 0 : index
    %53 = vector.load %arg12[%c0_48, %c0_49] : memref<8x100xf32, #tpu.memory_space<vmem>>, vector<8x99xf32>
    %54 = vector.extract_strided_slice %16 {offsets = [0, 1], sizes = [8, 99], strides = [1, 1]} : vector<8x100xbf16> to vector<8x99xbf16>
    %cst_50 = arith.constant dense<0.000000e+00> : vector<8x99xf32>
    %55 = tpu.matmul %52, %54, %cst_50 {dimension_numbers = #tpu.dot_dimension_numbers<[1], [0], [0], [1], [0, 0, 1, 1], [], []>} : vector<8x8xbf16>, vector<8x99xbf16>, vector<8x99xf32> -> vector<8x99xf32>
    %56 = arith.addf %53, %55 : vector<8x99xf32>
    %c0_51 = arith.constant 0 : index
    %c0_52 = arith.constant 0 : index
    %57 = vector.load %arg12[%c0_51, %c0_52] : memref<8x100xf32, #tpu.memory_space<vmem>>, vector<8x99xf32>
    tpu.vector_store %arg12[%c0_51, %c0_52], %56 {strides = array<i32>} : memref<8x100xf32, #tpu.memory_space<vmem>>, vector<8x99xf32>,
    %c15 = arith.constant 15 : index
    %c0_53 = arith.constant 0 : index
    %c0_54 = arith.constant 0 : index
    %58 = vector.load %arg8[%c15, %c0_53, %c0_54] : memref<27x8x8xbf16, #tpu.memory_space<vmem>>, vector<1x8x8xbf16>
    %59 = vector.shape_cast %58 : vector<1x8x8xbf16> to vector<8x8xbf16>
    %c0_55 = arith.constant 0 : index
    %c0_56 = arith.constant 0 : index
    %60 = vector.load %arg12[%c0_55, %c0_56] : memref<8x100xf32, #tpu.memory_space<vmem>>, vector<8x91xf32>
    %61 = vector.extract_strided_slice %16 {offsets = [0, 9], sizes = [8, 91], strides = [1, 1]} : vector<8x100xbf16> to vector<8x91xbf16>
    %cst_57 = arith.constant dense<0.000000e+00> : vector<8x91xf32>
    %62 = tpu.matmul %59, %61, %cst_57 {dimension_numbers = #tpu.dot_dimension_numbers<[1], [0], [0], [1], [0, 0, 1, 1], [], []>} : vector<8x8xbf16>, vector<8x91xbf16>, vector<8x91xf32> -> vector<8x91xf32>
    %63 = arith.addf %60, %62 : vector<8x91xf32>
    %c0_58 = arith.constant 0 : index
    %c0_59 = arith.constant 0 : index
    %64 = vector.load %arg12[%c0_58, %c0_59] : memref<8x100xf32, #tpu.memory_space<vmem>>, vector<8x91xf32>
    tpu.vector_store %arg12[%c0_58, %c0_59], %63 {strides = array<i32>} : memref<8x100xf32, #tpu.memory_space<vmem>>, vector<8x91xf32>,
    %c16 = arith.constant 16 : index
    %c0_60 = arith.constant 0 : index
    %c0_61 = arith.constant 0 : index
    %65 = vector.load %arg8[%c16, %c0_60, %c0_61] : memref<27x8x8xbf16, #tpu.memory_space<vmem>>, vector<1x8x8xbf16>
    %66 = vector.shape_cast %65 : vector<1x8x8xbf16> to vector<8x8xbf16>
    %c0_62 = arith.constant 0 : index
    %c0_63 = arith.constant 0 : index
    %67 = vector.load %arg12[%c0_62, %c0_63] : memref<8x100xf32, #tpu.memory_space<vmem>>, vector<8x90xf32>
    %68 = vector.extract_strided_slice %16 {offsets = [0, 10], sizes = [8, 90], strides = [1, 1]} : vector<8x100xbf16> to vector<8x90xbf16>
    %cst_64 = arith.constant dense<0.000000e+00> : vector<8x90xf32>
    %69 = tpu.matmul %66, %68, %cst_64 {dimension_numbers = #tpu.dot_dimension_numbers<[1], [0], [0], [1], [0, 0, 1, 1], [], []>} : vector<8x8xbf16>, vector<8x90xbf16>, vector<8x90xf32> -> vector<8x90xf32>
    %70 = arith.addf %67, %69 : vector<8x90xf32>
    %c0_65 = arith.constant 0 : index
    %c0_66 = arith.constant 0 : index
    %71 = vector.load %arg12[%c0_65, %c0_66] : memref<8x100xf32, #tpu.memory_space<vmem>>, vector<8x90xf32>
    tpu.vector_store %arg12[%c0_65, %c0_66], %70 {strides = array<i32>} : memref<8x100xf32, #tpu.memory_space<vmem>>, vector<8x90xf32>,
    %c17 = arith.constant 17 : index
    %c0_67 = arith.constant 0 : index
    %c0_68 = arith.constant 0 : index
    %72 = vector.load %arg8[%c17, %c0_67, %c0_68] : memref<27x8x8xbf16, #tpu.memory_space<vmem>>, vector<1x8x8xbf16>
    %73 = vector.shape_cast %72 : vector<1x8x8xbf16> to vector<8x8xbf16>
    %c0_69 = arith.constant 0 : index
    %c0_70 = arith.constant 0 : index
    %74 = vector.load %arg12[%c0_69, %c0_70] : memref<8x100xf32, #tpu.memory_space<vmem>>, vector<8x89xf32>
    %75 = vector.extract_strided_slice %16 {offsets = [0, 11], sizes = [8, 89], strides = [1, 1]} : vector<8x100xbf16> to vector<8x89xbf16>
    %cst_71 = arith.constant dense<0.000000e+00> : vector<8x89xf32>
    %76 = tpu.matmul %73, %75, %cst_71 {dimension_numbers = #tpu.dot_dimension_numbers<[1], [0], [0], [1], [0, 0, 1, 1], [], []>} : vector<8x8xbf16>, vector<8x89xbf16>, vector<8x89xf32> -> vector<8x89xf32>
    %77 = arith.addf %74, %76 : vector<8x89xf32>
    %c0_72 = arith.constant 0 : index
    %c0_73 = arith.constant 0 : index
    %78 = vector.load %arg12[%c0_72, %c0_73] : memref<8x100xf32, #tpu.memory_space<vmem>>, vector<8x89xf32>
    tpu.vector_store %arg12[%c0_72, %c0_73], %77 {strides = array<i32>} : memref<8x100xf32, #tpu.memory_space<vmem>>, vector<8x89xf32>,
    %c0_i32 = arith.constant 0 : i32
    %79 = arith.cmpi sgt, %arg1, %c0_i32 : i32
    %80 = arith.extui %79 : i1 to i32
    %c0_i32_74 = arith.constant 0 : i32
    %81 = arith.cmpi ne, %80, %c0_i32_74 : i32
    scf.if %81 {
      %c0_94 = arith.constant 0 : index
      %c0_95 = arith.constant 0 : index
      %c0_96 = arith.constant 0 : index
      %c0_97 = arith.constant 0 : index
      %106 = vector.load %arg2[%c0_94, %c0_95, %c0_96, %c0_97] : memref<1x1x8x100xbf16, #tpu.memory_space<vmem>>, vector<1x1x8x100xbf16>
      %107 = vector.shape_cast %106 : vector<1x1x8x100xbf16> to vector<8x100xbf16>
      %108 = arith.extf %107 : vector<8x100xbf16> to vector<8x100xf32>
      %109 = vector.broadcast %1 : vector<8x1xf32> to vector<8x100xf32>
      %110 = arith.mulf %108, %109 : vector<8x100xf32>
      %111 = vector.broadcast %2 : vector<8x1xf32> to vector<8x100xf32>
      %112 = arith.addf %110, %111 : vector<8x100xf32>
      %cst_98 = arith.constant 0.000000e+00 : f32
      %113 = vector.broadcast %cst_98 : f32 to vector<8x100xf32>
      %114 = arith.maximumf %112, %113 : vector<8x100xf32>
      %115 = vector.broadcast %0 : vector<1x100xf32> to vector<8x100xf32>
      %116 = arith.mulf %114, %115 : vector<8x100xf32>
      %117 = arith.truncf %116 : vector<8x100xf32> to vector<8x100xbf16>
      %c0_99 = arith.constant 0 : index
      %c0_100 = arith.constant 0 : index
      %c0_101 = arith.constant 0 : index
      %118 = vector.load %arg8[%c0_99, %c0_100, %c0_101] : memref<27x8x8xbf16, #tpu.memory_space<vmem>>, vector<1x8x8xbf16>
      %119 = vector.shape_cast %118 : vector<1x8x8xbf16> to vector<8x8xbf16>
      %c0_102 = arith.constant 0 : index
      %c11_103 = arith.constant 11 : index
      %120 = vector.load %arg12[%c0_102, %c11_103] : memref<8x100xf32, #tpu.memory_space<vmem>>, vector<8x89xf32>
      %121 = vector.extract_strided_slice %117 {offsets = [0, 0], sizes = [8, 89], strides = [1, 1]} : vector<8x100xbf16> to vector<8x89xbf16>
      %cst_104 = arith.constant dense<0.000000e+00> : vector<8x89xf32>
      %122 = tpu.matmul %119, %121, %cst_104 {dimension_numbers = #tpu.dot_dimension_numbers<[1], [0], [0], [1], [0, 0, 1, 1], [], []>} : vector<8x8xbf16>, vector<8x89xbf16>, vector<8x89xf32> -> vector<8x89xf32>
      %123 = arith.addf %120, %122 : vector<8x89xf32>
      %c0_105 = arith.constant 0 : index
      %c11_106 = arith.constant 11 : index
      %124 = vector.load %arg12[%c0_105, %c11_106] : memref<8x100xf32, #tpu.memory_space<vmem>>, vector<8x89xf32>
      tpu.vector_store %arg12[%c0_105, %c11_106], %123 {strides = array<i32>} : memref<8x100xf32, #tpu.memory_space<vmem>>, vector<8x89xf32>,
      %c1_107 = arith.constant 1 : index
      %c0_108 = arith.constant 0 : index
      %c0_109 = arith.constant 0 : index
      %125 = vector.load %arg8[%c1_107, %c0_108, %c0_109] : memref<27x8x8xbf16, #tpu.memory_space<vmem>>, vector<1x8x8xbf16>
      %126 = vector.shape_cast %125 : vector<1x8x8xbf16> to vector<8x8xbf16>
      %c0_110 = arith.constant 0 : index
      %c10_111 = arith.constant 10 : index
      %127 = vector.load %arg12[%c0_110, %c10_111] : memref<8x100xf32, #tpu.memory_space<vmem>>, vector<8x90xf32>
      %128 = vector.extract_strided_slice %117 {offsets = [0, 0], sizes = [8, 90], strides = [1, 1]} : vector<8x100xbf16> to vector<8x90xbf16>
      %cst_112 = arith.constant dense<0.000000e+00> : vector<8x90xf32>
      %129 = tpu.matmul %126, %128, %cst_112 {dimension_numbers = #tpu.dot_dimension_numbers<[1], [0], [0], [1], [0, 0, 1, 1], [], []>} : vector<8x8xbf16>, vector<8x90xbf16>, vector<8x90xf32> -> vector<8x90xf32>
      %130 = arith.addf %127, %129 : vector<8x90xf32>
      %c0_113 = arith.constant 0 : index
      %c10_114 = arith.constant 10 : index
      %131 = vector.load %arg12[%c0_113, %c10_114] : memref<8x100xf32, #tpu.memory_space<vmem>>, vector<8x90xf32>
      tpu.vector_store %arg12[%c0_113, %c10_114], %130 {strides = array<i32>} : memref<8x100xf32, #tpu.memory_space<vmem>>, vector<8x90xf32>,
      %c2 = arith.constant 2 : index
      %c0_115 = arith.constant 0 : index
      %c0_116 = arith.constant 0 : index
      %132 = vector.load %arg8[%c2, %c0_115, %c0_116] : memref<27x8x8xbf16, #tpu.memory_space<vmem>>, vector<1x8x8xbf16>
      %133 = vector.shape_cast %132 : vector<1x8x8xbf16> to vector<8x8xbf16>
      %c0_117 = arith.constant 0 : index
      %c9_118 = arith.constant 9 : index
      %134 = vector.load %arg12[%c0_117, %c9_118] : memref<8x100xf32, #tpu.memory_space<vmem>>, vector<8x91xf32>
      %135 = vector.extract_strided_slice %117 {offsets = [0, 0], sizes = [8, 91], strides = [1, 1]} : vector<8x100xbf16> to vector<8x91xbf16>
      %cst_119 = arith.constant dense<0.000000e+00> : vector<8x91xf32>
      %136 = tpu.matmul %133, %135, %cst_119 {dimension_numbers = #tpu.dot_dimension_numbers<[1], [0], [0], [1], [0, 0, 1, 1], [], []>} : vector<8x8xbf16>, vector<8x91xbf16>, vector<8x91xf32> -> vector<8x91xf32>
      %137 = arith.addf %134, %136 : vector<8x91xf32>
      %c0_120 = arith.constant 0 : index
      %c9_121 = arith.constant 9 : index
      %138 = vector.load %arg12[%c0_120, %c9_121] : memref<8x100xf32, #tpu.memory_space<vmem>>, vector<8x91xf32>
      tpu.vector_store %arg12[%c0_120, %c9_121], %137 {strides = array<i32>} : memref<8x100xf32, #tpu.memory_space<vmem>>, vector<8x91xf32>,
      %c3 = arith.constant 3 : index
      %c0_122 = arith.constant 0 : index
      %c0_123 = arith.constant 0 : index
      %139 = vector.load %arg8[%c3, %c0_122, %c0_123] : memref<27x8x8xbf16, #tpu.memory_space<vmem>>, vector<1x8x8xbf16>
      %140 = vector.shape_cast %139 : vector<1x8x8xbf16> to vector<8x8xbf16>
      %c0_124 = arith.constant 0 : index
      %c1_125 = arith.constant 1 : index
      %141 = vector.load %arg12[%c0_124, %c1_125] : memref<8x100xf32, #tpu.memory_space<vmem>>, vector<8x99xf32>
      %142 = vector.extract_strided_slice %117 {offsets = [0, 0], sizes = [8, 99], strides = [1, 1]} : vector<8x100xbf16> to vector<8x99xbf16>
      %cst_126 = arith.constant dense<0.000000e+00> : vector<8x99xf32>
      %143 = tpu.matmul %140, %142, %cst_126 {dimension_numbers = #tpu.dot_dimension_numbers<[1], [0], [0], [1], [0, 0, 1, 1], [], []>} : vector<8x8xbf16>, vector<8x99xbf16>, vector<8x99xf32> -> vector<8x99xf32>
      %144 = arith.addf %141, %143 : vector<8x99xf32>
      %c0_127 = arith.constant 0 : index
      %c1_128 = arith.constant 1 : index
      %145 = vector.load %arg12[%c0_127, %c1_128] : memref<8x100xf32, #tpu.memory_space<vmem>>, vector<8x99xf32>
      tpu.vector_store %arg12[%c0_127, %c1_128], %144 {strides = array<i32>} : memref<8x100xf32, #tpu.memory_space<vmem>>, vector<8x99xf32>,
      %c4 = arith.constant 4 : index
      %c0_129 = arith.constant 0 : index
      %c0_130 = arith.constant 0 : index
      %146 = vector.load %arg8[%c4, %c0_129, %c0_130] : memref<27x8x8xbf16, #tpu.memory_space<vmem>>, vector<1x8x8xbf16>
      %147 = vector.shape_cast %146 : vector<1x8x8xbf16> to vector<8x8xbf16>
      %c0_131 = arith.constant 0 : index
      %c0_132 = arith.constant 0 : index
      %148 = vector.load %arg12[%c0_131, %c0_132] : memref<8x100xf32, #tpu.memory_space<vmem>>, vector<8x100xf32>
      %cst_133 = arith.constant dense<0.000000e+00> : vector<8x100xf32>
      %149 = tpu.matmul %147, %117, %cst_133 {dimension_numbers = #tpu.dot_dimension_numbers<[1], [0], [0], [1], [0, 0, 1, 1], [], []>} : vector<8x8xbf16>, vector<8x100xbf16>, vector<8x100xf32> -> vector<8x100xf32>
      %150 = arith.addf %148, %149 : vector<8x100xf32>
      %c0_134 = arith.constant 0 : index
      %c0_135 = arith.constant 0 : index
      %151 = vector.load %arg12[%c0_134, %c0_135] : memref<8x100xf32, #tpu.memory_space<vmem>>, vector<8x100xf32>
      tpu.vector_store %arg12[%c0_134, %c0_135], %150 {strides = array<i32>} : memref<8x100xf32, #tpu.memory_space<vmem>>, vector<8x100xf32>,
      %c5 = arith.constant 5 : index
      %c0_136 = arith.constant 0 : index
      %c0_137 = arith.constant 0 : index
      %152 = vector.load %arg8[%c5, %c0_136, %c0_137] : memref<27x8x8xbf16, #tpu.memory_space<vmem>>, vector<1x8x8xbf16>
      %153 = vector.shape_cast %152 : vector<1x8x8xbf16> to vector<8x8xbf16>
      %c0_138 = arith.constant 0 : index
      %c0_139 = arith.constant 0 : index
      %154 = vector.load %arg12[%c0_138, %c0_139] : memref<8x100xf32, #tpu.memory_space<vmem>>, vector<8x99xf32>
      %155 = vector.extract_strided_slice %117 {offsets = [0, 1], sizes = [8, 99], strides = [1, 1]} : vector<8x100xbf16> to vector<8x99xbf16>
      %cst_140 = arith.constant dense<0.000000e+00> : vector<8x99xf32>
      %156 = tpu.matmul %153, %155, %cst_140 {dimension_numbers = #tpu.dot_dimension_numbers<[1], [0], [0], [1], [0, 0, 1, 1], [], []>} : vector<8x8xbf16>, vector<8x99xbf16>, vector<8x99xf32> -> vector<8x99xf32>
      %157 = arith.addf %154, %156 : vector<8x99xf32>
      %c0_141 = arith.constant 0 : index
      %c0_142 = arith.constant 0 : index
      %158 = vector.load %arg12[%c0_141, %c0_142] : memref<8x100xf32, #tpu.memory_space<vmem>>, vector<8x99xf32>
      tpu.vector_store %arg12[%c0_141, %c0_142], %157 {strides = array<i32>} : memref<8x100xf32, #tpu.memory_space<vmem>>, vector<8x99xf32>,
      %c6 = arith.constant 6 : index
      %c0_143 = arith.constant 0 : index
      %c0_144 = arith.constant 0 : index
      %159 = vector.load %arg8[%c6, %c0_143, %c0_144] : memref<27x8x8xbf16, #tpu.memory_space<vmem>>, vector<1x8x8xbf16>
      %160 = vector.shape_cast %159 : vector<1x8x8xbf16> to vector<8x8xbf16>
      %c0_145 = arith.constant 0 : index
      %c0_146 = arith.constant 0 : index
      %161 = vector.load %arg12[%c0_145, %c0_146] : memref<8x100xf32, #tpu.memory_space<vmem>>, vector<8x91xf32>
      %162 = vector.extract_strided_slice %117 {offsets = [0, 9], sizes = [8, 91], strides = [1, 1]} : vector<8x100xbf16> to vector<8x91xbf16>
      %cst_147 = arith.constant dense<0.000000e+00> : vector<8x91xf32>
      %163 = tpu.matmul %160, %162, %cst_147 {dimension_numbers = #tpu.dot_dimension_numbers<[1], [0], [0], [1], [0, 0, 1, 1], [], []>} : vector<8x8xbf16>, vector<8x91xbf16>, vector<8x91xf32> -> vector<8x91xf32>
      %164 = arith.addf %161, %163 : vector<8x91xf32>
      %c0_148 = arith.constant 0 : index
      %c0_149 = arith.constant 0 : index
      %165 = vector.load %arg12[%c0_148, %c0_149] : memref<8x100xf32, #tpu.memory_space<vmem>>, vector<8x91xf32>
      tpu.vector_store %arg12[%c0_148, %c0_149], %164 {strides = array<i32>} : memref<8x100xf32, #tpu.memory_space<vmem>>, vector<8x91xf32>,
      %c7 = arith.constant 7 : index
      %c0_150 = arith.constant 0 : index
      %c0_151 = arith.constant 0 : index
      %166 = vector.load %arg8[%c7, %c0_150, %c0_151] : memref<27x8x8xbf16, #tpu.memory_space<vmem>>, vector<1x8x8xbf16>
      %167 = vector.shape_cast %166 : vector<1x8x8xbf16> to vector<8x8xbf16>
      %c0_152 = arith.constant 0 : index
      %c0_153 = arith.constant 0 : index
      %168 = vector.load %arg12[%c0_152, %c0_153] : memref<8x100xf32, #tpu.memory_space<vmem>>, vector<8x90xf32>
      %169 = vector.extract_strided_slice %117 {offsets = [0, 10], sizes = [8, 90], strides = [1, 1]} : vector<8x100xbf16> to vector<8x90xbf16>
      %cst_154 = arith.constant dense<0.000000e+00> : vector<8x90xf32>
      %170 = tpu.matmul %167, %169, %cst_154 {dimension_numbers = #tpu.dot_dimension_numbers<[1], [0], [0], [1], [0, 0, 1, 1], [], []>} : vector<8x8xbf16>, vector<8x90xbf16>, vector<8x90xf32> -> vector<8x90xf32>
      %171 = arith.addf %168, %170 : vector<8x90xf32>
      %c0_155 = arith.constant 0 : index
      %c0_156 = arith.constant 0 : index
      %172 = vector.load %arg12[%c0_155, %c0_156] : memref<8x100xf32, #tpu.memory_space<vmem>>, vector<8x90xf32>
      tpu.vector_store %arg12[%c0_155, %c0_156], %171 {strides = array<i32>} : memref<8x100xf32, #tpu.memory_space<vmem>>, vector<8x90xf32>,
      %c8 = arith.constant 8 : index
      %c0_157 = arith.constant 0 : index
      %c0_158 = arith.constant 0 : index
      %173 = vector.load %arg8[%c8, %c0_157, %c0_158] : memref<27x8x8xbf16, #tpu.memory_space<vmem>>, vector<1x8x8xbf16>
      %174 = vector.shape_cast %173 : vector<1x8x8xbf16> to vector<8x8xbf16>
      %c0_159 = arith.constant 0 : index
      %c0_160 = arith.constant 0 : index
      %175 = vector.load %arg12[%c0_159, %c0_160] : memref<8x100xf32, #tpu.memory_space<vmem>>, vector<8x89xf32>
      %176 = vector.extract_strided_slice %117 {offsets = [0, 11], sizes = [8, 89], strides = [1, 1]} : vector<8x100xbf16> to vector<8x89xbf16>
      %cst_161 = arith.constant dense<0.000000e+00> : vector<8x89xf32>
      %177 = tpu.matmul %174, %176, %cst_161 {dimension_numbers = #tpu.dot_dimension_numbers<[1], [0], [0], [1], [0, 0, 1, 1], [], []>} : vector<8x8xbf16>, vector<8x89xbf16>, vector<8x89xf32> -> vector<8x89xf32>
      %178 = arith.addf %175, %177 : vector<8x89xf32>
      %c0_162 = arith.constant 0 : index
      %c0_163 = arith.constant 0 : index
      %179 = vector.load %arg12[%c0_162, %c0_163] : memref<8x100xf32, #tpu.memory_space<vmem>>, vector<8x89xf32>
      tpu.vector_store %arg12[%c0_162, %c0_163], %178 {strides = array<i32>} : memref<8x100xf32, #tpu.memory_space<vmem>>, vector<8x89xf32>,
    } else {
    }
    %c7_i32 = arith.constant 7 : i32
    %82 = arith.cmpi slt, %arg1, %c7_i32 : i32
    %83 = arith.extui %82 : i1 to i32
    %c0_i32_75 = arith.constant 0 : i32
    %84 = arith.cmpi ne, %83, %c0_i32_75 : i32
    scf.if %84 {
      %c0_94 = arith.constant 0 : index
      %c0_95 = arith.constant 0 : index
      %c0_96 = arith.constant 0 : index
      %c0_97 = arith.constant 0 : index
      %106 = vector.load %arg4[%c0_94, %c0_95, %c0_96, %c0_97] : memref<1x1x8x100xbf16, #tpu.memory_space<vmem>>, vector<1x1x8x100xbf16>
      %107 = vector.shape_cast %106 : vector<1x1x8x100xbf16> to vector<8x100xbf16>
      %108 = arith.extf %107 : vector<8x100xbf16> to vector<8x100xf32>
      %109 = vector.broadcast %1 : vector<8x1xf32> to vector<8x100xf32>
      %110 = arith.mulf %108, %109 : vector<8x100xf32>
      %111 = vector.broadcast %2 : vector<8x1xf32> to vector<8x100xf32>
      %112 = arith.addf %110, %111 : vector<8x100xf32>
      %cst_98 = arith.constant 0.000000e+00 : f32
      %113 = vector.broadcast %cst_98 : f32 to vector<8x100xf32>
      %114 = arith.maximumf %112, %113 : vector<8x100xf32>
      %115 = vector.broadcast %0 : vector<1x100xf32> to vector<8x100xf32>
      %116 = arith.mulf %114, %115 : vector<8x100xf32>
      %117 = arith.truncf %116 : vector<8x100xf32> to vector<8x100xbf16>
      %c18 = arith.constant 18 : index
      %c0_99 = arith.constant 0 : index
      %c0_100 = arith.constant 0 : index
      %118 = vector.load %arg8[%c18, %c0_99, %c0_100] : memref<27x8x8xbf16, #tpu.memory_space<vmem>>, vector<1x8x8xbf16>
      %119 = vector.shape_cast %118 : vector<1x8x8xbf16> to vector<8x8xbf16>
      %c0_101 = arith.constant 0 : index
      %c11_102 = arith.constant 11 : index
      %120 = vector.load %arg12[%c0_101, %c11_102] : memref<8x100xf32, #tpu.memory_space<vmem>>, vector<8x89xf32>
      %121 = vector.extract_strided_slice %117 {offsets = [0, 0], sizes = [8, 89], strides = [1, 1]} : vector<8x100xbf16> to vector<8x89xbf16>
      %cst_103 = arith.constant dense<0.000000e+00> : vector<8x89xf32>
      %122 = tpu.matmul %119, %121, %cst_103 {dimension_numbers = #tpu.dot_dimension_numbers<[1], [0], [0], [1], [0, 0, 1, 1], [], []>} : vector<8x8xbf16>, vector<8x89xbf16>, vector<8x89xf32> -> vector<8x89xf32>
      %123 = arith.addf %120, %122 : vector<8x89xf32>
      %c0_104 = arith.constant 0 : index
      %c11_105 = arith.constant 11 : index
      %124 = vector.load %arg12[%c0_104, %c11_105] : memref<8x100xf32, #tpu.memory_space<vmem>>, vector<8x89xf32>
      tpu.vector_store %arg12[%c0_104, %c11_105], %123 {strides = array<i32>} : memref<8x100xf32, #tpu.memory_space<vmem>>, vector<8x89xf32>,
      %c19 = arith.constant 19 : index
      %c0_106 = arith.constant 0 : index
      %c0_107 = arith.constant 0 : index
      %125 = vector.load %arg8[%c19, %c0_106, %c0_107] : memref<27x8x8xbf16, #tpu.memory_space<vmem>>, vector<1x8x8xbf16>
      %126 = vector.shape_cast %125 : vector<1x8x8xbf16> to vector<8x8xbf16>
      %c0_108 = arith.constant 0 : index
      %c10_109 = arith.constant 10 : index
      %127 = vector.load %arg12[%c0_108, %c10_109] : memref<8x100xf32, #tpu.memory_space<vmem>>, vector<8x90xf32>
      %128 = vector.extract_strided_slice %117 {offsets = [0, 0], sizes = [8, 90], strides = [1, 1]} : vector<8x100xbf16> to vector<8x90xbf16>
      %cst_110 = arith.constant dense<0.000000e+00> : vector<8x90xf32>
      %129 = tpu.matmul %126, %128, %cst_110 {dimension_numbers = #tpu.dot_dimension_numbers<[1], [0], [0], [1], [0, 0, 1, 1], [], []>} : vector<8x8xbf16>, vector<8x90xbf16>, vector<8x90xf32> -> vector<8x90xf32>
      %130 = arith.addf %127, %129 : vector<8x90xf32>
      %c0_111 = arith.constant 0 : index
      %c10_112 = arith.constant 10 : index
      %131 = vector.load %arg12[%c0_111, %c10_112] : memref<8x100xf32, #tpu.memory_space<vmem>>, vector<8x90xf32>
      tpu.vector_store %arg12[%c0_111, %c10_112], %130 {strides = array<i32>} : memref<8x100xf32, #tpu.memory_space<vmem>>, vector<8x90xf32>,
      %c20 = arith.constant 20 : index
      %c0_113 = arith.constant 0 : index
      %c0_114 = arith.constant 0 : index
      %132 = vector.load %arg8[%c20, %c0_113, %c0_114] : memref<27x8x8xbf16, #tpu.memory_space<vmem>>, vector<1x8x8xbf16>
      %133 = vector.shape_cast %132 : vector<1x8x8xbf16> to vector<8x8xbf16>
      %c0_115 = arith.constant 0 : index
      %c9_116 = arith.constant 9 : index
      %134 = vector.load %arg12[%c0_115, %c9_116] : memref<8x100xf32, #tpu.memory_space<vmem>>, vector<8x91xf32>
      %135 = vector.extract_strided_slice %117 {offsets = [0, 0], sizes = [8, 91], strides = [1, 1]} : vector<8x100xbf16> to vector<8x91xbf16>
      %cst_117 = arith.constant dense<0.000000e+00> : vector<8x91xf32>
      %136 = tpu.matmul %133, %135, %cst_117 {dimension_numbers = #tpu.dot_dimension_numbers<[1], [0], [0], [1], [0, 0, 1, 1], [], []>} : vector<8x8xbf16>, vector<8x91xbf16>, vector<8x91xf32> -> vector<8x91xf32>
      %137 = arith.addf %134, %136 : vector<8x91xf32>
      %c0_118 = arith.constant 0 : index
      %c9_119 = arith.constant 9 : index
      %138 = vector.load %arg12[%c0_118, %c9_119] : memref<8x100xf32, #tpu.memory_space<vmem>>, vector<8x91xf32>
      tpu.vector_store %arg12[%c0_118, %c9_119], %137 {strides = array<i32>} : memref<8x100xf32, #tpu.memory_space<vmem>>, vector<8x91xf32>,
      %c21 = arith.constant 21 : index
      %c0_120 = arith.constant 0 : index
      %c0_121 = arith.constant 0 : index
      %139 = vector.load %arg8[%c21, %c0_120, %c0_121] : memref<27x8x8xbf16, #tpu.memory_space<vmem>>, vector<1x8x8xbf16>
      %140 = vector.shape_cast %139 : vector<1x8x8xbf16> to vector<8x8xbf16>
      %c0_122 = arith.constant 0 : index
      %c1_123 = arith.constant 1 : index
      %141 = vector.load %arg12[%c0_122, %c1_123] : memref<8x100xf32, #tpu.memory_space<vmem>>, vector<8x99xf32>
      %142 = vector.extract_strided_slice %117 {offsets = [0, 0], sizes = [8, 99], strides = [1, 1]} : vector<8x100xbf16> to vector<8x99xbf16>
      %cst_124 = arith.constant dense<0.000000e+00> : vector<8x99xf32>
      %143 = tpu.matmul %140, %142, %cst_124 {dimension_numbers = #tpu.dot_dimension_numbers<[1], [0], [0], [1], [0, 0, 1, 1], [], []>} : vector<8x8xbf16>, vector<8x99xbf16>, vector<8x99xf32> -> vector<8x99xf32>
      %144 = arith.addf %141, %143 : vector<8x99xf32>
      %c0_125 = arith.constant 0 : index
      %c1_126 = arith.constant 1 : index
      %145 = vector.load %arg12[%c0_125, %c1_126] : memref<8x100xf32, #tpu.memory_space<vmem>>, vector<8x99xf32>
      tpu.vector_store %arg12[%c0_125, %c1_126], %144 {strides = array<i32>} : memref<8x100xf32, #tpu.memory_space<vmem>>, vector<8x99xf32>,
      %c22 = arith.constant 22 : index
      %c0_127 = arith.constant 0 : index
      %c0_128 = arith.constant 0 : index
      %146 = vector.load %arg8[%c22, %c0_127, %c0_128] : memref<27x8x8xbf16, #tpu.memory_space<vmem>>, vector<1x8x8xbf16>
      %147 = vector.shape_cast %146 : vector<1x8x8xbf16> to vector<8x8xbf16>
      %c0_129 = arith.constant 0 : index
      %c0_130 = arith.constant 0 : index
      %148 = vector.load %arg12[%c0_129, %c0_130] : memref<8x100xf32, #tpu.memory_space<vmem>>, vector<8x100xf32>
      %cst_131 = arith.constant dense<0.000000e+00> : vector<8x100xf32>
      %149 = tpu.matmul %147, %117, %cst_131 {dimension_numbers = #tpu.dot_dimension_numbers<[1], [0], [0], [1], [0, 0, 1, 1], [], []>} : vector<8x8xbf16>, vector<8x100xbf16>, vector<8x100xf32> -> vector<8x100xf32>
      %150 = arith.addf %148, %149 : vector<8x100xf32>
      %c0_132 = arith.constant 0 : index
      %c0_133 = arith.constant 0 : index
      %151 = vector.load %arg12[%c0_132, %c0_133] : memref<8x100xf32, #tpu.memory_space<vmem>>, vector<8x100xf32>
      tpu.vector_store %arg12[%c0_132, %c0_133], %150 {strides = array<i32>} : memref<8x100xf32, #tpu.memory_space<vmem>>, vector<8x100xf32>,
      %c23 = arith.constant 23 : index
      %c0_134 = arith.constant 0 : index
      %c0_135 = arith.constant 0 : index
      %152 = vector.load %arg8[%c23, %c0_134, %c0_135] : memref<27x8x8xbf16, #tpu.memory_space<vmem>>, vector<1x8x8xbf16>
      %153 = vector.shape_cast %152 : vector<1x8x8xbf16> to vector<8x8xbf16>
      %c0_136 = arith.constant 0 : index
      %c0_137 = arith.constant 0 : index
      %154 = vector.load %arg12[%c0_136, %c0_137] : memref<8x100xf32, #tpu.memory_space<vmem>>, vector<8x99xf32>
      %155 = vector.extract_strided_slice %117 {offsets = [0, 1], sizes = [8, 99], strides = [1, 1]} : vector<8x100xbf16> to vector<8x99xbf16>
      %cst_138 = arith.constant dense<0.000000e+00> : vector<8x99xf32>
      %156 = tpu.matmul %153, %155, %cst_138 {dimension_numbers = #tpu.dot_dimension_numbers<[1], [0], [0], [1], [0, 0, 1, 1], [], []>} : vector<8x8xbf16>, vector<8x99xbf16>, vector<8x99xf32> -> vector<8x99xf32>
      %157 = arith.addf %154, %156 : vector<8x99xf32>
      %c0_139 = arith.constant 0 : index
      %c0_140 = arith.constant 0 : index
      %158 = vector.load %arg12[%c0_139, %c0_140] : memref<8x100xf32, #tpu.memory_space<vmem>>, vector<8x99xf32>
      tpu.vector_store %arg12[%c0_139, %c0_140], %157 {strides = array<i32>} : memref<8x100xf32, #tpu.memory_space<vmem>>, vector<8x99xf32>,
      %c24 = arith.constant 24 : index
      %c0_141 = arith.constant 0 : index
      %c0_142 = arith.constant 0 : index
      %159 = vector.load %arg8[%c24, %c0_141, %c0_142] : memref<27x8x8xbf16, #tpu.memory_space<vmem>>, vector<1x8x8xbf16>
      %160 = vector.shape_cast %159 : vector<1x8x8xbf16> to vector<8x8xbf16>
      %c0_143 = arith.constant 0 : index
      %c0_144 = arith.constant 0 : index
      %161 = vector.load %arg12[%c0_143, %c0_144] : memref<8x100xf32, #tpu.memory_space<vmem>>, vector<8x91xf32>
      %162 = vector.extract_strided_slice %117 {offsets = [0, 9], sizes = [8, 91], strides = [1, 1]} : vector<8x100xbf16> to vector<8x91xbf16>
      %cst_145 = arith.constant dense<0.000000e+00> : vector<8x91xf32>
      %163 = tpu.matmul %160, %162, %cst_145 {dimension_numbers = #tpu.dot_dimension_numbers<[1], [0], [0], [1], [0, 0, 1, 1], [], []>} : vector<8x8xbf16>, vector<8x91xbf16>, vector<8x91xf32> -> vector<8x91xf32>
      %164 = arith.addf %161, %163 : vector<8x91xf32>
      %c0_146 = arith.constant 0 : index
      %c0_147 = arith.constant 0 : index
      %165 = vector.load %arg12[%c0_146, %c0_147] : memref<8x100xf32, #tpu.memory_space<vmem>>, vector<8x91xf32>
      tpu.vector_store %arg12[%c0_146, %c0_147], %164 {strides = array<i32>} : memref<8x100xf32, #tpu.memory_space<vmem>>, vector<8x91xf32>,
      %c25 = arith.constant 25 : index
      %c0_148 = arith.constant 0 : index
      %c0_149 = arith.constant 0 : index
      %166 = vector.load %arg8[%c25, %c0_148, %c0_149] : memref<27x8x8xbf16, #tpu.memory_space<vmem>>, vector<1x8x8xbf16>
      %167 = vector.shape_cast %166 : vector<1x8x8xbf16> to vector<8x8xbf16>
      %c0_150 = arith.constant 0 : index
      %c0_151 = arith.constant 0 : index
      %168 = vector.load %arg12[%c0_150, %c0_151] : memref<8x100xf32, #tpu.memory_space<vmem>>, vector<8x90xf32>
      %169 = vector.extract_strided_slice %117 {offsets = [0, 10], sizes = [8, 90], strides = [1, 1]} : vector<8x100xbf16> to vector<8x90xbf16>
      %cst_152 = arith.constant dense<0.000000e+00> : vector<8x90xf32>
      %170 = tpu.matmul %167, %169, %cst_152 {dimension_numbers = #tpu.dot_dimension_numbers<[1], [0], [0], [1], [0, 0, 1, 1], [], []>} : vector<8x8xbf16>, vector<8x90xbf16>, vector<8x90xf32> -> vector<8x90xf32>
      %171 = arith.addf %168, %170 : vector<8x90xf32>
      %c0_153 = arith.constant 0 : index
      %c0_154 = arith.constant 0 : index
      %172 = vector.load %arg12[%c0_153, %c0_154] : memref<8x100xf32, #tpu.memory_space<vmem>>, vector<8x90xf32>
      tpu.vector_store %arg12[%c0_153, %c0_154], %171 {strides = array<i32>} : memref<8x100xf32, #tpu.memory_space<vmem>>, vector<8x90xf32>,
      %c26 = arith.constant 26 : index
      %c0_155 = arith.constant 0 : index
      %c0_156 = arith.constant 0 : index
      %173 = vector.load %arg8[%c26, %c0_155, %c0_156] : memref<27x8x8xbf16, #tpu.memory_space<vmem>>, vector<1x8x8xbf16>
      %174 = vector.shape_cast %173 : vector<1x8x8xbf16> to vector<8x8xbf16>
      %c0_157 = arith.constant 0 : index
      %c0_158 = arith.constant 0 : index
      %175 = vector.load %arg12[%c0_157, %c0_158] : memref<8x100xf32, #tpu.memory_space<vmem>>, vector<8x89xf32>
      %176 = vector.extract_strided_slice %117 {offsets = [0, 11], sizes = [8, 89], strides = [1, 1]} : vector<8x100xbf16> to vector<8x89xbf16>
      %cst_159 = arith.constant dense<0.000000e+00> : vector<8x89xf32>
      %177 = tpu.matmul %174, %176, %cst_159 {dimension_numbers = #tpu.dot_dimension_numbers<[1], [0], [0], [1], [0, 0, 1, 1], [], []>} : vector<8x8xbf16>, vector<8x89xbf16>, vector<8x89xf32> -> vector<8x89xf32>
      %178 = arith.addf %175, %177 : vector<8x89xf32>
      %c0_160 = arith.constant 0 : index
      %c0_161 = arith.constant 0 : index
      %179 = vector.load %arg12[%c0_160, %c0_161] : memref<8x100xf32, #tpu.memory_space<vmem>>, vector<8x89xf32>
      tpu.vector_store %arg12[%c0_160, %c0_161], %178 {strides = array<i32>} : memref<8x100xf32, #tpu.memory_space<vmem>>, vector<8x89xf32>,
    } else {
    }
    %c0_76 = arith.constant 0 : index
    %c0_77 = arith.constant 0 : index
    %85 = vector.load %arg12[%c0_76, %c0_77] : memref<8x100xf32, #tpu.memory_space<vmem>>, vector<8x100xf32>
    %c0_78 = arith.constant 0 : index
    %c0_79 = arith.constant 0 : index
    %86 = vector.load %arg9[%c0_78, %c0_79] : memref<8x1xf32, #tpu.memory_space<vmem>>, vector<8x1xf32>
    %87 = vector.broadcast %86 : vector<8x1xf32> to vector<8x100xf32>
    %88 = arith.addf %85, %87 : vector<8x100xf32>
    %89 = vector.broadcast %0 : vector<1x100xf32> to vector<8x100xf32>
    %90 = arith.mulf %88, %89 : vector<8x100xf32>
    %cst_80 = arith.constant dense<0.000000e+00> : vector<8xf32>
    %91 = vector.multi_reduction <add>, %90, %cst_80 [1] : vector<8x100xf32> to vector<8xf32>
    %92 = vector.shape_cast %91 : vector<8xf32> to vector<8x1xf32>
    %c0_81 = arith.constant 0 : index
    %c0_82 = arith.constant 0 : index
    %c0_83 = arith.constant 0 : index
    %c0_84 = arith.constant 0 : index
    %93 = vector.load %arg11[%c0_81, %c0_82, %c0_83, %c0_84] : memref<1x1x8x2xf32, #tpu.memory_space<vmem>>, vector<1x1x8x1xf32>
    %94 = vector.shape_cast %93 : vector<1x1x8x1xf32> to vector<8x1xf32>
    %95 = vector.shape_cast %92 : vector<8x1xf32> to vector<1x1x8x1xf32>
    tpu.vector_store %arg11[%c0_81, %c0_82, %c0_83, %c0_84], %95 {strides = array<i32>} : memref<1x1x8x2xf32, #tpu.memory_space<vmem>>, vector<1x1x8x1xf32>,
    %96 = arith.mulf %88, %90 : vector<8x100xf32>
    %cst_85 = arith.constant dense<0.000000e+00> : vector<8xf32>
    %97 = vector.multi_reduction <add>, %96, %cst_85 [1] : vector<8x100xf32> to vector<8xf32>
    %98 = vector.shape_cast %97 : vector<8xf32> to vector<8x1xf32>
    %c0_86 = arith.constant 0 : index
    %c0_87 = arith.constant 0 : index
    %c0_88 = arith.constant 0 : index
    %c1_89 = arith.constant 1 : index
    %99 = vector.load %arg11[%c0_86, %c0_87, %c0_88, %c1_89] : memref<1x1x8x2xf32, #tpu.memory_space<vmem>>, vector<1x1x8x1xf32>
    %100 = vector.shape_cast %99 : vector<1x1x8x1xf32> to vector<8x1xf32>
    %101 = vector.shape_cast %98 : vector<8x1xf32> to vector<1x1x8x1xf32>
    tpu.vector_store %arg11[%c0_86, %c0_87, %c0_88, %c1_89], %101 {strides = array<i32>} : memref<1x1x8x2xf32, #tpu.memory_space<vmem>>, vector<1x1x8x1xf32>,
    %102 = arith.truncf %88 : vector<8x100xf32> to vector<8x100xbf16>
    %c0_90 = arith.constant 0 : index
    %c0_91 = arith.constant 0 : index
    %c0_92 = arith.constant 0 : index
    %c0_93 = arith.constant 0 : index
    %103 = vector.load %arg10[%c0_90, %c0_91, %c0_92, %c0_93] : memref<1x1x8x100xbf16, #tpu.memory_space<vmem>>, vector<1x1x8x100xbf16>
    %104 = vector.shape_cast %103 : vector<1x1x8x100xbf16> to vector<8x100xbf16>
    %105 = vector.shape_cast %102 : vector<8x100xbf16> to vector<1x1x8x100xbf16>
    tpu.vector_store %arg10[%c0_90, %c0_91, %c0_92, %c0_93], %105 {strides = array<i32>} : memref<1x1x8x100xbf16, #tpu.memory_space<vmem>>, vector<1x1x8x100xbf16>,
    return
  }
  func.func @transform_0(%arg0: i32, %arg1: i32) -> (i32, i32, i32, i32) {
    %c1_i32 = arith.constant 1 : i32
    %0 = arith.subi %arg1, %c1_i32 : i32
    %c0_i32 = arith.constant 0 : i32
    %1 = arith.maxsi %0, %c0_i32 : i32
    %c0_i32_0 = arith.constant 0 : i32
    %c0_i32_1 = arith.constant 0 : i32
    %c0_i32_2 = arith.constant 0 : i32
    return %arg0, %1, %c0_i32_0, %c0_i32_1 : i32, i32, i32, i32
  }
  func.func @transform_1(%arg0: i32, %arg1: i32) -> (i32, i32, i32, i32) {
    %c0_i32 = arith.constant 0 : i32
    %c0_i32_0 = arith.constant 0 : i32
    %c0_i32_1 = arith.constant 0 : i32
    return %arg0, %arg1, %c0_i32, %c0_i32_0 : i32, i32, i32, i32
  }
  func.func @transform_2(%arg0: i32, %arg1: i32) -> (i32, i32, i32, i32) {
    %c1_i32 = arith.constant 1 : i32
    %0 = arith.addi %arg1, %c1_i32 : i32
    %c7_i32 = arith.constant 7 : i32
    %1 = arith.minsi %0, %c7_i32 : i32
    %c0_i32 = arith.constant 0 : i32
    %c0_i32_0 = arith.constant 0 : i32
    %c0_i32_1 = arith.constant 0 : i32
    return %arg0, %1, %c0_i32, %c0_i32_0 : i32, i32, i32, i32
  }
  func.func @transform_3(%arg0: i32, %arg1: i32) -> (i32, i32) {
    %c0_i32 = arith.constant 0 : i32
    %c0_i32_0 = arith.constant 0 : i32
    %c0_i32_1 = arith.constant 0 : i32
    return %c0_i32, %c0_i32_0 : i32, i32
  }
  func.func @transform_4(%arg0: i32, %arg1: i32) -> (i32, i32) {
    %c0_i32 = arith.constant 0 : i32
    %c0_i32_0 = arith.constant 0 : i32
    %c0_i32_1 = arith.constant 0 : i32
    return %c0_i32, %c0_i32_0 : i32, i32
  }
  func.func @transform_5(%arg0: i32, %arg1: i32) -> (i32, i32) {
    %c0_i32 = arith.constant 0 : i32
    %c0_i32_0 = arith.constant 0 : i32
    %c0_i32_1 = arith.constant 0 : i32
    return %c0_i32, %c0_i32_0 : i32, i32
  }
  func.func @transform_6(%arg0: i32, %arg1: i32) -> (i32, i32, i32) {
    %c0_i32 = arith.constant 0 : i32
    %c0_i32_0 = arith.constant 0 : i32
    %c0_i32_1 = arith.constant 0 : i32
    %c0_i32_2 = arith.constant 0 : i32
    return %c0_i32, %c0_i32_0, %c0_i32_1 : i32, i32, i32
  }
  func.func @transform_7(%arg0: i32, %arg1: i32) -> (i32, i32) {
    %c0_i32 = arith.constant 0 : i32
    %c0_i32_0 = arith.constant 0 : i32
    %c0_i32_1 = arith.constant 0 : i32
    return %c0_i32, %c0_i32_0 : i32, i32
  }
  func.func @transform_8(%arg0: i32, %arg1: i32) -> (i32, i32, i32, i32) {
    %c0_i32 = arith.constant 0 : i32
    %c0_i32_0 = arith.constant 0 : i32
    %c0_i32_1 = arith.constant 0 : i32
    return %arg0, %arg1, %c0_i32, %c0_i32_0 : i32, i32, i32, i32
  }
  func.func @transform_9(%arg0: i32, %arg1: i32) -> (i32, i32, i32, i32) {
    %c0_i32 = arith.constant 0 : i32
    %c0_i32_0 = arith.constant 0 : i32
    %c0_i32_1 = arith.constant 0 : i32
    return %arg0, %arg1, %c0_i32, %c0_i32_0 : i32, i32, i32, i32
  }
}

module attributes {stable_mosaic.version = 11 : i64} {
  func.func @_tail_kernel(%arg0: i32, %arg1: i32, %arg2: memref<1x1x8x100xbf16, #tpu.memory_space<vmem>>, %arg3: memref<1x1x8x100xbf16, #tpu.memory_space<vmem>>, %arg4: memref<8x1xf32, #tpu.memory_space<vmem>>, %arg5: memref<8x1xf32, #tpu.memory_space<vmem>>, %arg6: memref<1x1x8x100xf32, #tpu.memory_space<vmem>>) attributes {dimension_semantics = [#tpu.dimension_semantics<parallel>, #tpu.dimension_semantics<parallel>], iteration_bounds = array<i64: 2, 8>, scalar_prefetch = 0 : i64, scratch_operands = 0 : i64, tpu.core_type = #tpu.core_type<tc>, window_params = [{transform_indices = @transform_0, window_bounds = array<i64: 1, 1, 8, 100>}, {transform_indices = @transform_1, window_bounds = array<i64: 1, 1, 8, 100>}, {pipeline_mode = #tpu.pipeline_mode<synchronous>, transform_indices = @transform_2, window_bounds = array<i64: 8, 1>}, {pipeline_mode = #tpu.pipeline_mode<synchronous>, transform_indices = @transform_3, window_bounds = array<i64: 8, 1>}, {transform_indices = @transform_4, window_bounds = array<i64: 1, 1, 8, 100>}]} {
    %c0 = arith.constant 0 : index
    %c0_0 = arith.constant 0 : index
    %c0_1 = arith.constant 0 : index
    %c0_2 = arith.constant 0 : index
    %0 = vector.load %arg2[%c0, %c0_0, %c0_1, %c0_2] : memref<1x1x8x100xbf16, #tpu.memory_space<vmem>>, vector<1x1x8x100xbf16>
    %1 = vector.shape_cast %0 : vector<1x1x8x100xbf16> to vector<8x100xbf16>
    %2 = arith.extf %1 : vector<8x100xbf16> to vector<8x100xf32>
    %c0_3 = arith.constant 0 : index
    %c0_4 = arith.constant 0 : index
    %3 = vector.load %arg4[%c0_3, %c0_4] : memref<8x1xf32, #tpu.memory_space<vmem>>, vector<8x1xf32>
    %4 = vector.broadcast %3 : vector<8x1xf32> to vector<8x100xf32>
    %5 = arith.mulf %2, %4 : vector<8x100xf32>
    %c0_5 = arith.constant 0 : index
    %c0_6 = arith.constant 0 : index
    %6 = vector.load %arg5[%c0_5, %c0_6] : memref<8x1xf32, #tpu.memory_space<vmem>>, vector<8x1xf32>
    %7 = vector.broadcast %6 : vector<8x1xf32> to vector<8x100xf32>
    %8 = arith.addf %5, %7 : vector<8x100xf32>
    %cst = arith.constant 0.000000e+00 : f32
    %9 = vector.broadcast %cst : f32 to vector<8x100xf32>
    %10 = arith.maximumf %8, %9 : vector<8x100xf32>
    %c0_7 = arith.constant 0 : index
    %c0_8 = arith.constant 0 : index
    %c0_9 = arith.constant 0 : index
    %c0_10 = arith.constant 0 : index
    %11 = vector.load %arg3[%c0_7, %c0_8, %c0_9, %c0_10] : memref<1x1x8x100xbf16, #tpu.memory_space<vmem>>, vector<1x1x8x100xbf16>
    %12 = vector.shape_cast %11 : vector<1x1x8x100xbf16> to vector<8x100xbf16>
    %13 = arith.extf %12 : vector<8x100xbf16> to vector<8x100xf32>
    %14 = arith.mulf %13, %10 : vector<8x100xf32>
    %c0_11 = arith.constant 0 : index
    %c0_12 = arith.constant 0 : index
    %c0_13 = arith.constant 0 : index
    %c0_14 = arith.constant 0 : index
    %15 = vector.load %arg6[%c0_11, %c0_12, %c0_13, %c0_14] : memref<1x1x8x100xf32, #tpu.memory_space<vmem>>, vector<1x1x8x100xf32>
    %16 = vector.shape_cast %15 : vector<1x1x8x100xf32> to vector<8x100xf32>
    %17 = vector.shape_cast %14 : vector<8x100xf32> to vector<1x1x8x100xf32>
    tpu.vector_store %arg6[%c0_11, %c0_12, %c0_13, %c0_14], %17 {strides = array<i32>} : memref<1x1x8x100xf32, #tpu.memory_space<vmem>>, vector<1x1x8x100xf32>,
    return
  }
  func.func @transform_0(%arg0: i32, %arg1: i32) -> (i32, i32, i32, i32) {
    %c0_i32 = arith.constant 0 : i32
    %c0_i32_0 = arith.constant 0 : i32
    %c0_i32_1 = arith.constant 0 : i32
    return %arg0, %arg1, %c0_i32, %c0_i32_0 : i32, i32, i32, i32
  }
  func.func @transform_1(%arg0: i32, %arg1: i32) -> (i32, i32, i32, i32) {
    %c0_i32 = arith.constant 0 : i32
    %c0_i32_0 = arith.constant 0 : i32
    %c0_i32_1 = arith.constant 0 : i32
    return %arg0, %arg1, %c0_i32, %c0_i32_0 : i32, i32, i32, i32
  }
  func.func @transform_2(%arg0: i32, %arg1: i32) -> (i32, i32) {
    %c0_i32 = arith.constant 0 : i32
    %c0_i32_0 = arith.constant 0 : i32
    %c0_i32_1 = arith.constant 0 : i32
    return %c0_i32, %c0_i32_0 : i32, i32
  }
  func.func @transform_3(%arg0: i32, %arg1: i32) -> (i32, i32) {
    %c0_i32 = arith.constant 0 : i32
    %c0_i32_0 = arith.constant 0 : i32
    %c0_i32_1 = arith.constant 0 : i32
    return %c0_i32, %c0_i32_0 : i32, i32
  }
  func.func @transform_4(%arg0: i32, %arg1: i32) -> (i32, i32, i32, i32) {
    %c0_i32 = arith.constant 0 : i32
    %c0_i32_0 = arith.constant 0 : i32
    %c0_i32_1 = arith.constant 0 : i32
    return %arg0, %arg1, %c0_i32, %c0_i32_0 : i32, i32, i32, i32
  }
}

</mosaic_0001>

<bundles_post_ra>
// kernel: _att_double_conv.5
= control target key start
LH: loop header
LB: loop body
LE: loop exit
PB: predicated region body
PF: predicated region fallthrough
CT: control target
= control target key end

     0   :  { %s507_s15 = smov 0   ;;  %s509_s16 = smov 0   ;;  %s567_s0 = inlined_call_operand.vmem [shape: bf16[2,8,8,100], index: 0, kind: input, shape index: {}]   ;;  %s568_s1 = inlined_call_operand.vmem [shape: bf16[2,8,8,100], index: 1, kind: input, shape index: {}]   ;;  %s569_s2 = inlined_call_operand.vmem [shape: f32[8,1], index: 2, kind: input, shape index: {}]   ;;  %s570_s3 = inlined_call_operand.vmem [shape: f32[8,1], index: 3, kind: input, shape index: {}]   ;;  %s571_s4 = inlined_call_operand.vmem [shape: f32[2,8,8,100], index: 4, kind: output, shape index: {}]  }
   0x1   :  { %s511_s17 = smov 0   ;;  %s513_s18 = smov 0  }
   0x2   :  { %s515_s19 = smov 0  }
   0x3 LB: > { %s23_s20 = sadd.s32 1, %s471_s17  ;;  %s26_s21 = sadd.s32 1, %s475_s18  ;;  %s479_s19 = sphi %s515_s19, %s14_s19   ;;  %s475_s18 = sphi %s513_s18, %s575_s18   ;;  %s471_s17 = sphi %s511_s17, %s574_s17   ;;  %s467_s16 = sphi %s509_s16, %s573_s16   ;;  %s463_s15 = sphi %s507_s15, %s572_s15  }
   0x4   : > { %p24_p0 = scmp.ge.s32.totalorder %s23_s20, 8  ;;  %p390_p1 = scmp.ge.s32.totalorder %s479_s19, 1 }
   0x5   : > { %p196_p2 = scmp.lt.s32.totalorder %s479_s19, 17 }
   0x6   : > { %s577_s20 = smov (%p24_p0, %s23_s20), 0  ;;  %s579_s21 = smov (!%p24_p0, %s26_s21), %s475_s18 }
   0x7   : > { %p197_p3 = pnand %p390_p1, %p196_p2  ;;  %p28_p4 = scmp.ge.s32.totalorder %s579_s21, 2 }
   0x8   : > { %v262_v0 = vld [vmem:[%s569_s2] sm:$0xff] (!%p197_p3)  ;;  %v481_v1 = vmov (!%p197_p3), 0   ;;  %p236_p5 = scmp.lt.s32.totalorder (!%p197_p3), %s467_s16, 1  ;;  %p238_p6 = scmp.lt.s32.totalorder (!%p197_p3), %s463_s15, 7  ;;  %vm280_vm0 = vcmask (!%p197_p3), 818176  }
   0x9   : > { %s581_s21 = smov (%p28_p4, %s579_s21), 0  ;;  %200 = sbr.rel (%p197_p3) target bundleno = 150 (0x96), region = 36 }
   0xa   : > { %440 = vset.pattern.permute.xlu0 (!%p197_p3), %v481_v1  ;;  %v269_v2 = vld [vmem:[%s570_s3] sm:$0xff] (!%p197_p3) }
   0xb   : > { %265 = vperm.xlu0 (!%p197_p3), %440, %v262_v0  }
   0xf   : > { %272 = vperm.xlu0 (!%p197_p3), %440, %v269_v2  }
  0x10   : > { %s583_s16 = smov (!%p236_p5, %s467_s16), 1  ;;  %s585_s15 = smov (!%p238_p6, %s463_s15), 7 }
  0x11   : > { %s391_s26 = sshll.u32 %s583_s16, 3 }
  0x12   : > { %s241_s27 = sadd.s32 %s391_s26, %s585_s15 }
  0x13   : > { %s392_s28 = sshll.u32 %s241_s27, 2  ;;  %s396_s9 = sshll.u32 %s241_s27, 3 }
  0x14   : > { %s243_s5 = scalar_lea.vmem %s567_s0, %s392_s28  ;;  %s251_s8 = scalar_lea.vmem %s568_s1, %s392_s28 }
  0x15   : > { %v260_v3 = vld [vmem:[%s243_s5] sm:$0xf]  ;;  %s259_s12 = scalar_lea.vmem %s571_s4, %s396_s9 }
  0x16   : > { %v261_v4 = vunpack.c.l.bf16 %v260_v3  ;;  %v277_v6 = vld [vmem:[%s251_s8] sm:$0xf] }
  0x17   : > { %v278_v10 = vunpack.c.l.bf16 %v277_v6 }
  0x8a   : > { %v266_v5 = vpop.permute.xlu0 %265 }
  0x8b   : > { %v268_v7 = vmul.f32 %v266_v5, %v261_v4 }
  0x8e   : > { %v273_v8 = vpop.permute.xlu0 %272 }
  0x8f   : > { %v275_v9 = vadd.f32 %v273_v8, %v268_v7 }
  0x91   : > { %v276_v11 = vmax.f32 %v275_v9, 0.0 }
  0x93   : > { %v279_v12 = vmul.f32 %v278_v10, %v276_v11 }
  0x95   : > { %281 = vst.msk [vmem:[%s259_s12] sm:$0xff] %vm280_vm0, %v279_v12 }
  0x96 PF: > { %s14_s19 = sadd.s32 1, %s479_s19   ;;  %s572_s15 = smov %s471_s17 }
  0x97   : > { %p11_p7 = scmp.ge.s32.totalorder %s14_s19, 18   ;;  %s573_s16 = smov %s475_s18 }
  0x98   : > { %s574_s17 = smov %s577_s20  ;;  %s575_s18 = smov %s581_s21 }
  0x99   :  { %13 = sbr.rel (!%p11_p7) target bundleno = 3 (0x3), region = 69 }

// kernel: _att_double_conv.4
= control target key start
LH: loop header
LB: loop body
LE: loop exit
PB: predicated region body
PF: predicated region fallthrough
CT: control target
= control target key end

     0   :  { %s2653_s30 = smov 0   ;;  %s2655_s10 = smov 0   ;;  %s3004_s0 = inlined_call_operand.vmem [shape: bf16[2,8,8,100], index: 0, kind: input, shape index: {}, may-alias: {0,1,2}]   ;;  %s3005_s1 = inlined_call_operand.vmem [shape: bf16[2,8,8,100], index: 1, kind: input, shape index: {}, may-alias: {0,1,2}]   ;;  %s3006_s2 = inlined_call_operand.vmem [shape: bf16[2,8,8,100], index: 2, kind: input, shape index: {}, may-alias: {0,1,2}]   ;;  %s3007_s3 = inlined_call_operand.vmem [shape: f32[1,100], index: 3, kind: input, shape index: {}]   ;;  %s3008_s4 = inlined_call_operand.vmem [shape: f32[8,1], index: 4, kind: input, shape index: {}]   ;;  %s3009_s5 = inlined_call_operand.vmem [shape: f32[8,1], index: 5, kind: input, shape index: {}]   ;;  %s3010_s6 = inlined_call_operand.vmem [shape: bf16[27,8,8], index: 6, kind: input, shape index: {}]   ;;  %s3011_s7 = inlined_call_operand.vmem [shape: f32[8,1], index: 7, kind: input, shape index: {}]   ;;  %s3012_s8 = inlined_call_operand.vmem [shape: bf16[2,8,8,100], index: 8, kind: output, shape index: {0}]   ;;  %s3013_s9 = inlined_call_operand.vmem [shape: f32[2,8,8,2], index: 9, kind: output, shape index: {1}]  }
   0x1   :  { %3014 = sst [smem:[#allocation3_spill]] %s3008_s4  ;;  %s2657_s11 = smov 0  }
   0x2   :  { %s2659_s12 = smov 0   ;;  %s2661_s13 = smov 0  }
   0x3 LB: > { %s29_s14 = sadd.s32 1, %s2562_s11  ;;  %s32_s15 = sadd.s32 1, %s2566_s12  ;;  %s2570_s13 = sphi %s2661_s13, %s20_s13   ;;  %s2566_s12 = sphi %s2659_s12, %s3020_s12   ;;  %s2562_s11 = sphi %s2657_s11, %s3019_s11   ;;  %s2558_s10 = sphi %s2655_s10, %s3018_s10   ;;  %s2554_s30 = sphi %s2653_s30, %s3017_s30  }
   0x4   : > { %p30_p0 = scmp.ge.s32.totalorder %s29_s14, 8  ;;  %p2163_p1 = scmp.ge.s32.totalorder %s2570_s13, 1 }
   0x5   : > { %p365_p2 = scmp.lt.s32.totalorder %s2570_s13, 17 }
   0x6   : > { %s3022_s14 = smov (%p30_p0, %s29_s14), 0  ;;  %s3024_s15 = smov (!%p30_p0, %s32_s15), %s2566_s12 }
   0x7   : > { %p366_p3 = pnand %p2163_p1, %p365_p2  ;;  %p34_p4 = scmp.ge.s32.totalorder %s3024_s15, 2 }
   0x8   : > { %s3015_s4 = sld [smem:[#allocation3_spill]] (!%p366_p3)  ;;  %p440_p5 = scmp.lt.s32.totalorder (!%p366_p3), %s2558_s10, 1  ;;  %v2572_v1 = vmov (!%p366_p3), 0   ;;  %v492_v2 = vld [vmem:[%s3009_s5] sm:$0xff] (!%p366_p3)  ;;  %v2573_v3 = vmov (!%p366_p3), 0.0   ;;  %vm2574_vm0 = vmmov (!%p366_p3), 0  }
   0x9   : > { %s3026_s15 = smov (%p34_p4, %s3024_s15), 0  ;;  %369 = sbr.rel (%p366_p3) target bundleno = 1504 (0x5e0), region = 52 }
   0xa   : > { %2530 = vset.pattern.permute.xlu0 (!%p366_p3), %v2572_v1  ;;  %s2164_s18 = sadd.s32 (!%p366_p3), 4294967295, %s2554_s30  ;;  %p453_p6 = scmp.lt.s32.totalorder (!%p366_p3), %s2554_s30, 7  ;;  %2297 = vmatprep.subr.bf16.mxu0 (!%p366_p3), %v2573_v3  ;;  %v2735_v10 = vld [vmem:[%s3007_s3] ss:$0 sm:$0xff] (!%p366_p3)  ;;  %vm525_vm1 = vcmask (!%p366_p3), 1043456   ;;  %vm521_vm2 = vcmask (!%p366_p3), 64512  }
   0xb   : > { %p438_p7 = scmp.gt.s32.totalorder (!%p366_p3), %s2164_s18, 0  ;;  %p2165_p8 = scmp.lt.s32.totalorder (!%p366_p3), %s2164_s18, 7  ;;  %2303 = vmatprep.subr.bf16.mxu1 (!%p366_p3), %v2573_v3  ;;  %2299 = vmatprep.mubr.msk.bf16.mxu0 (!%p366_p3), %vm2574_vm0, %v2573_v3  ;;  %v2184_v15 = vld [vmem:[%s3010_s6 + $0x24] sm:$0xf] (!%p366_p3)  ;;  %v2186_v16 = vld [vmem:[%s3010_s6 + $0x28] sm:$0xf] (!%p366_p3) }
   0xc   : > { %s459_s22 = sadd.s32 (!%p366_p3), 1, %s2554_s30  ;;  %2305 = vmatprep.mubr.msk.bf16.mxu1 (!%p366_p3), %vm2574_vm0, %v2573_v3  ;;  %s2576_s29 = smov (!%p366_p3), 127   ;;  %v2188_v17 = vld [vmem:[%s3010_s6 + $0x2c] sm:$0xf] (!%p366_p3)  ;;  %v2190_v18 = vld [vmem:[%s3010_s6 + $0x30] sm:$0xf] (!%p366_p3) }
   0xd   : > { %p460_p9 = scmp.lt.s32.totalorder (!%p366_p3), %s459_s22, 7  ;;  %s2578_s28 = smov (!%p366_p3), 117   ;;  %v2192_v19 = vld [vmem:[%s3010_s6 + $0x34] sm:$0xf] (!%p366_p3)  ;;  %vm493_vm3 = vcmask (!%p366_p3), 818176   ;;  %vm574_vm4 = vcmask (!%p366_p3), 818264  }
   0xe   : > { %v491_v0 = vld [vmem:[%s3015_s4] sm:$0xff] (!%p366_p3)  ;;  %s2575_s4 = smov (!%p366_p3), 118   ;;  %494 = vst.msk [vmem:[#allocation2] sm:$0xff] (!%p366_p3), %vm493_vm3, %v2573_v3  ;;  %v2194_v23 = vld [vmem:[%s3010_s6 + $0x38] sm:$0xf] (!%p366_p3)  ;;  %vm627_vm5 = vcmask (!%p366_p3), 818256  }
   0xf   : > { %499 = vperm.xlu0 (!%p366_p3), %2530, %v491_v0   ;;  %v2196_v27 = vld [vmem:[%s3010_s6 + $0x3c] sm:$0xf] (!%p366_p3)  ;;  %v2198_v30 = vld [vmem:[%s3010_s6 + $0x40] sm:$0xf] (!%p366_p3)  ;;  %v2200_v31 = vld [vmem:[%s3010_s6 + $0x44] sm:$0xf] (!%p366_p3) }
  0x10   : > { %s3028_s10 = smov (!%p440_p5, %s2558_s10), 1  ;;  %s3030_s18 = smov (!%p438_p7, %s2164_s18), 0  ;;  %vm680_vm6 = vcmask 818248   ;;  %vm733_vm7 = vcmask 818184   ;;  %vm836_vm8 = vcmask 809984   ;;  %vm890_vm9 = vcmask 744448  }
  0x11   : > { %s2170_s21 = sshll.u32 %s3028_s10, 3  ;;  %s3032_s18 = smov (!%p2165_p8, %s3030_s18), 7  ;;  %vm944_vm10 = vcmask 736256   ;;  %vm998_vm11 = vcmask 728064  }
  0x12   : > { %s454_s23 = scalar_select %p453_p6, %s2554_s30, 7 }
  0x13   : > { %505 = vperm.xlu0 %2530, %v492_v2   ;;  %s445_s24 = sadd.s32 %s3032_s18, %s2170_s21  ;;  %s3034_s22 = smov (!%p460_p9, %s459_s22), 7 }
  0x14   : > { %s2696_s25 = sshll.u32 %s445_s24, 2  ;;  %s456_s26 = sadd.s32 %s2170_s21, %s454_s23 }
  0x15   : > { %s2173_s16 = sshll.u32 %s456_s26, 2  ;;  %s2182_s10 = sshll.u32 %s456_s26, 3  ;;  %v520_v52 = vld [vmem:[#allocation2] sm:$0xff] }
  0x16   : > { %s2705_s20 = scalar_lea.vmem %s3012_s8, %s2173_s16  ;;  %s3036_s22 = smov (!%p460_p9, %s3034_s22), 7 }
  0x17   : > { %s2712_s24 = scalar_lea.vmem %s3013_s9, %s2182_s10  ;;  %s467_s27 = sadd.s32 %s2170_s21, %s3036_s22 }
  0x18   : > { %s2178_s26 = sshll.u32 %s467_s27, 2  ;;  %s458_s18 = scalar_lea.vmem %s3005_s1, %s2173_s16 }
  0x19   : > { %s2721_s19 = scalar_lea.vmem %s3006_s2, %s2178_s26  ;;  %v495_v4 = vld [vmem:[%s458_s18] sm:$0xf]  ;;  %s2577_s26 = smov 119  }
  0x1a   : > { %v496_v5 = vunpack.c.l.bf16 %v495_v4  ;;  %s2579_s21 = smov 11   ;;  %s2580_s22 = smov 10  }
  0x1b   : > { %p2202_p10 = scmp.le.s32.totalorder %s2554_s30, 0 }
  0x1c   : > { %s3016_s23 = scalar_lea.vmem (!%p2202_p10), %s3004_s0, %s2696_s25  ;;  %vm2584_vm12 = vmmov (!%p2202_p10), 0   ;;  %s2585_s25 = smov (!%p2202_p10), 127  }
  0x1d   : > { %s2586_s27 = smov (!%p2202_p10), 118   ;;  %s2590_s16 = smov (!%p2202_p10), 10  }
  0x1e   : > { %s2591_s10 = smov (!%p2202_p10), 9  }
  0x8e   : > { %v2726_v6 = vpop.permute.xlu0 %499 }
  0x8f   : > { %v502_v7 = vmul.f32 %v2726_v6, %v496_v5 }
  0x92   : > { %v2729_v8 = vpop.permute.xlu0 %505 }
  0x93   : > { %v508_v9 = vadd.f32 %v2729_v8, %v502_v7 }
  0x95   : > { %v509_v11 = vmax.f32 %v508_v9, 0.0 }
  0x97   : > { %v516_v12 = vmul.f32 %v2735_v10, %v509_v11 }
  0x99   : > { %v517_v13 = vpack.c.bf16 %v516_v12, %v516_v12 }
  0x9b   : > { %895 = vrot.lane.b32.xlu0 %v517_v13, %s2575_s4  ;;  %787 = vrot.lane.b32.xlu1 %v517_v13, %s2576_s29  ;;  %v527_v14 = vsel %vm525_vm1, %v517_v13, 0  ;;  %s2581_s4 = smov 9   ;;  %s2582_s29 = smov 1  }
  0x9c   : > { %2298 = vmatpush3.bf16.msra.mxu0 %v527_v14  ;;  %2304 = vmatpush3.bf16.msra.mxu1 %v527_v14 }
  0x9d   : > { %2309 = vmatprep.subr.bf16.mxu0 %v2573_v3  ;;  %2315 = vmatprep.subr.bf16.mxu1 %v2573_v3 }
  0x9f   : > { %841 = vrot.lane.b32.xlu1 %v517_v13, %s2577_s26  ;;  %2300 = vmatmul.mubr.msk.bf16.vlgmr.msra.gmra.mrb[0].mxu0 %vm521_vm2, %v2184_v15 }
  0xa0   : > { %2306 = vmatmul.mubr.msk.bf16.vlgmr.msra.gmra.mrb[0].mxu1 %vm521_vm2, %v2186_v16  ;;  %2310 = vmatpush3.bf16.msra.mxu0 %v527_v14 }
  0xa1   : > { %2316 = vmatpush3.bf16.msra.mxu1 %v527_v14  ;;  %2311 = vmatprep.mubr.msk.bf16.mxu0 %vm2574_vm0, %v2573_v3 }
  0xa2   : > { %2321 = vmatprep.subr.bf16.mxu0 %v2573_v3  ;;  %2317 = vmatprep.mubr.msk.bf16.mxu1 %vm2574_vm0, %v2573_v3 }
  0xa3   : > { %949 = vrot.lane.b32.xlu1 %v517_v13, %s2578_s28  ;;  %2327 = vmatprep.subr.bf16.mxu1 %v2573_v3 }
  0xa7   : > { %2312 = vmatmul.mubr.msk.bf16.vlgmr.msra.gmra.mrb[4].mxu0 %vm521_vm2, %v2188_v17 }
  0xa8   : > { %2322 = vmatpush3.bf16.msra.mxu0 %v527_v14  ;;  %2318 = vmatmul.mubr.msk.bf16.vlgmr.msra.gmra.mrb[4].mxu1 %vm521_vm2, %v2190_v18 }
  0xa9   : > { %2323 = vmatprep.mubr.msk.bf16.mxu0 %vm2574_vm0, %v2573_v3  ;;  %2329 = vmatprep.mubr.msk.bf16.mxu1 %vm2574_vm0, %v2573_v3 }
  0xaa   : > { %2333 = vmatprep.subr.bf16.mxu0 %v2573_v3 }
  0xaf   : > { %2324 = vmatmul.mubr.msk.bf16.vlgmr.msra.gmra.mrb[8].mxu0 %vm521_vm2, %v2192_v19 }
  0xb0   : > { %2335 = vmatprep.mubr.msk.bf16.mxu0 %vm2574_vm0, %v2573_v3 }
 0x10d   : > { %v788_v20 = vpop.permute.xlu1 %787  ;;  %v896_v22 = vpop.permute.xlu0 %895 }
 0x10e   : > { %v793_v21 = vsel %vm525_vm1, %v788_v20, 0  ;;  %v901_v25 = vsel %vm525_vm1, %v896_v22, 0 }
 0x10f   : > { %2328 = vmatpush3.bf16.msra.mxu1 %v793_v21 }
 0x110   : > { %2339 = vmatprep.subr.bf16.mxu1 %v2573_v3 }
 0x111   : > { %v842_v24 = vpop.permute.xlu1 %841 }
 0x112   : > { %v847_v26 = vsel %vm525_vm1, %v842_v24, 0  ;;  %2330 = vmatmul.mubr.msk.bf16.vlgmr.msra.gmra.mrb[8].mxu1 %vm521_vm2, %v2194_v23 }
 0x113   : > { %2334 = vmatpush3.bf16.msra.mxu0 %v847_v26  ;;  %2340 = vmatpush3.bf16.msra.mxu1 %v901_v25 }
 0x114   : > { %2345 = vmatprep.subr.bf16.mxu0 %v2573_v3  ;;  %2341 = vmatprep.mubr.msk.bf16.mxu1 %vm2574_vm0, %v2573_v3 }
 0x115   : > { %v950_v28 = vpop.permute.xlu1 %949 }
 0x116   : > { %v955_v29 = vsel %vm525_vm1, %v950_v28, 0  ;;  %2336 = vmatmul.mubr.msk.bf16.vlgmr.msra.gmra.mrb[12].mxu0 %vm521_vm2, %v2196_v27 }
 0x117   : > { %2346 = vmatpush3.bf16.msra.mxu0 %v955_v29  ;;  %2347 = vmatprep.mubr.msk.bf16.mxu0 %vm2574_vm0, %v2573_v3 }
 0x11a   : > { %2342 = vmatmul.mubr.msk.bf16.vlgmr.msra.gmra.mrb[12].mxu1 %vm521_vm2, %v2198_v30  ;;  %v1004_v30 = vld [vmem:[%s3016_s23] sm:$0xf] (!%p2202_p10)  ;;  %s2592_s23 = smov (!%p2202_p10), 1  }
 0x11e   : > { %2348 = vmatmul.mubr.msk.bf16.vlgmr.msra.gmra.mrb[16].mxu0 %vm521_vm2, %v2200_v31  ;;  %v2583_v31 = vmov (!%p2202_p10), 0.0  }
 0x11f   : > { %2351 = vmatprep.subr.bf16.mxu0 (!%p2202_p10), %v2583_v31  ;;  %2353 = vmatprep.mubr.msk.bf16.mxu0 (!%p2202_p10), %vm2584_vm12, %v2583_v31 }
 0x120   : > { %2357 = vmatprep.subr.bf16.mxu1 (!%p2202_p10), %v2583_v31  ;;  %2359 = vmatprep.mubr.msk.bf16.mxu1 (!%p2202_p10), %vm2584_vm12, %v2583_v31 }
 0x172   : > { %v563_v32 = vpop.f32.mrb[0].mxu0 }
 0x173   : > { %570 = vrot.lane.b32.xlu0 %v563_v32, %s2579_s21  ;;  %v2301_v33 = vpop.f32.mrb[1].mxu0  ;;  %v616_v34 = vpop.f32.mrb[0].mxu1  ;;  %v1005_v32 = vunpack.c.l.bf16 (!%p2202_p10), %v1004_v30  ;;  %s2587_s21 = smov (!%p2202_p10), 119  }
 0x174   : > { %v566_v35 = vpop.f32.mrb[2].mxu0  ;;  %v2307_v36 = vpop.f32.mrb[1].mxu1  ;;  %623 = vrot.lane.b32.xlu1 %v616_v34, %s2580_s22  ;;  %s2588_s22 = smov (!%p2202_p10), 117  }
 0x175   : > { %v2302_v37 = vpop.f32.mrb[3].mxu0  ;;  %v619_v38 = vpop.f32.mrb[2].mxu1  ;;  %v1006_v33 = vmul.f32 (!%p2202_p10), %v1005_v32, %v2726_v6 }
 0x176   : > { %v2308_v39 = vpop.f32.mrb[3].mxu1 }
 0x177   : > { %v1007_v34 = vadd.f32 (!%p2202_p10), %v1006_v33, %v2729_v8  ;;  %v1011_v39 = vld [vmem:[%s3010_s6] sm:$0xf] (!%p2202_p10) }
 0x179   : > { %v1008_v35 = vmax.f32 (!%p2202_p10), %v1007_v34, 0.0 }
 0x17a   : > { %v669_v40 = vpop.f32.mrb[4].mxu0 }
 0x17b   : > { %v2313_v41 = vpop.f32.mrb[5].mxu0  ;;  %676 = vrot.lane.b32.xlu0 %v669_v40, %s2581_s4  ;;  %v722_v42 = vpop.f32.mrb[4].mxu1  ;;  %v1009_v36 = vmul.f32 (!%p2202_p10), %v2735_v10, %v1008_v35  ;;  %v2204_v40 = vld [vmem:[%s3010_s6 + $0x4] sm:$0xf] (!%p2202_p10) }
 0x17c   : > { %v672_v43 = vpop.f32.mrb[6].mxu0  ;;  %v2319_v44 = vpop.f32.mrb[5].mxu1  ;;  %729 = vrot.lane.b32.xlu1 %v722_v42, %s2582_s29  ;;  %v2206_v41 = vld [vmem:[%s3010_s6 + $0x8] sm:$0xf] (!%p2202_p10)  ;;  %v2208_v42 = vld [vmem:[%s3010_s6 + $0xc] sm:$0xf] (!%p2202_p10) }
 0x17d   : > { %v2314_v45 = vpop.f32.mrb[7].mxu0  ;;  %v725_v46 = vpop.f32.mrb[6].mxu1  ;;  %v1010_v37 = vpack.c.bf16 (!%p2202_p10), %v1009_v36, %v1009_v36  ;;  %v2210_v43 = vld [vmem:[%s3010_s6 + $0x10] sm:$0xf] (!%p2202_p10)  ;;  %s2589_s29 = smov (!%p2202_p10), 11  }
 0x17e   : > { %v2320_v47 = vpop.f32.mrb[7].mxu1 }
 0x17f   : > { %v1017_v38 = vsel (!%p2202_p10), %vm525_vm1, %v1010_v37, 0  ;;  %1273 = vrot.lane.b32.xlu0 (!%p2202_p10), %v1010_v37, %s2585_s25  ;;  %v2212_v47 = vld [vmem:[%s3010_s6 + $0x14] sm:$0xf] (!%p2202_p10) }
 0x180   : > { %1379 = vrot.lane.b32.xlu1 (!%p2202_p10), %v1010_v37, %s2586_s27  ;;  %2352 = vmatpush3.bf16.msra.mxu0 (!%p2202_p10), %v1017_v38 }
 0x181   : > { %2358 = vmatpush3.bf16.msra.mxu1 (!%p2202_p10), %v1017_v38  ;;  %2363 = vmatprep.subr.bf16.mxu0 (!%p2202_p10), %v2583_v31 }
 0x182   : > { %v775_v48 = vpop.f32.mrb[8].mxu0  ;;  %2369 = vmatprep.subr.bf16.mxu1 (!%p2202_p10), %v2583_v31 }
 0x183   : > { %v2325_v49 = vpop.f32.mrb[9].mxu0  ;;  %2354 = vmatmul.mubr.msk.bf16.vlgmr.msra.gmra.mrb[0].mxu0 (!%p2202_p10), %vm521_vm2, %v1011_v39  ;;  %1326 = vrot.lane.b32.xlu0 (!%p2202_p10), %v1010_v37, %s2587_s21 }
 0x184   : > { %v778_v50 = vpop.f32.mrb[10].mxu0  ;;  %2360 = vmatmul.mubr.msk.bf16.vlgmr.msra.gmra.mrb[0].mxu1 (!%p2202_p10), %vm521_vm2, %v2204_v40  ;;  %2364 = vmatpush3.bf16.msra.mxu0 (!%p2202_p10), %v1017_v38 }
 0x185   : > { %v2326_v51 = vpop.f32.mrb[11].mxu0  ;;  %2365 = vmatprep.mubr.msk.bf16.mxu0 (!%p2202_p10), %vm2584_vm12, %v2583_v31  ;;  %2370 = vmatpush3.bf16.msra.mxu1 (!%p2202_p10), %v1017_v38 }
 0x186   : > { %2371 = vmatprep.mubr.msk.bf16.mxu1 (!%p2202_p10), %vm2584_vm12, %v2583_v31  ;;  %1432 = vrot.lane.b32.xlu1 (!%p2202_p10), %v1010_v37, %s2588_s22 }
 0x187   : > { %2375 = vmatprep.subr.bf16.mxu0 (!%p2202_p10), %v2583_v31  ;;  %2381 = vmatprep.subr.bf16.mxu1 (!%p2202_p10), %v2583_v31 }
 0x18b   : > { %2366 = vmatmul.mubr.msk.bf16.vlgmr.msra.gmra.mrb[4].mxu0 (!%p2202_p10), %vm521_vm2, %v2206_v41 }
 0x18c   : > { %2372 = vmatmul.mubr.msk.bf16.vlgmr.msra.gmra.mrb[4].mxu1 (!%p2202_p10), %vm521_vm2, %v2208_v42  ;;  %2376 = vmatpush3.bf16.msra.mxu0 (!%p2202_p10), %v1017_v38 }
 0x18d   : > { %2377 = vmatprep.mubr.msk.bf16.mxu0 (!%p2202_p10), %vm2584_vm12, %v2583_v31  ;;  %2383 = vmatprep.mubr.msk.bf16.mxu1 (!%p2202_p10), %vm2584_vm12, %v2583_v31 }
 0x18e   : > { %2387 = vmatprep.subr.bf16.mxu0 (!%p2202_p10), %v2583_v31 }
 0x193   : > { %2378 = vmatmul.mubr.msk.bf16.vlgmr.msra.gmra.mrb[8].mxu0 (!%p2202_p10), %vm521_vm2, %v2210_v43 }
 0x194   : > { %2389 = vmatprep.mubr.msk.bf16.mxu0 (!%p2202_p10), %vm2584_vm12, %v2583_v31 }
 0x1e5   : > { %v571_v53 = vpop.permute.xlu0 %570  ;;  %v829_v54 = vpop.f32.mrb[8].mxu1 }
 0x1e6   : > { %v573_v55 = vadd.f32 %v571_v53, %v520_v52  ;;  %v2331_v56 = vpop.f32.mrb[9].mxu1  ;;  %v624_v63 = vpop.permute.xlu1 %623  ;;  %v2214_v52 = vld [vmem:[%s3010_s6 + $0x18] sm:$0xf] (!%p2202_p10)  ;;  %v2216_v53 = vld [vmem:[%s3010_s6 + $0x1c] sm:$0xf] (!%p2202_p10) }
 0x1e7   : > { %v832_v57 = vpop.f32.mrb[10].mxu1 }
 0x1e8   : > { %575 = vst.msk [vmem:[#allocation2] sm:$0xff] %vm574_vm4, %v573_v55  ;;  %v2332_v58 = vpop.f32.mrb[11].mxu1  ;;  %v2218_v55 = vld [vmem:[%s3010_s6 + $0x20] sm:$0xf] (!%p2202_p10) }
 0x1e9   : > { %v883_v59 = vpop.f32.mrb[12].mxu0 }
 0x1ea   : > { %v2337_v60 = vpop.f32.mrb[13].mxu0 }
 0x1eb   : > { %v886_v61 = vpop.f32.mrb[14].mxu0 }
 0x1ec   : > { %v2338_v62 = vpop.f32.mrb[15].mxu0 }
 0x1ed   : > { %v937_v0 = vpop.f32.mrb[12].mxu1  ;;  %v677_v14 = vpop.permute.xlu0 %676 }
 0x1ee   : > { %v2343_v2 = vpop.f32.mrb[13].mxu1  ;;  %v730_v17 = vpop.permute.xlu1 %729 }
 0x1ef   : > { %v578_v3 = vld [vmem:[#allocation2] sm:$0xff]  ;;  %v940_v4 = vpop.f32.mrb[14].mxu1 }
 0x1f0   : > { %v626_v5 = vadd.f32 %v624_v63, %v578_v3  ;;  %v2344_v7 = vpop.f32.mrb[15].mxu1 }
 0x1f1   : > { %v991_v9 = vpop.f32.mrb[16].mxu0  ;;  %v1274_v44 = vpop.permute.xlu0 (!%p2202_p10), %1273 }
 0x1f2   : > { %628 = vst.msk [vmem:[#allocation2] sm:$0xff] %vm627_vm5, %v626_v5  ;;  %v2349_v11 = vpop.f32.mrb[17].mxu0  ;;  %v1380_v45 = vpop.permute.xlu1 (!%p2202_p10), %1379  ;;  %v1279_v46 = vsel (!%p2202_p10), %vm525_vm1, %v1274_v44, 0 }
 0x1f3   : > { %v994_v12 = vpop.f32.mrb[18].mxu0  ;;  %2382 = vmatpush3.bf16.msra.mxu1 (!%p2202_p10), %v1279_v46 }
 0x1f4   : > { %v2350_v13 = vpop.f32.mrb[19].mxu0  ;;  %2393 = vmatprep.subr.bf16.mxu1 (!%p2202_p10), %v2583_v31 }
 0x1f5   : > { %v1327_v49 = vpop.permute.xlu0 (!%p2202_p10), %1326 }
 0x1f6   : > { %2384 = vmatmul.mubr.msk.bf16.vlgmr.msra.gmra.mrb[8].mxu1 (!%p2202_p10), %vm521_vm2, %v2212_v47  ;;  %v1332_v51 = vsel (!%p2202_p10), %vm525_vm1, %v1327_v49, 0 }
 0x1f7   : > { %2395 = vmatprep.mubr.msk.bf16.mxu1 (!%p2202_p10), %vm2584_vm12, %v2583_v31  ;;  %2388 = vmatpush3.bf16.msra.mxu0 (!%p2202_p10), %v1332_v51 }
 0x1f8   : > { %v1433_v50 = vpop.permute.xlu1 (!%p2202_p10), %1432  ;;  %2399 = vmatprep.subr.bf16.mxu0 (!%p2202_p10), %v2583_v31 }
 0x1f9   : > { %v631_v15 = vld [vmem:[#allocation2] sm:$0xff] }
 0x1fa   : > { %v679_v16 = vadd.f32 %v677_v14, %v631_v15  ;;  %2390 = vmatmul.mubr.msk.bf16.vlgmr.msra.gmra.mrb[12].mxu0 (!%p2202_p10), %vm521_vm2, %v2214_v52 }
 0x1fb   : > { %2401 = vmatprep.mubr.msk.bf16.mxu0 (!%p2202_p10), %vm2584_vm12, %v2583_v31 }
 0x1fc   : > { %681 = vst.msk [vmem:[#allocation2] sm:$0xff] %vm680_vm6, %v679_v16 }
 0x203   : > { %v684_v18 = vld [vmem:[#allocation2] sm:$0xff] }
 0x204   : > { %v732_v19 = vadd.f32 %v730_v17, %v684_v18 }
 0x206   : > { %734 = vst.msk [vmem:[#allocation2] sm:$0xff] %vm733_vm7, %v732_v19 }
 0x20d   : > { %v737_v20 = vld [vmem:[#allocation2] sm:$0xff] }
 0x20e   : > { %v781_v21 = vadd.f32 %v775_v48, %v737_v20  ;;  %v1385_v48 = vsel (!%p2202_p10), %vm525_vm1, %v1380_v45, 0 }
 0x20f   : > { %2394 = vmatpush3.bf16.msra.mxu1 (!%p2202_p10), %v1385_v48 }
 0x210   : > { %782 = vst.msk [vmem:[#allocation2] sm:$0xff] %vm493_vm3, %v781_v21 }
 0x212   : > { %2396 = vmatmul.mubr.msk.bf16.vlgmr.msra.gmra.mrb[12].mxu1 (!%p2202_p10), %vm521_vm2, %v2216_v53 }
 0x217   : > { %v785_v22 = vld [vmem:[#allocation2] sm:$0xff] }
 0x218   : > { %v835_v23 = vadd.f32 %v829_v54, %v785_v22  ;;  %v1438_v54 = vsel (!%p2202_p10), %vm525_vm1, %v1433_v50, 0 }
 0x219   : > { %2400 = vmatpush3.bf16.msra.mxu0 (!%p2202_p10), %v1438_v54 }
 0x21a   : > { %837 = vst.msk [vmem:[#allocation2] sm:$0xff] %vm836_vm8, %v835_v23 }
 0x21c   : > { %2402 = vmatmul.mubr.msk.bf16.vlgmr.msra.gmra.mrb[16].mxu0 (!%p2202_p10), %vm521_vm2, %v2218_v55 }
 0x221   : > { %v840_v24 = vld [vmem:[#allocation2] sm:$0xff] }
 0x222   : > { %v889_v25 = vadd.f32 %v883_v59, %v840_v24 }
 0x224   : > { %891 = vst.msk [vmem:[#allocation2] sm:$0xff] %vm890_vm9, %v889_v25 }
 0x22b   : > { %v894_v26 = vld [vmem:[#allocation2] sm:$0xff] }
 0x22c   : > { %v943_v27 = vadd.f32 %v937_v0, %v894_v26 }
 0x22e   : > { %945 = vst.msk [vmem:[#allocation2] sm:$0xff] %vm944_vm10, %v943_v27 }
 0x232   : > { %1003 = sbr.rel (%p2202_p10) target bundleno = 797 (0x31d), region = 56 }
 0x235   : > { %v948_v28 = vld [vmem:[#allocation2] sm:$0xff] }
 0x236   : > { %v997_v29 = vadd.f32 %v991_v9, %v948_v28 }
 0x238   : > { %999 = vst.msk [vmem:[#allocation2] sm:$0xff] %vm998_vm11, %v997_v29 }
 0x23f   : > { %v1012_v16 = vld [vmem:[#allocation2] sm:$0xff] }
 0x256   : > { %v1053_v56 = vpop.f32.mrb[0].mxu0 }
 0x257   : > { %v1105_v57 = vpop.f32.mrb[0].mxu1  ;;  %1060 = vrot.lane.b32.xlu0 %v1053_v56, %s2589_s29  ;;  %v2355_v58 = vpop.f32.mrb[1].mxu0 }
 0x258   : > { %v2361_v59 = vpop.f32.mrb[1].mxu1  ;;  %1112 = vrot.lane.b32.xlu1 %v1105_v57, %s2590_s16  ;;  %v1056_v60 = vpop.f32.mrb[2].mxu0 }
 0x259   : > { %v1108_v61 = vpop.f32.mrb[2].mxu1  ;;  %v2356_v62 = vpop.f32.mrb[3].mxu0 }
 0x25a   : > { %v2362_v63 = vpop.f32.mrb[3].mxu1 }
 0x25e   : > { %v1157_v0 = vpop.f32.mrb[4].mxu0 }
 0x25f   : > { %v1209_v2 = vpop.f32.mrb[4].mxu1  ;;  %v2367_v3 = vpop.f32.mrb[5].mxu0  ;;  %1164 = vrot.lane.b32.xlu0 %v1157_v0, %s2591_s10 }
 0x260   : > { %v2373_v4 = vpop.f32.mrb[5].mxu1  ;;  %1216 = vrot.lane.b32.xlu1 %v1209_v2, %s2592_s23  ;;  %v1160_v5 = vpop.f32.mrb[6].mxu0 }
 0x261   : > { %v1212_v7 = vpop.f32.mrb[6].mxu1  ;;  %v2368_v9 = vpop.f32.mrb[7].mxu0 }
 0x262   : > { %v2374_v11 = vpop.f32.mrb[7].mxu1 }
 0x266   : > { %v1261_v12 = vpop.f32.mrb[8].mxu0 }
 0x267   : > { %v2379_v13 = vpop.f32.mrb[9].mxu0 }
 0x268   : > { %v1264_v14 = vpop.f32.mrb[10].mxu0 }
 0x269   : > { %v2380_v15 = vpop.f32.mrb[11].mxu0 }
 0x2c9   : > { %v1061_v17 = vpop.permute.xlu0 %1060  ;;  %v1315_v19 = vpop.f32.mrb[8].mxu1 }
 0x2ca   : > { %v1063_v18 = vadd.f32 %v1061_v17, %v1012_v16  ;;  %v2385_v20 = vpop.f32.mrb[9].mxu1  ;;  %v1113_v24 = vpop.permute.xlu1 %1112 }
 0x2cb   : > { %v1318_v21 = vpop.f32.mrb[10].mxu1 }
 0x2cc   : > { %1064 = vst.msk [vmem:[#allocation2] sm:$0xff] %vm574_vm4, %v1063_v18  ;;  %v2386_v22 = vpop.f32.mrb[11].mxu1 }
 0x2cd   : > { %v1368_v23 = vpop.f32.mrb[12].mxu0 }
 0x2ce   : > { %v2391_v25 = vpop.f32.mrb[13].mxu0 }
 0x2cf   : > { %v1371_v28 = vpop.f32.mrb[14].mxu0 }
 0x2d0   : > { %v2392_v31 = vpop.f32.mrb[15].mxu0 }
 0x2d1   : > { %v1165_v37 = vpop.permute.xlu0 %1164 }
 0x2d2   : > { %v1217_v41 = vpop.permute.xlu1 %1216 }
 0x2d3   : > { %v1067_v27 = vld [vmem:[#allocation2] sm:$0xff] }
 0x2d4   : > { %v1115_v30 = vadd.f32 %v1113_v24, %v1067_v27 }
 0x2d6   : > { %1116 = vst.msk [vmem:[#allocation2] sm:$0xff] %vm627_vm5, %v1115_v30 }
 0x2dd   : > { %v1119_v39 = vld [vmem:[#allocation2] sm:$0xff] }
 0x2de   : > { %v1167_v40 = vadd.f32 %v1165_v37, %v1119_v39 }
 0x2e0   : > { %1168 = vst.msk [vmem:[#allocation2] sm:$0xff] %vm680_vm6, %v1167_v40 }
 0x2e5   : > { %v1421_v26 = vpop.f32.mrb[12].mxu1 }
 0x2e6   : > { %v2397_v29 = vpop.f32.mrb[13].mxu1 }
 0x2e7   : > { %v1424_v32 = vpop.f32.mrb[14].mxu1  ;;  %v1171_v42 = vld [vmem:[#allocation2] sm:$0xff] }
 0x2e8   : > { %v2398_v33 = vpop.f32.mrb[15].mxu1  ;;  %v1219_v43 = vadd.f32 %v1217_v41, %v1171_v42 }
 0x2ea   : > { %1220 = vst.msk [vmem:[#allocation2] sm:$0xff] %vm733_vm7, %v1219_v43 }
 0x2ef   : > { %v1474_v34 = vpop.f32.mrb[16].mxu0 }
 0x2f0   : > { %v2403_v35 = vpop.f32.mrb[17].mxu0 }
 0x2f1   : > { %v1477_v36 = vpop.f32.mrb[18].mxu0  ;;  %v1223_v44 = vld [vmem:[#allocation2] sm:$0xff] }
 0x2f2   : > { %v2404_v38 = vpop.f32.mrb[19].mxu0  ;;  %v1267_v45 = vadd.f32 %v1261_v12, %v1223_v44 }
 0x2f4   : > { %1268 = vst.msk [vmem:[#allocation2] sm:$0xff] %vm493_vm3, %v1267_v45 }
 0x2fb   : > { %v1271_v46 = vld [vmem:[#allocation2] sm:$0xff] }
 0x2fc   : > { %v1321_v47 = vadd.f32 %v1315_v19, %v1271_v46 }
 0x2fe   : > { %1322 = vst.msk [vmem:[#allocation2] sm:$0xff] %vm836_vm8, %v1321_v47 }
 0x305   : > { %v1325_v48 = vld [vmem:[#allocation2] sm:$0xff] }
 0x306   : > { %v1374_v49 = vadd.f32 %v1368_v23, %v1325_v48 }
 0x308   : > { %1375 = vst.msk [vmem:[#allocation2] sm:$0xff] %vm890_vm9, %v1374_v49 }
 0x30f   : > { %v1378_v50 = vld [vmem:[#allocation2] sm:$0xff] }
 0x310   : > { %v1427_v51 = vadd.f32 %v1421_v26, %v1378_v50 }
 0x312   : > { %1428 = vst.msk [vmem:[#allocation2] sm:$0xff] %vm944_vm10, %v1427_v51 }
 0x319   : > { %v1431_v52 = vld [vmem:[#allocation2] sm:$0xff] }
 0x31a   : > { %v1480_v53 = vadd.f32 %v1474_v34, %v1431_v52 }
 0x31c   : > { %1481 = vst.msk [vmem:[#allocation2] sm:$0xff] %vm998_vm11, %v1480_v53 }
 0x31d PF: > { %p2220_p11 = scmp.ge.s32.totalorder %s2554_s30, 7 }
 0x31e   : > { %v1486_v54 = vld [vmem:[%s2721_s19] sm:$0xf] (!%p2220_p11)  ;;  %v2593_v55 = vmov (!%p2220_p11), 0.0   ;;  %vm2594_vm13 = vmmov (!%p2220_p11), 0   ;;  %s2595_s30 = smov (!%p2220_p11), 127   ;;  %s2596_s19 = smov (!%p2220_p11), 118  }
 0x31f   : > { %1485 = sbr.rel (%p2220_p11) target bundleno = 1225 (0x4c9), region = 60  ;;  %2405 = vmatprep.subr.bf16.mxu0 (!%p2220_p11), %v2593_v55  ;;  %v1487_v56 = vunpack.c.l.bf16 (!%p2220_p11), %v1486_v54  ;;  %2407 = vmatprep.mubr.msk.bf16.mxu0 (!%p2220_p11), %vm2594_vm13, %v2593_v55  ;;  %v2221_v63 = vld [vmem:[%s3010_s6 + $0x48] sm:$0xf] (!%p2220_p11)  ;;  %s2597_s17 = smov (!%p2220_p11), 119   ;;  %v2227_v0 = vld [vmem:[%s3010_s6 + $0x54] sm:$0xf] (!%p2220_p11) }
 0x320   : > { %2411 = vmatprep.subr.bf16.mxu1 (!%p2220_p11), %v2593_v55  ;;  %2413 = vmatprep.mubr.msk.bf16.mxu1 (!%p2220_p11), %vm2594_vm13, %v2593_v55  ;;  %s2598_s18 = smov (!%p2220_p11), 117   ;;  %v2229_v2 = vld [vmem:[%s3010_s6 + $0x58] sm:$0xf] (!%p2220_p11)  ;;  %v2231_v7 = vld [vmem:[%s3010_s6 + $0x5c] sm:$0xf] (!%p2220_p11)  ;;  %s2600_s21 = smov (!%p2220_p11), 10  }
 0x321   : > { %v1488_v57 = vmul.f32 (!%p2220_p11), %v1487_v56, %v2726_v6  ;;  %v2223_v6 = vld [vmem:[%s3010_s6 + $0x4c] sm:$0xf] (!%p2220_p11)  ;;  %v2233_v14 = vld [vmem:[%s3010_s6 + $0x60] sm:$0xf] (!%p2220_p11)  ;;  %v2235_v15 = vld [vmem:[%s3010_s6 + $0x64] sm:$0xf] (!%p2220_p11) }
 0x322   : > { %v2237_v17 = vld [vmem:[%s3010_s6 + $0x68] sm:$0xf] (!%p2220_p11)  ;;  %s2601_s22 = smov (!%p2220_p11), 9   ;;  %s2602_s4 = smov (!%p2220_p11), 1  }
 0x323   : > { %v1489_v58 = vadd.f32 (!%p2220_p11), %v1488_v57, %v2729_v8  ;;  %v2225_v8 = vld [vmem:[%s3010_s6 + $0x50] sm:$0xf] (!%p2220_p11)  ;;  %v1495_v38 = vld [vmem:[#allocation2] sm:$0xff] (!%p2220_p11) }
 0x325   : > { %v1490_v59 = vmax.f32 (!%p2220_p11), %v1489_v58, 0.0 }
 0x327   : > { %v1491_v60 = vmul.f32 %v2735_v10, %v1490_v59 }
 0x329   : > { %v1492_v61 = vpack.c.bf16 %v1491_v60, %v1491_v60 }
 0x32b   : > { %v1500_v62 = vsel %vm525_vm1, %v1492_v61, 0  ;;  %1756 = vrot.lane.b32.xlu0 %v1492_v61, %s2595_s30  ;;  %1862 = vrot.lane.b32.xlu1 %v1492_v61, %s2596_s19 }
 0x32c   : > { %2406 = vmatpush3.bf16.msra.mxu0 %v1500_v62  ;;  %2412 = vmatpush3.bf16.msra.mxu1 %v1500_v62 }
 0x32d   : > { %2417 = vmatprep.subr.bf16.mxu0 %v2593_v55  ;;  %2423 = vmatprep.subr.bf16.mxu1 %v2593_v55 }
 0x32f   : > { %2408 = vmatmul.mubr.msk.bf16.vlgmr.msra.gmra.mrb[0].mxu0 %vm521_vm2, %v2221_v63  ;;  %2414 = vmatmul.mubr.msk.bf16.vlgmr.msra.gmra.mrb[0].mxu1 %vm521_vm2, %v2223_v6 }
 0x330   : > { %2418 = vmatpush3.bf16.msra.mxu0 %v1500_v62  ;;  %2419 = vmatprep.mubr.msk.bf16.mxu0 %vm2594_vm13, %v2593_v55 }
 0x331   : > { %2424 = vmatpush3.bf16.msra.mxu1 %v1500_v62  ;;  %2425 = vmatprep.mubr.msk.bf16.mxu1 %vm2594_vm13, %v2593_v55 }
 0x332   : > { %1809 = vrot.lane.b32.xlu0 %v1492_v61, %s2597_s17  ;;  %1915 = vrot.lane.b32.xlu1 %v1492_v61, %s2598_s18  ;;  %s2599_s18 = smov 11  }
 0x333   : > { %2429 = vmatprep.subr.bf16.mxu0 %v2593_v55  ;;  %2435 = vmatprep.subr.bf16.mxu1 %v2593_v55 }
 0x337   : > { %2420 = vmatmul.mubr.msk.bf16.vlgmr.msra.gmra.mrb[4].mxu0 %vm521_vm2, %v2225_v8  ;;  %2426 = vmatmul.mubr.msk.bf16.vlgmr.msra.gmra.mrb[4].mxu1 %vm521_vm2, %v2227_v0 }
 0x338   : > { %2430 = vmatpush3.bf16.msra.mxu0 %v1500_v62  ;;  %2431 = vmatprep.mubr.msk.bf16.mxu0 %vm2594_vm13, %v2593_v55 }
 0x339   : > { %2437 = vmatprep.mubr.msk.bf16.mxu1 %vm2594_vm13, %v2593_v55  ;;  %2441 = vmatprep.subr.bf16.mxu0 %v2593_v55 }
 0x33f   : > { %2432 = vmatmul.mubr.msk.bf16.vlgmr.msra.gmra.mrb[8].mxu0 %vm521_vm2, %v2229_v2 }
 0x340   : > { %2443 = vmatprep.mubr.msk.bf16.mxu0 %vm2594_vm13, %v2593_v55 }
 0x39d   : > { %v1757_v3 = vpop.permute.xlu0 %1756  ;;  %v1863_v4 = vpop.permute.xlu1 %1862 }
 0x39e   : > { %v1762_v5 = vsel %vm525_vm1, %v1757_v3, 0  ;;  %v1868_v9 = vsel %vm525_vm1, %v1863_v4, 0 }
 0x39f   : > { %2436 = vmatpush3.bf16.msra.mxu1 %v1762_v5 }
 0x3a0   : > { %2447 = vmatprep.subr.bf16.mxu1 %v2593_v55 }
 0x3a2   : > { %2438 = vmatmul.mubr.msk.bf16.vlgmr.msra.gmra.mrb[8].mxu1 %vm521_vm2, %v2231_v7 }
 0x3a3   : > { %2448 = vmatpush3.bf16.msra.mxu1 %v1868_v9  ;;  %2449 = vmatprep.mubr.msk.bf16.mxu1 %vm2594_vm13, %v2593_v55 }
 0x3a4   : > { %v1810_v11 = vpop.permute.xlu0 %1809  ;;  %v1916_v12 = vpop.permute.xlu1 %1915 }
 0x3a5   : > { %v1815_v13 = vsel %vm525_vm1, %v1810_v11, 0  ;;  %v1921_v16 = vsel %vm525_vm1, %v1916_v12, 0 }
 0x3a6   : > { %2442 = vmatpush3.bf16.msra.mxu0 %v1815_v13 }
 0x3a7   : > { %2453 = vmatprep.subr.bf16.mxu0 %v2593_v55 }
 0x3a9   : > { %2444 = vmatmul.mubr.msk.bf16.vlgmr.msra.gmra.mrb[12].mxu0 %vm521_vm2, %v2233_v14 }
 0x3aa   : > { %2450 = vmatmul.mubr.msk.bf16.vlgmr.msra.gmra.mrb[12].mxu1 %vm521_vm2, %v2235_v15  ;;  %2454 = vmatpush3.bf16.msra.mxu0 %v1921_v16 }
 0x3ab   : > { %2455 = vmatprep.mubr.msk.bf16.mxu0 %vm2594_vm13, %v2593_v55 }
 0x3b1   : > { %2456 = vmatmul.mubr.msk.bf16.vlgmr.msra.gmra.mrb[16].mxu0 %vm521_vm2, %v2237_v17 }
 0x402   : > { %v1536_v18 = vpop.f32.mrb[0].mxu0  ;;  %v1588_v19 = vpop.f32.mrb[0].mxu1 }
 0x403   : > { %1543 = vrot.lane.b32.xlu0 %v1536_v18, %s2599_s18  ;;  %v2409_v20 = vpop.f32.mrb[1].mxu0  ;;  %v2415_v21 = vpop.f32.mrb[1].mxu1  ;;  %1595 = vrot.lane.b32.xlu1 %v1588_v19, %s2600_s21 }
 0x404   : > { %v1539_v22 = vpop.f32.mrb[2].mxu0  ;;  %v1591_v23 = vpop.f32.mrb[2].mxu1 }
 0x405   : > { %v2410_v24 = vpop.f32.mrb[3].mxu0  ;;  %v2416_v25 = vpop.f32.mrb[3].mxu1 }
 0x40a   : > { %v1640_v26 = vpop.f32.mrb[4].mxu0  ;;  %v1692_v27 = vpop.f32.mrb[4].mxu1 }
 0x40b   : > { %v2421_v28 = vpop.f32.mrb[5].mxu0  ;;  %1647 = vrot.lane.b32.xlu0 %v1640_v26, %s2601_s22  ;;  %v2427_v29 = vpop.f32.mrb[5].mxu1  ;;  %1699 = vrot.lane.b32.xlu1 %v1692_v27, %s2602_s4 }
 0x40c   : > { %v1643_v30 = vpop.f32.mrb[6].mxu0  ;;  %v1695_v31 = vpop.f32.mrb[6].mxu1 }
 0x40d   : > { %v2422_v32 = vpop.f32.mrb[7].mxu0  ;;  %v2428_v33 = vpop.f32.mrb[7].mxu1 }
 0x412   : > { %v1744_v34 = vpop.f32.mrb[8].mxu0 }
 0x413   : > { %v2433_v35 = vpop.f32.mrb[9].mxu0 }
 0x414   : > { %v1747_v36 = vpop.f32.mrb[10].mxu0 }
 0x415   : > { %v2434_v37 = vpop.f32.mrb[11].mxu0 }
 0x475   : > { %v1544_v39 = vpop.permute.xlu0 %1543  ;;  %v1798_v41 = vpop.f32.mrb[8].mxu1 }
 0x476   : > { %v1546_v40 = vadd.f32 %v1544_v39, %v1495_v38  ;;  %v2439_v42 = vpop.f32.mrb[9].mxu1  ;;  %v1596_v46 = vpop.permute.xlu1 %1595 }
 0x477   : > { %v1801_v43 = vpop.f32.mrb[10].mxu1 }
 0x478   : > { %1547 = vst.msk [vmem:[#allocation2] sm:$0xff] %vm574_vm4, %v1546_v40  ;;  %v2440_v44 = vpop.f32.mrb[11].mxu1 }
 0x47c   : > { %v1851_v45 = vpop.f32.mrb[12].mxu0 }
 0x47d   : > { %v2445_v47 = vpop.f32.mrb[13].mxu0  ;;  %v1904_v48 = vpop.f32.mrb[12].mxu1 }
 0x47e   : > { %v1854_v50 = vpop.f32.mrb[14].mxu0  ;;  %v2451_v51 = vpop.f32.mrb[13].mxu1 }
 0x47f   : > { %v1550_v49 = vld [vmem:[#allocation2] sm:$0xff]  ;;  %v2446_v53 = vpop.f32.mrb[15].mxu0  ;;  %v1907_v54 = vpop.f32.mrb[14].mxu1 }
 0x480   : > { %v1598_v52 = vadd.f32 %v1596_v46, %v1550_v49  ;;  %v2452_v55 = vpop.f32.mrb[15].mxu1  ;;  %v1648_v59 = vpop.permute.xlu0 %1647 }
 0x481   : > { %v1700_v63 = vpop.permute.xlu1 %1699 }
 0x482   : > { %1599 = vst.msk [vmem:[#allocation2] sm:$0xff] %vm627_vm5, %v1598_v52 }
 0x484   : > { %v1957_v56 = vpop.f32.mrb[16].mxu0 }
 0x485   : > { %v2457_v57 = vpop.f32.mrb[17].mxu0 }
 0x486   : > { %v1960_v58 = vpop.f32.mrb[18].mxu0 }
 0x487   : > { %v2458_v60 = vpop.f32.mrb[19].mxu0 }
 0x489   : > { %v1602_v61 = vld [vmem:[#allocation2] sm:$0xff] }
 0x48a   : > { %v1650_v62 = vadd.f32 %v1648_v59, %v1602_v61 }
 0x48c   : > { %1651 = vst.msk [vmem:[#allocation2] sm:$0xff] %vm680_vm6, %v1650_v62 }
 0x493   : > { %v1654_v6 = vld [vmem:[#allocation2] sm:$0xff] }
 0x494   : > { %v1702_v8 = vadd.f32 %v1700_v63, %v1654_v6 }
 0x496   : > { %1703 = vst.msk [vmem:[#allocation2] sm:$0xff] %vm733_vm7, %v1702_v8 }
 0x49d   : > { %v1706_v0 = vld [vmem:[#allocation2] sm:$0xff] }
 0x49e   : > { %v1750_v2 = vadd.f32 %v1744_v34, %v1706_v0 }
 0x4a0   : > { %1751 = vst.msk [vmem:[#allocation2] sm:$0xff] %vm493_vm3, %v1750_v2 }
 0x4a7   : > { %v1754_v3 = vld [vmem:[#allocation2] sm:$0xff] }
 0x4a8   : > { %v1804_v4 = vadd.f32 %v1798_v41, %v1754_v3 }
 0x4aa   : > { %1805 = vst.msk [vmem:[#allocation2] sm:$0xff] %vm836_vm8, %v1804_v4 }
 0x4b1   : > { %v1808_v5 = vld [vmem:[#allocation2] sm:$0xff] }
 0x4b2   : > { %v1857_v7 = vadd.f32 %v1851_v45, %v1808_v5 }
 0x4b4   : > { %1858 = vst.msk [vmem:[#allocation2] sm:$0xff] %vm890_vm9, %v1857_v7 }
 0x4bb   : > { %v1861_v9 = vld [vmem:[#allocation2] sm:$0xff] }
 0x4bc   : > { %v1910_v11 = vadd.f32 %v1904_v48, %v1861_v9 }
 0x4be   : > { %1911 = vst.msk [vmem:[#allocation2] sm:$0xff] %vm944_vm10, %v1910_v11 }
 0x4c5   : > { %v1914_v12 = vld [vmem:[#allocation2] sm:$0xff] }
 0x4c6   : > { %v1963_v13 = vadd.f32 %v1957_v56, %v1914_v12 }
 0x4c8   : > { %1964 = vst.msk [vmem:[#allocation2] sm:$0xff] %vm998_vm11, %v1963_v13 }
 0x4c9 PF: > { %2531 = vset.pattern.permute.xlu0 %v2572_v1  ;;  %v1966_v14 = vld [vmem:[%s3011_s7] sm:$0xff]  ;;  %vm1986_vm14 = vcmask 814080   ;;  %vm1977_vm15 = vcmask 7168   ;;  %vm1983_vm0 = vcmask 15368  }
 0x4ca   : > { %1969 = vperm.xlu0 %2531, %v1966_v14  }
 0x4cf   : > { %v1965_v15 = vld [vmem:[#allocation2] sm:$0xff] }
 0x549   : > { %v1970_v16 = vpop.permute.xlu0 %1969 }
 0x54a   : > { %v1972_v17 = vadd.f32 %v1970_v16, %v1965_v15 }
 0x54c   : > { %v1985_v18 = vpack.c.bf16 %v1972_v17, %v1972_v17  ;;  %v1973_v19 = vmul.f32 %v2735_v10, %v1972_v17 }
 0x54e   : > { %1987 = vst.msk [vmem:[%s2705_s20] sm:$0xf] %vm1986_vm14, %v1985_v18  ;;  %v1974_v20 = vsel %vm493_vm3, %v1973_v19, 0.0  ;;  %v1979_v21 = vmul.f32 %v1973_v19, %v1972_v17 }
 0x54f   : > { %1975 = vadd.xlane.f32.xlu0 %v1974_v20 }
 0x550   : > { %v1980_v1 = vsel %vm493_vm3, %v1979_v21, 0.0 }
 0x551   : > { %1981 = vadd.xlane.f32.xlu1 %v1980_v1 }
 0x5dc   : > { %v1976_v22 = vpop.xlane.xlu0 %1975 }
 0x5dd   : > { %1978 = vst.msk [vmem:[%s2712_s24] sm:$0xff] %vm1977_vm15, %v1976_v22 }
 0x5de   : > { %v1982_v23 = vpop.xlane.xlu1 %1981 }
 0x5df   : > { %1984 = vst.msk [vmem:[%s2712_s24] sm:$0xff] %vm1983_vm0, %v1982_v23 }
 0x5e0 PF: > { %s20_s13 = sadd.s32 1, %s2570_s13   ;;  %s3017_s30 = smov %s2562_s11 }
 0x5e1   : > { %p17_p12 = scmp.ge.s32.totalorder %s20_s13, 18   ;;  %s3018_s10 = smov %s2566_s12 }
 0x5e2   : > { %s3019_s11 = smov %s3022_s14  ;;  %s3020_s12 = smov %s3026_s15 }
 0x5e3   :  { %19 = sbr.rel (!%p17_p12) target bundleno = 3 (0x3), region = 134 }

// kernel: _att_double_conv.3
= control target key start
LH: loop header
LB: loop body
LE: loop exit
PB: predicated region body
PF: predicated region fallthrough
CT: control target
= control target key end

     0   :  { %s3103_s13 = smov 0   ;;  %s3105_s14 = smov 0   ;;  %s3624_s0 = inlined_call_operand.vmem [shape: bf16[2,10,4,100], index: 0, kind: input, shape index: {}, may-alias: {0,1,2}]   ;;  %s3625_s1 = inlined_call_operand.vmem [shape: bf16[2,10,4,100], index: 1, kind: input, shape index: {}, may-alias: {0,1,2}]   ;;  %s3626_s2 = inlined_call_operand.vmem [shape: bf16[2,10,4,100], index: 2, kind: input, shape index: {}, may-alias: {0,1,2}]   ;;  %s3627_s3 = inlined_call_operand.vmem [shape: f32[1,100], index: 3, kind: input, shape index: {}]   ;;  %s3628_s4 = inlined_call_operand.vmem [shape: bf16[27,16,4], index: 4, kind: input, shape index: {}]   ;;  %s3629_s5 = inlined_call_operand.vmem [shape: f32[16,1], index: 5, kind: input, shape index: {}]   ;;  %s3630_s6 = inlined_call_operand.vmem [shape: bf16[8,8], index: 6, kind: input, shape index: {}]   ;;  %s3631_s7 = inlined_call_operand.vmem [shape: f32[8,1], index: 7, kind: input, shape index: {}]   ;;  %s3632_s8 = inlined_call_operand.vmem [shape: bf16[2,8,8,100], index: 8, kind: output, shape index: {0}]   ;;  %s3633_s9 = inlined_call_operand.vmem [shape: bf16[2,8,8,100], index: 9, kind: output, shape index: {1}]   ;;  %s3634_s10 = inlined_call_operand.vmem [shape: f32[2,8,8,2], index: 10, kind: output, shape index: {2}]  }
   0x1   :  { %3637 = sst [smem:[#allocation3_spill]] %s3624_s0  ;;  %s3107_s15 = smov 0  }
   0x2   :  { %3638 = sst [smem:[#allocation4_spill]] %s3625_s1  ;;  %s3109_s16 = smov 0  }
   0x3   :  { %s3111_s17 = smov 0  }
   0x4 LB: > { %s30_s18 = sadd.s32 1, %s3026_s15  ;;  %s33_s19 = sadd.s32 1, %s3030_s16  ;;  %s3034_s17 = sphi %s3111_s17, %s21_s17   ;;  %s3030_s16 = sphi %s3109_s16, %s3645_s16   ;;  %s3026_s15 = sphi %s3107_s15, %s3644_s15   ;;  %s3022_s14 = sphi %s3105_s14, %s3643_s14   ;;  %s3018_s13 = sphi %s3103_s13, %s3642_s13  }
   0x5   : > { %p31_p0 = scmp.ge.s32.totalorder %s30_s18, 8  ;;  %p2566_p1 = scmp.ge.s32.totalorder %s3034_s17, 1 }
   0x6   : > { %p378_p2 = scmp.lt.s32.totalorder %s3034_s17, 17 }
   0x7   : > { %s3647_s18 = smov (%p31_p0, %s30_s18), 0  ;;  %s3649_s19 = smov (!%p31_p0, %s33_s19), %s3030_s16 }
   0x8   : > { %p379_p3 = pnand %p2566_p1, %p378_p2  ;;  %p35_p4 = scmp.ge.s32.totalorder %s3649_s19, 2 }
   0x9   : > { %p456_p5 = scmp.lt.s32.totalorder (!%p379_p3), %s3022_s14, 1  ;;  %p458_p6 = scmp.lt.s32.totalorder (!%p379_p3), %s3018_s13, 9  ;;  %v591_v0 = vlaneseq (!%p379_p3)  ;;  %v3036_v1 = vmov (!%p379_p3), 1983009808   ;;  %v3037_v3 = vmov (!%p379_p3), 0.0   ;;  %vm3038_vm0 = vmmov (!%p379_p3), 0  }
   0xa   : > { %s3651_s19 = smov (%p35_p4, %s3649_s19), 0  ;;  %382 = sbr.rel (%p379_p3) target bundleno = 877 (0x36d), region = 52 }
   0xb   : > { %v589_v2 = vunpack.c.l.s4 (!%p379_p3), %v3036_v1  ;;  %2742 = vmatprep.subr.bf16.mxu0 (!%p379_p3), %v3037_v3  ;;  %2748 = vmatprep.subr.bf16.mxu1 (!%p379_p3), %v3037_v3  ;;  %v592_v4 = vshrl.u32 (!%p379_p3), %v591_v0, 7  ;;  %vm528_vm1 = vcmask (!%p379_p3), 1041408   ;;  %s3639_s0 = sld [smem:[#allocation3_spill]] (!%p379_p3)  ;;  %v2965_v7 = vld [vmem:[%s3628_s4] sm:$0xff] (!%p379_p3)   ;;  %s464_s29 = sadd.s32 (!%p379_p3), 1, %s3018_s13  ;;  %vm524_vm2 = vcmask (!%p379_p3), 31744  }
   0xc   : > { %2744 = vmatprep.mubr.msk.bf16.mxu0 (!%p379_p3), %vm3038_vm0, %v3037_v3  ;;  %2750 = vmatprep.mubr.msk.bf16.mxu1 (!%p379_p3), %vm3038_vm0, %v3037_v3  ;;  %p467_p7 = scmp.lt.s32.totalorder (!%p379_p3), %s464_s29, 9  ;;  %s3039_s30 = smov (!%p379_p3), 127   ;;  %vm509_vm3 = vcmask (!%p379_p3), 818176   ;;  %v2966_v18 = vld [vmem:[%s3628_s4 + $0x8] sm:$0xff] (!%p379_p3)   ;;  %v2967_v23 = vld [vmem:[%s3628_s4 + $0x10] sm:$0xff] (!%p379_p3)   ;;  %v2968_v26 = vld [vmem:[%s3628_s4 + $0x18] sm:$0xff] (!%p379_p3)  }
   0xd   : > { %v590_v5 = vunpack.c.0.s8 (!%p379_p3), %v589_v2  ;;  %s3635_s11 = smov (!%p379_p3), 118   ;;  %s3640_s1 = sld [smem:[#allocation4_spill]] (!%p379_p3)  ;;  %510 = vst.msk [vmem:[#allocation2] sm:$0xff] (!%p379_p3), %vm509_vm3, %v3037_v3  ;;  %511 = vst.msk [vmem:[#allocation2 + $0x8] sm:$0xff] (!%p379_p3), %vm509_vm3, %v3037_v3  ;;  %v2969_v29 = vld [vmem:[%s3628_s4 + $0x20] sm:$0xff] (!%p379_p3)   ;;  %v2970_v32 = vld [vmem:[%s3628_s4 + $0x28] sm:$0xff] (!%p379_p3)  }
   0xe   : > { %s3043_s27 = smov (!%p379_p3), 116   ;;  %s3044_s28 = smov (!%p379_p3), 108   ;;  %v2971_v35 = vld [vmem:[%s3628_s4 + $0x30] sm:$0xff] (!%p379_p3)   ;;  %v2972_v37 = vld [vmem:[%s3628_s4 + $0x38] sm:$0xff] (!%p379_p3)   ;;  %v2973_v40 = vld [vmem:[%s3628_s4 + $0x40] sm:$0xff] (!%p379_p3)   ;;  %vm646_vm4 = vcmask (!%p379_p3), 809984  }
   0xf   : > { %v593_v6 = vsub.s32 (!%p379_p3), %v590_v5, %v592_v4  ;;  %v2974_v43 = vld [vmem:[%s3628_s4 + $0x48] sm:$0xff] (!%p379_p3)   ;;  %v2975_v46 = vld [vmem:[%s3628_s4 + $0x50] sm:$0xff] (!%p379_p3)   ;;  %v2976_v49 = vld [vmem:[%s3628_s4 + $0x58] sm:$0xff] (!%p379_p3)   ;;  %vm710_vm5 = vcmask (!%p379_p3), 801792   ;;  %vm774_vm6 = vcmask (!%p379_p3), 736256   ;;  %vm838_vm7 = vcmask (!%p379_p3), 728064  }
  0x10   : > { %v2977_v52 = vld [vmem:[%s3628_s4 + $0x60] sm:$0xff] (!%p379_p3)   ;;  %v2978_v55 = vld [vmem:[%s3628_s4 + $0x68] sm:$0xff] (!%p379_p3)   ;;  %v2979_v58 = vld [vmem:[%s3628_s4 + $0x70] sm:$0xff] (!%p379_p3)   ;;  %vm902_vm8 = vcmask (!%p379_p3), 719872   ;;  %vm966_vm9 = vcmask (!%p379_p3), 654336   ;;  %vm1030_vm10 = vcmask (!%p379_p3), 646144  }
  0x11   : > { %s3653_s14 = smov (!%p456_p5, %s3022_s14), 1  ;;  %s3655_s29 = smov (!%p467_p7, %s464_s29), 9  ;;  %v2980_v61 = vld [vmem:[%s3628_s4 + $0x78] sm:$0xff]   ;;  %v2981_v63 = vld [vmem:[%s3628_s4 + $0x80] sm:$0xff]   ;;  %v2982_v2 = vld [vmem:[%s3628_s4 + $0x88] sm:$0xff]   ;;  %vm1094_vm11 = vcmask 637952  }
  0x12   : > { %s459_s20 = scalar_select %p458_p6, %s3018_s13, 9  ;;  %vm2342_vm12 = vcmask 814080   ;;  %vm2273_vm13 = vcmask 1043456   ;;  %vm2269_vm14 = vcmask 64512   ;;  %vm2333_vm15 = vcmask 7168  }
  0x13   : > { %s3146_s21 = smul.u32 10, %s3653_s14  ;;  %p486_p9 = scmp.lt.s32.totalorder %s3018_s13, 7 }
  0x15   : > { %s461_s22 = sadd.s32 %s3146_s21, %s459_s20  ;;  %s470_s12 = sadd.s32 %s3146_s21, %s3655_s29 }
  0x16   : > { %s2567_s23 = sshll.u32 %s461_s22, 1  ;;  %s2568_s20 = sshll.u32 %s470_s12, 1 }
  0x17   : > { %s463_s26 = scalar_lea.vmem %s3639_s0, %s2567_s23  ;;  %s3041_s22 = smov 126  }
  0x18   : > { %v512_v8 = vld [vmem:[%s463_s26] sm:$0x3]  ;;  %s3042_s23 = smov 117   ;;  %s472_s26 = scalar_lea.vmem %s3640_s1, %s2568_s20 }
  0x19   : > { %v594_v9 = vrot.slane %v512_v8, %v593_v6  ;;  %v530_v10 = vsel %vm528_vm1, %v512_v8, 0  ;;  %v3169_v11 = vld [vmem:[%s472_s26] sm:$0x3]  ;;  %s3045_s29 = smov 107   ;;  %s3046_s12 = smov 106  }
  0x1a   : > { %2743 = vmatpush3.bf16.msra.mxu0 %v530_v10  ;;  %v1175_v12 = vrot.slane %v3169_v11, %v593_v6  ;;  %s3641_s20 = smov 118   ;;  %v1111_v38 = vsel %vm528_vm1, %v3169_v11, 0 }
  0x1b   : > { %595 = vrot.lane.b32.xlu0 %v594_v9, %s3039_s30  ;;  %723 = vrot.lane.b32.xlu1 %v594_v9, %s3635_s11  ;;  %s474_s11 = sadd.s32 2, %s3018_s13  ;;  %s3659_s13 = smov (!%p486_p9, %s3018_s13), 7 }
  0x1c   : > { %2754 = vmatprep.subr.bf16.mxu0 %v3037_v3  ;;  %p477_p8 = scmp.lt.s32.totalorder %s474_s11, 9 }
  0x1d   : > { %2745 = vmatmul.mubr.msk.bf16.vlgmr.msra.gmra.mrb[0].mxu0 %vm524_vm2, %v2965_v7 }
  0x1e   : > { %2756 = vmatprep.mubr.msk.bf16.mxu0 %vm3038_vm0, %v3037_v3  ;;  %s3657_s11 = smov (!%p477_p8, %s474_s11), 9 }
  0x1f   : > { %659 = vrot.lane.b32.xlu0 %v594_v9, %s3041_s22  ;;  %787 = vrot.lane.b32.xlu1 %v594_v9, %s3042_s23  ;;  %s480_s24 = sadd.s32 %s3146_s21, %s3657_s11 }
  0x20   : > { %s2569_s25 = sshll.u32 %s480_s24, 1 }
  0x21   : > { %s482_s1 = scalar_lea.vmem %s3626_s2, %s2569_s25  ;;  %s2570_s25 = sshll.u32 %s3653_s14, 3 }
  0x22   : > { %v3181_v13 = vld [vmem:[%s482_s1] sm:$0x3]  ;;  %s3582_s26 = sadd.s32 %s2570_s25, %s3659_s13 }
  0x23   : > { %851 = vrot.lane.b32.xlu0 %v594_v9, %s3043_s27  ;;  %915 = vrot.lane.b32.xlu1 %v594_v9, %s3044_s28  ;;  %v1748_v14 = vrot.slane %v3181_v13, %v593_v6  ;;  %v1684_v0 = vsel %vm528_vm1, %v3181_v13, 0  ;;  %v2983_v6 = vld [vmem:[%s3628_s4 + $0x90] sm:$0xff]   ;;  %s2571_s0 = sshll.u32 %s3582_s26, 2 }
  0x24   : > { %s491_s14 = scalar_lea.vmem %s3632_s8, %s2571_s0  ;;  %s499_s24 = scalar_lea.vmem %s3633_s9, %s2571_s0 }
  0x27   : > { %979 = vrot.lane.b32.xlu0 %v594_v9, %s3045_s29  ;;  %1043 = vrot.lane.b32.xlu1 %v594_v9, %s3046_s12  ;;  %v2984_v9 = vld [vmem:[%s3628_s4 + $0x98] sm:$0xff]  }
  0x2b   : > { %1176 = vrot.lane.b32.xlu0 %v1175_v12, %s3039_s30  ;;  %1239 = vrot.lane.b32.xlu1 %v1175_v12, %s3041_s22 }
  0x2f   : > { %1302 = vrot.lane.b32.xlu0 %v1175_v12, %s3641_s20  ;;  %1365 = vrot.lane.b32.xlu1 %v1175_v12, %s3042_s23 }
  0x33   : > { %1428 = vrot.lane.b32.xlu0 %v1175_v12, %s3043_s27  ;;  %1491 = vrot.lane.b32.xlu1 %v1175_v12, %s3044_s28 }
  0x37   : > { %1554 = vrot.lane.b32.xlu0 %v1175_v12, %s3045_s29  ;;  %1617 = vrot.lane.b32.xlu1 %v1175_v12, %s3046_s12  ;;  %v2985_v12 = vld [vmem:[%s3628_s4 + $0xa0] sm:$0xff]  }
  0x3b   : > { %1749 = vrot.lane.b32.xlu0 %v1748_v14, %s3039_s30  ;;  %1812 = vrot.lane.b32.xlu1 %v1748_v14, %s3041_s22 }
  0x3f   : > { %1875 = vrot.lane.b32.xlu0 %v1748_v14, %s3641_s20  ;;  %1938 = vrot.lane.b32.xlu1 %v1748_v14, %s3042_s23  ;;  %s2575_s23 = sshll.u32 %s3582_s26, 3 }
  0x43   : > { %2001 = vrot.lane.b32.xlu0 %v1748_v14, %s3043_s27  ;;  %2064 = vrot.lane.b32.xlu1 %v1748_v14, %s3044_s28 }
  0x47   : > { %2127 = vrot.lane.b32.xlu0 %v1748_v14, %s3045_s29  ;;  %2190 = vrot.lane.b32.xlu1 %v1748_v14, %s3046_s12  ;;  %v2986_v14 = vld [vmem:[%s3628_s4 + $0xa8] sm:$0xff]   ;;  %s507_s29 = scalar_lea.vmem %s3634_s10, %s2575_s23 }
  0x8d   : > { %v596_v15 = vpop.permute.xlu0 %595  ;;  %v724_v16 = vpop.permute.xlu1 %723 }
  0x8e   : > { %v601_v17 = vsel %vm528_vm1, %v596_v15, 0  ;;  %v729_v19 = vsel %vm528_vm1, %v724_v16, 0  ;;  %v2987_v15 = vld [vmem:[%s3628_s4 + $0xb0] sm:$0xff]  }
  0x8f   : > { %2749 = vmatpush3.bf16.msra.mxu1 %v601_v17 }
  0x90   : > { %2760 = vmatprep.subr.bf16.mxu1 %v3037_v3 }
  0x91   : > { %v660_v20 = vpop.permute.xlu0 %659  ;;  %v788_v21 = vpop.permute.xlu1 %787 }
  0x92   : > { %2751 = vmatmul.mubr.msk.bf16.vlgmr.msra.gmra.mrb[0].mxu1 %vm524_vm2, %v2966_v18  ;;  %v665_v22 = vsel %vm528_vm1, %v660_v20, 0  ;;  %v793_v24 = vsel %vm528_vm1, %v788_v21, 0  ;;  %v2988_v18 = vld [vmem:[%s3628_s4 + $0xb8] sm:$0xff]   ;;  %v518_v21 = vld [vmem:[#allocation2 + $0x8] sm:$0xff] }
  0x93   : > { %2755 = vmatpush3.bf16.msra.mxu0 %v665_v22  ;;  %2761 = vmatpush3.bf16.msra.mxu1 %v729_v19  ;;  %v517_v19 = vld [vmem:[#allocation2] sm:$0xff] }
  0x94   : > { %2762 = vmatprep.mubr.msk.bf16.mxu1 %vm3038_vm0, %v3037_v3  ;;  %2766 = vmatprep.subr.bf16.mxu0 %v3037_v3 }
  0x95   : > { %v852_v25 = vpop.permute.xlu0 %851  ;;  %2772 = vmatprep.subr.bf16.mxu1 %v3037_v3  ;;  %v916_v28 = vpop.permute.xlu1 %915 }
  0x96   : > { %2757 = vmatmul.mubr.msk.bf16.vlgmr.msra.gmra.mrb[4].mxu0 %vm524_vm2, %v2967_v23  ;;  %v857_v27 = vsel %vm528_vm1, %v852_v25, 0  ;;  %v921_v30 = vsel %vm528_vm1, %v916_v28, 0 }
  0x97   : > { %2767 = vmatpush3.bf16.msra.mxu0 %v793_v24  ;;  %2768 = vmatprep.mubr.msk.bf16.mxu0 %vm3038_vm0, %v3037_v3 }
  0x98   : > { %2778 = vmatprep.subr.bf16.mxu0 %v3037_v3 }
  0x99   : > { %v980_v31 = vpop.permute.xlu0 %979  ;;  %v1044_v34 = vpop.permute.xlu1 %1043 }
  0x9a   : > { %2763 = vmatmul.mubr.msk.bf16.vlgmr.msra.gmra.mrb[4].mxu1 %vm524_vm2, %v2968_v26  ;;  %v985_v33 = vsel %vm528_vm1, %v980_v31, 0  ;;  %v1049_v36 = vsel %vm528_vm1, %v1044_v34, 0 }
  0x9b   : > { %2773 = vmatpush3.bf16.msra.mxu1 %v857_v27  ;;  %2774 = vmatprep.mubr.msk.bf16.mxu1 %vm3038_vm0, %v3037_v3 }
  0x9c   : > { %2784 = vmatprep.subr.bf16.mxu1 %v3037_v3 }
  0x9d   : > { %v1177_v39 = vpop.permute.xlu0 %1176  ;;  %v1240_v42 = vpop.permute.xlu1 %1239 }
  0x9e   : > { %2769 = vmatmul.mubr.msk.bf16.vlgmr.msra.gmra.mrb[8].mxu0 %vm524_vm2, %v2969_v29  ;;  %v1182_v41 = vsel %vm528_vm1, %v1177_v39, 0  ;;  %v1245_v44 = vsel %vm528_vm1, %v1240_v42, 0  ;;  %v2989_v29 = vld [vmem:[%s3628_s4 + $0xc0] sm:$0xff]  }
  0x9f   : > { %2779 = vmatpush3.bf16.msra.mxu0 %v921_v30  ;;  %2780 = vmatprep.mubr.msk.bf16.mxu0 %vm3038_vm0, %v3037_v3 }
  0xa0   : > { %2790 = vmatprep.subr.bf16.mxu0 %v3037_v3 }
  0xa1   : > { %v1303_v45 = vpop.permute.xlu0 %1302  ;;  %v1366_v48 = vpop.permute.xlu1 %1365 }
  0xa2   : > { %2775 = vmatmul.mubr.msk.bf16.vlgmr.msra.gmra.mrb[8].mxu1 %vm524_vm2, %v2970_v32  ;;  %v1308_v47 = vsel %vm528_vm1, %v1303_v45, 0  ;;  %v1371_v50 = vsel %vm528_vm1, %v1366_v48, 0  ;;  %v2990_v32 = vld [vmem:[%s3628_s4 + $0xc8] sm:$0xff]   ;;  %v2245_v45 = vld [vmem:[%s3629_s5] sm:$0xff] }
  0xa3   : > { %2785 = vmatpush3.bf16.msra.mxu1 %v985_v33  ;;  %2786 = vmatprep.mubr.msk.bf16.mxu1 %vm3038_vm0, %v3037_v3  ;;  %v2253_v48 = vld [vmem:[%s3629_s5 + $0x8] sm:$0xff] }
  0xa4   : > { %2796 = vmatprep.subr.bf16.mxu1 %v3037_v3 }
  0xa5   : > { %v1429_v51 = vpop.permute.xlu0 %1428  ;;  %v1492_v54 = vpop.permute.xlu1 %1491 }
  0xa6   : > { %2781 = vmatmul.mubr.msk.bf16.vlgmr.msra.gmra.mrb[12].mxu0 %vm524_vm2, %v2971_v35  ;;  %v1434_v53 = vsel %vm528_vm1, %v1429_v51, 0  ;;  %v1497_v56 = vsel %vm528_vm1, %v1492_v54, 0  ;;  %v2991_v35 = vld [vmem:[%s3628_s4 + $0xd0] sm:$0xff]  }
  0xa7   : > { %2791 = vmatpush3.bf16.msra.mxu0 %v1049_v36  ;;  %2792 = vmatprep.mubr.msk.bf16.mxu0 %vm3038_vm0, %v3037_v3 }
  0xa8   : > { %2802 = vmatprep.subr.bf16.mxu0 %v3037_v3 }
  0xa9   : > { %v1555_v57 = vpop.permute.xlu0 %1554  ;;  %v1618_v60 = vpop.permute.xlu1 %1617 }
  0xaa   : > { %2787 = vmatmul.mubr.msk.bf16.vlgmr.msra.gmra.mrb[12].mxu1 %vm524_vm2, %v2972_v37  ;;  %v1560_v59 = vsel %vm528_vm1, %v1555_v57, 0  ;;  %v1623_v62 = vsel %vm528_vm1, %v1618_v60, 0 }
  0xab   : > { %2797 = vmatpush3.bf16.msra.mxu1 %v1111_v38  ;;  %2798 = vmatprep.mubr.msk.bf16.mxu1 %vm3038_vm0, %v3037_v3 }
  0xac   : > { %2808 = vmatprep.subr.bf16.mxu1 %v3037_v3 }
  0xad   : > { %v1750_v1 = vpop.permute.xlu0 %1749  ;;  %v1813_v5 = vpop.permute.xlu1 %1812 }
  0xae   : > { %2793 = vmatmul.mubr.msk.bf16.vlgmr.msra.gmra.mrb[16].mxu0 %vm524_vm2, %v2973_v40  ;;  %v1755_v4 = vsel %vm528_vm1, %v1750_v1, 0  ;;  %v1818_v7 = vsel %vm528_vm1, %v1813_v5, 0 }
  0xaf   : > { %2803 = vmatpush3.bf16.msra.mxu0 %v1182_v41  ;;  %2804 = vmatprep.mubr.msk.bf16.mxu0 %vm3038_vm0, %v3037_v3 }
  0xb0   : > { %2814 = vmatprep.subr.bf16.mxu0 %v3037_v3 }
  0xb1   : > { %v1876_v8 = vpop.permute.xlu0 %1875  ;;  %v1939_v11 = vpop.permute.xlu1 %1938 }
  0xb2   : > { %2799 = vmatmul.mubr.msk.bf16.vlgmr.msra.gmra.mrb[16].mxu1 %vm524_vm2, %v2974_v43  ;;  %v1881_v10 = vsel %vm528_vm1, %v1876_v8, 0  ;;  %v1944_v13 = vsel %vm528_vm1, %v1939_v11, 0 }
  0xb3   : > { %2809 = vmatpush3.bf16.msra.mxu1 %v1245_v44  ;;  %2810 = vmatprep.mubr.msk.bf16.mxu1 %vm3038_vm0, %v3037_v3  ;;  %v3047_v44 = vmov 0  }
  0xb4   : > { %2820 = vmatprep.subr.bf16.mxu1 %v3037_v3  ;;  %2964 = vset.pattern.permute.xlu1 %v3047_v44 }
  0xb5   : > { %v2002_v16 = vpop.permute.xlu0 %2001  ;;  %v2065_v22 = vpop.permute.xlu1 %2064  ;;  %2963 = vset.pattern.permute.xlu0 %v3047_v44  ;;  %2248 = vperm.xlu1 %2964, %v2245_v45  }
  0xb6   : > { %2805 = vmatmul.mubr.msk.bf16.vlgmr.msra.gmra.mrb[20].mxu0 %vm524_vm2, %v2975_v46  ;;  %v2007_v17 = vsel %vm528_vm1, %v2002_v16, 0  ;;  %v2070_v25 = vsel %vm528_vm1, %v2065_v22, 0  ;;  %2256 = vperm.xlu0 %2963, %v2253_v48  }
  0xb7   : > { %2815 = vmatpush3.bf16.msra.mxu0 %v1308_v47  ;;  %2816 = vmatprep.mubr.msk.bf16.mxu0 %vm3038_vm0, %v3037_v3 }
  0xb8   : > { %2826 = vmatprep.subr.bf16.mxu0 %v3037_v3 }
  0xb9   : > { %v2128_v30 = vpop.permute.xlu0 %2127  ;;  %v2191_v33 = vpop.permute.xlu1 %2190 }
  0xba   : > { %2811 = vmatmul.mubr.msk.bf16.vlgmr.msra.gmra.mrb[20].mxu1 %vm524_vm2, %v2976_v49  ;;  %v2133_v31 = vsel %vm528_vm1, %v2128_v30, 0  ;;  %v2196_v34 = vsel %vm528_vm1, %v2191_v33, 0 }
  0xbb   : > { %2821 = vmatpush3.bf16.msra.mxu1 %v1371_v50  ;;  %2822 = vmatprep.mubr.msk.bf16.mxu1 %vm3038_vm0, %v3037_v3 }
  0xbc   : > { %2832 = vmatprep.subr.bf16.mxu1 %v3037_v3 }
  0xbe   : > { %2817 = vmatmul.mubr.msk.bf16.vlgmr.msra.gmra.mrb[24].mxu0 %vm524_vm2, %v2977_v52 }
  0xbf   : > { %2827 = vmatpush3.bf16.msra.mxu0 %v1434_v53  ;;  %2828 = vmatprep.mubr.msk.bf16.mxu0 %vm3038_vm0, %v3037_v3 }
  0xc0   : > { %2838 = vmatprep.subr.bf16.mxu0 %v3037_v3 }
  0xc2   : > { %2823 = vmatmul.mubr.msk.bf16.vlgmr.msra.gmra.mrb[24].mxu1 %vm524_vm2, %v2978_v55 }
  0xc3   : > { %2833 = vmatpush3.bf16.msra.mxu1 %v1497_v56  ;;  %2834 = vmatprep.mubr.msk.bf16.mxu1 %vm3038_vm0, %v3037_v3 }
  0xc4   : > { %2844 = vmatprep.subr.bf16.mxu1 %v3037_v3 }
  0xc6   : > { %2829 = vmatmul.mubr.msk.bf16.vlgmr.msra.gmra.mrb[28].mxu0 %vm524_vm2, %v2979_v58 }
  0xc7   : > { %2839 = vmatpush3.bf16.msra.mxu0 %v1560_v59  ;;  %2840 = vmatprep.mubr.msk.bf16.mxu0 %vm3038_vm0, %v3037_v3 }
  0xc8   : > { %2850 = vmatprep.subr.bf16.mxu0 %v3037_v3 }
  0xca   : > { %2835 = vmatmul.mubr.msk.bf16.vlgmr.msra.gmra.mrb[28].mxu1 %vm524_vm2, %v2980_v61 }
  0xcb   : > { %2845 = vmatpush3.bf16.msra.mxu1 %v1623_v62  ;;  %2846 = vmatprep.mubr.msk.bf16.mxu1 %vm3038_vm0, %v3037_v3 }
  0xcc   : > { %2856 = vmatprep.subr.bf16.mxu1 %v3037_v3 }
  0xce   : > { %2841 = vmatmul.mubr.msk.bf16.vlgmr.msra.gmra.mrb[32].mxu0 %vm524_vm2, %v2981_v63 }
  0xcf   : > { %2851 = vmatpush3.bf16.msra.mxu0 %v1684_v0  ;;  %2852 = vmatprep.mubr.msk.bf16.mxu0 %vm3038_vm0, %v3037_v3 }
  0xd0   : > { %2862 = vmatprep.subr.bf16.mxu0 %v3037_v3 }
  0xd2   : > { %2847 = vmatmul.mubr.msk.bf16.vlgmr.msra.gmra.mrb[32].mxu1 %vm524_vm2, %v2982_v2 }
  0xd3   : > { %2857 = vmatpush3.bf16.msra.mxu1 %v1755_v4  ;;  %2858 = vmatprep.mubr.msk.bf16.mxu1 %vm3038_vm0, %v3037_v3 }
  0xd4   : > { %2868 = vmatprep.subr.bf16.mxu1 %v3037_v3 }
  0xd6   : > { %2853 = vmatmul.mubr.msk.bf16.vlgmr.msra.gmra.mrb[36].mxu0 %vm524_vm2, %v2983_v6 }
  0xd7   : > { %2863 = vmatpush3.bf16.msra.mxu0 %v1818_v7  ;;  %2864 = vmatprep.mubr.msk.bf16.mxu0 %vm3038_vm0, %v3037_v3 }
  0xd8   : > { %2874 = vmatprep.subr.bf16.mxu0 %v3037_v3 }
  0xda   : > { %2859 = vmatmul.mubr.msk.bf16.vlgmr.msra.gmra.mrb[36].mxu1 %vm524_vm2, %v2984_v9 }
  0xdb   : > { %2869 = vmatpush3.bf16.msra.mxu1 %v1881_v10  ;;  %2870 = vmatprep.mubr.msk.bf16.mxu1 %vm3038_vm0, %v3037_v3 }
  0xdc   : > { %2880 = vmatprep.subr.bf16.mxu1 %v3037_v3 }
  0xde   : > { %2865 = vmatmul.mubr.msk.bf16.vlgmr.msra.gmra.mrb[40].mxu0 %vm524_vm2, %v2985_v12 }
  0xdf   : > { %2875 = vmatpush3.bf16.msra.mxu0 %v1944_v13  ;;  %2876 = vmatprep.mubr.msk.bf16.mxu0 %vm3038_vm0, %v3037_v3 }
  0xe0   : > { %2886 = vmatprep.subr.bf16.mxu0 %v3037_v3 }
  0xe2   : > { %2871 = vmatmul.mubr.msk.bf16.vlgmr.msra.gmra.mrb[40].mxu1 %vm524_vm2, %v2986_v14 }
  0xe3   : > { %2882 = vmatprep.mubr.msk.bf16.mxu1 %vm3038_vm0, %v3037_v3  ;;  %2881 = vmatpush3.bf16.msra.mxu1 %v2007_v17 }
  0xe4   : > { %2892 = vmatprep.subr.bf16.mxu1 %v3037_v3 }
  0xe6   : > { %2877 = vmatmul.mubr.msk.bf16.vlgmr.msra.gmra.mrb[44].mxu0 %vm524_vm2, %v2987_v15 }
  0xe7   : > { %2888 = vmatprep.mubr.msk.bf16.mxu0 %vm3038_vm0, %v3037_v3  ;;  %2887 = vmatpush3.bf16.msra.mxu0 %v2070_v25 }
  0xe8   : > { %2898 = vmatprep.subr.bf16.mxu0 %v3037_v3 }
  0xea   : > { %2883 = vmatmul.mubr.msk.bf16.vlgmr.msra.gmra.mrb[44].mxu1 %vm524_vm2, %v2988_v18 }
  0xeb   : > { %2894 = vmatprep.mubr.msk.bf16.mxu1 %vm3038_vm0, %v3037_v3  ;;  %2893 = vmatpush3.bf16.msra.mxu1 %v2133_v31 }
  0xec   : > { %2904 = vmatprep.subr.bf16.mxu1 %v3037_v3 }
  0xee   : > { %2889 = vmatmul.mubr.msk.bf16.vlgmr.msra.gmra.mrb[48].mxu0 %vm524_vm2, %v2989_v29 }
  0xef   : > { %2900 = vmatprep.mubr.msk.bf16.mxu0 %vm3038_vm0, %v3037_v3  ;;  %2899 = vmatpush3.bf16.msra.mxu0 %v2196_v34 }
  0xf0   : > { %v566_v20 = vpop.f32.mrb[0].mxu0 }
  0xf1   : > { %v573_v23 = vadd.f32 %v566_v20, %v517_v19  ;;  %v2746_v24 = vpop.f32.mrb[1].mxu0 }
  0xf2   : > { %v569_v26 = vpop.f32.mrb[2].mxu0  ;;  %2895 = vmatmul.mubr.msk.bf16.vlgmr.msra.gmra.mrb[48].mxu1 %vm524_vm2, %v2990_v32 }
  0xf3   : > { %575 = vst.msk [vmem:[#allocation2] sm:$0xff] %vm509_vm3, %v573_v23  ;;  %v574_v27 = vadd.f32 %v569_v26, %v518_v21  ;;  %v2747_v28 = vpop.f32.mrb[3].mxu0  ;;  %2906 = vmatprep.mubr.msk.bf16.mxu1 %vm3038_vm0, %v3037_v3  ;;  %vm2339_vm0 = vcmask 15368  }
  0xf5   : > { %576 = vst.msk [vmem:[#allocation2 + $0x8] sm:$0xff] %vm509_vm3, %v574_v27 }
  0xf6   : > { %2901 = vmatmul.mubr.msk.bf16.vlgmr.msra.gmra.mrb[52].mxu0 %vm524_vm2, %v2991_v35 }
  0xfa   : > { %v580_v36 = vld [vmem:[#allocation2] sm:$0xff] }
  0xfc   : > { %v581_v40 = vld [vmem:[#allocation2 + $0x8] sm:$0xff] }
 0x165   : > { %v637_v37 = vpop.f32.mrb[0].mxu1 }
 0x166   : > { %v644_v38 = vadd.f32 %v637_v37, %v580_v36  ;;  %v2752_v39 = vpop.f32.mrb[1].mxu1 }
 0x167   : > { %v640_v41 = vpop.f32.mrb[2].mxu1 }
 0x168   : > { %647 = vst.msk [vmem:[#allocation2] sm:$0xff] %vm646_vm4, %v644_v38  ;;  %v645_v3 = vadd.f32 %v640_v41, %v581_v40  ;;  %v2753_v42 = vpop.f32.mrb[3].mxu1 }
 0x169   : > { %v701_v43 = vpop.f32.mrb[4].mxu0 }
 0x16a   : > { %648 = vst.msk [vmem:[#allocation2 + $0x8] sm:$0xff] %vm646_vm4, %v645_v3  ;;  %v2758_v46 = vpop.f32.mrb[5].mxu0 }
 0x16b   : > { %v704_v47 = vpop.f32.mrb[6].mxu0 }
 0x16c   : > { %v2759_v49 = vpop.f32.mrb[7].mxu0 }
 0x16d   : > { %v765_v50 = vpop.f32.mrb[4].mxu1 }
 0x16e   : > { %v2764_v51 = vpop.f32.mrb[5].mxu1 }
 0x16f   : > { %v652_v52 = vld [vmem:[#allocation2] sm:$0xff]  ;;  %v768_v53 = vpop.f32.mrb[6].mxu1 }
 0x170   : > { %v708_v54 = vadd.f32 %v701_v43, %v652_v52  ;;  %v2765_v55 = vpop.f32.mrb[7].mxu1 }
 0x171   : > { %v653_v56 = vld [vmem:[#allocation2 + $0x8] sm:$0xff]  ;;  %v829_v57 = vpop.f32.mrb[8].mxu0 }
 0x172   : > { %711 = vst.msk [vmem:[#allocation2] sm:$0xff] %vm710_vm5, %v708_v54  ;;  %v709_v58 = vadd.f32 %v704_v47, %v653_v56  ;;  %v2770_v59 = vpop.f32.mrb[9].mxu0 }
 0x173   : > { %v832_v60 = vpop.f32.mrb[10].mxu0 }
 0x174   : > { %712 = vst.msk [vmem:[#allocation2 + $0x8] sm:$0xff] %vm710_vm5, %v709_v58  ;;  %v2771_v61 = vpop.f32.mrb[11].mxu0 }
 0x175   : > { %v893_v62 = vpop.f32.mrb[8].mxu1 }
 0x176   : > { %v2776_v63 = vpop.f32.mrb[9].mxu1 }
 0x177   : > { %v896_v0 = vpop.f32.mrb[10].mxu1 }
 0x178   : > { %v2777_v1 = vpop.f32.mrb[11].mxu1 }
 0x179   : > { %v716_v2 = vld [vmem:[#allocation2] sm:$0xff]  ;;  %v957_v4 = vpop.f32.mrb[12].mxu0 }
 0x17a   : > { %v772_v5 = vadd.f32 %v765_v50, %v716_v2  ;;  %v2782_v6 = vpop.f32.mrb[13].mxu0 }
 0x17b   : > { %v717_v7 = vld [vmem:[#allocation2 + $0x8] sm:$0xff]  ;;  %v960_v8 = vpop.f32.mrb[14].mxu0 }
 0x17c   : > { %775 = vst.msk [vmem:[#allocation2] sm:$0xff] %vm774_vm6, %v772_v5  ;;  %v773_v9 = vadd.f32 %v768_v53, %v717_v7  ;;  %v2783_v10 = vpop.f32.mrb[15].mxu0 }
 0x17d   : > { %v1021_v11 = vpop.f32.mrb[12].mxu1 }
 0x17e   : > { %776 = vst.msk [vmem:[#allocation2 + $0x8] sm:$0xff] %vm774_vm6, %v773_v9  ;;  %v2788_v12 = vpop.f32.mrb[13].mxu1 }
 0x17f   : > { %v3413_v13 = vpop.f32.mrb[14].mxu1 }
 0x180   : > { %v2789_v14 = vpop.f32.mrb[15].mxu1 }
 0x181   : > { %v3415_v15 = vpop.f32.mrb[16].mxu0 }
 0x182   : > { %v2794_v16 = vpop.f32.mrb[17].mxu0 }
 0x183   : > { %v780_v17 = vld [vmem:[#allocation2] sm:$0xff]  ;;  %v3417_v18 = vpop.f32.mrb[18].mxu0 }
 0x184   : > { %v836_v19 = vadd.f32 %v829_v57, %v780_v17  ;;  %v2795_v20 = vpop.f32.mrb[19].mxu0 }
 0x185   : > { %v781_v21 = vld [vmem:[#allocation2 + $0x8] sm:$0xff]  ;;  %v3419_v22 = vpop.f32.mrb[16].mxu1 }
 0x186   : > { %839 = vst.msk [vmem:[#allocation2] sm:$0xff] %vm838_vm7, %v836_v19  ;;  %v837_v23 = vadd.f32 %v832_v60, %v781_v21  ;;  %v2800_v24 = vpop.f32.mrb[17].mxu1 }
 0x187   : > { %v3422_v25 = vpop.f32.mrb[18].mxu1 }
 0x188   : > { %840 = vst.msk [vmem:[#allocation2 + $0x8] sm:$0xff] %vm838_vm7, %v837_v23  ;;  %v2801_v26 = vpop.f32.mrb[19].mxu1 }
 0x189   : > { %v3425_v27 = vpop.f32.mrb[20].mxu0 }
 0x18a   : > { %v2806_v28 = vpop.f32.mrb[21].mxu0 }
 0x18b   : > { %v3427_v29 = vpop.f32.mrb[22].mxu0 }
 0x18c   : > { %v2807_v30 = vpop.f32.mrb[23].mxu0 }
 0x18d   : > { %v844_v31 = vld [vmem:[#allocation2] sm:$0xff]  ;;  %v3429_v32 = vpop.f32.mrb[20].mxu1 }
 0x18e   : > { %v900_v33 = vadd.f32 %v893_v62, %v844_v31  ;;  %v2812_v34 = vpop.f32.mrb[21].mxu1 }
 0x18f   : > { %v845_v35 = vld [vmem:[#allocation2 + $0x8] sm:$0xff]  ;;  %v3431_v36 = vpop.f32.mrb[22].mxu1 }
 0x190   : > { %903 = vst.msk [vmem:[#allocation2] sm:$0xff] %vm902_vm8, %v900_v33  ;;  %v901_v37 = vadd.f32 %v896_v0, %v845_v35  ;;  %v2813_v38 = vpop.f32.mrb[23].mxu1 }
 0x191   : > { %v3434_v39 = vpop.f32.mrb[24].mxu0 }
 0x192   : > { %904 = vst.msk [vmem:[#allocation2 + $0x8] sm:$0xff] %vm902_vm8, %v901_v37  ;;  %v2818_v40 = vpop.f32.mrb[25].mxu0 }
 0x193   : > { %v3437_v41 = vpop.f32.mrb[26].mxu0 }
 0x194   : > { %v2819_v3 = vpop.f32.mrb[27].mxu0 }
 0x195   : > { %v3439_v42 = vpop.f32.mrb[24].mxu1 }
 0x196   : > { %v2824_v43 = vpop.f32.mrb[25].mxu1 }
 0x197   : > { %v908_v44 = vld [vmem:[#allocation2] sm:$0xff]  ;;  %v3441_v45 = vpop.f32.mrb[26].mxu1 }
 0x198   : > { %v964_v46 = vadd.f32 %v957_v4, %v908_v44  ;;  %v2825_v47 = vpop.f32.mrb[27].mxu1 }
 0x199   : > { %v909_v48 = vld [vmem:[#allocation2 + $0x8] sm:$0xff]  ;;  %v3443_v49 = vpop.f32.mrb[28].mxu0 }
 0x19a   : > { %967 = vst.msk [vmem:[#allocation2] sm:$0xff] %vm966_vm9, %v964_v46  ;;  %v965_v50 = vadd.f32 %v960_v8, %v909_v48  ;;  %v2830_v51 = vpop.f32.mrb[29].mxu0 }
 0x19b   : > { %v3446_v52 = vpop.f32.mrb[30].mxu0 }
 0x19c   : > { %968 = vst.msk [vmem:[#allocation2 + $0x8] sm:$0xff] %vm966_vm9, %v965_v50  ;;  %v2831_v53 = vpop.f32.mrb[31].mxu0 }
 0x19d   : > { %v3449_v54 = vpop.f32.mrb[28].mxu1 }
 0x19e   : > { %v2836_v55 = vpop.f32.mrb[29].mxu1 }
 0x19f   : > { %v3451_v56 = vpop.f32.mrb[30].mxu1 }
 0x1a0   : > { %v2837_v57 = vpop.f32.mrb[31].mxu1 }
 0x1a1   : > { %v972_v58 = vld [vmem:[#allocation2] sm:$0xff]  ;;  %v3453_v59 = vpop.f32.mrb[32].mxu0 }
 0x1a2   : > { %v1028_v60 = vadd.f32 %v1021_v11, %v972_v58  ;;  %v2842_v61 = vpop.f32.mrb[33].mxu0 }
 0x1a3   : > { %v973_v62 = vld [vmem:[#allocation2 + $0x8] sm:$0xff]  ;;  %v3455_v63 = vpop.f32.mrb[34].mxu0 }
 0x1a4   : > { %1031 = vst.msk [vmem:[#allocation2] sm:$0xff] %vm1030_vm10, %v1028_v60  ;;  %v1029_v0 = vadd.f32 %v3413_v13, %v973_v62  ;;  %v2843_v1 = vpop.f32.mrb[35].mxu0 }
 0x1a5   : > { %v3459_v2 = vpop.f32.mrb[32].mxu1 }
 0x1a6   : > { %1032 = vst.msk [vmem:[#allocation2 + $0x8] sm:$0xff] %vm1030_vm10, %v1029_v0  ;;  %v2848_v4 = vpop.f32.mrb[33].mxu1 }
 0x1a7   : > { %v3462_v5 = vpop.f32.mrb[34].mxu1 }
 0x1a8   : > { %v2849_v6 = vpop.f32.mrb[35].mxu1 }
 0x1a9   : > { %v3464_v7 = vpop.f32.mrb[36].mxu0 }
 0x1aa   : > { %v2854_v8 = vpop.f32.mrb[37].mxu0 }
 0x1ab   : > { %v1036_v9 = vld [vmem:[#allocation2] sm:$0xff]  ;;  %v3466_v10 = vpop.f32.mrb[38].mxu0 }
 0x1ac   : > { %v1092_v11 = vadd.f32 %v3415_v15, %v1036_v9  ;;  %v2855_v12 = vpop.f32.mrb[39].mxu0 }
 0x1ad   : > { %v1037_v13 = vld [vmem:[#allocation2 + $0x8] sm:$0xff]  ;;  %v3469_v14 = vpop.f32.mrb[36].mxu1 }
 0x1ae   : > { %1095 = vst.msk [vmem:[#allocation2] sm:$0xff] %vm1094_vm11, %v1092_v11  ;;  %v1093_v16 = vadd.f32 %v3417_v18, %v1037_v13  ;;  %v2860_v17 = vpop.f32.mrb[37].mxu1 }
 0x1af   : > { %v3473_v19 = vpop.f32.mrb[38].mxu1 }
 0x1b0   : > { %1096 = vst.msk [vmem:[#allocation2 + $0x8] sm:$0xff] %vm1094_vm11, %v1093_v16  ;;  %v2861_v20 = vpop.f32.mrb[39].mxu1 }
 0x1b1   : > { %v3476_v21 = vpop.f32.mrb[40].mxu0 }
 0x1b2   : > { %v2866_v23 = vpop.f32.mrb[41].mxu0 }
 0x1b3   : > { %v3478_v24 = vpop.f32.mrb[42].mxu0 }
 0x1b4   : > { %v2867_v15 = vpop.f32.mrb[43].mxu0 }
 0x1b5   : > { %v1100_v26 = vld [vmem:[#allocation2] sm:$0xff]  ;;  %v3480_v28 = vpop.f32.mrb[40].mxu1 }
 0x1b6   : > { %v1154_v30 = vadd.f32 %v3419_v22, %v1100_v26  ;;  %v2872_v31 = vpop.f32.mrb[41].mxu1 }
 0x1b7   : > { %v1101_v33 = vld [vmem:[#allocation2 + $0x8] sm:$0xff]  ;;  %v3483_v18 = vpop.f32.mrb[42].mxu1 }
 0x1b8   : > { %1156 = vst.msk [vmem:[#allocation2] sm:$0xff] %vm509_vm3, %v1154_v30  ;;  %v1155_v34 = vadd.f32 %v3422_v25, %v1101_v33  ;;  %v2873_v35 = vpop.f32.mrb[43].mxu1 }
 0x1b9   : > { %v3487_v37 = vpop.f32.mrb[44].mxu0 }
 0x1ba   : > { %1157 = vst.msk [vmem:[#allocation2 + $0x8] sm:$0xff] %vm509_vm3, %v1155_v34  ;;  %v2878_v38 = vpop.f32.mrb[45].mxu0 }
 0x1bb   : > { %v3490_v40 = vpop.f32.mrb[46].mxu0 }
 0x1bc   : > { %v2879_v3 = vpop.f32.mrb[47].mxu0 }
 0x1bd   : > { %v3492_v43 = vpop.f32.mrb[44].mxu1 }
 0x1be   : > { %v2884_v44 = vpop.f32.mrb[45].mxu1 }
 0x1bf   : > { %v1161_v22 = vld [vmem:[#allocation2] sm:$0xff]  ;;  %v3495_v47 = vpop.f32.mrb[46].mxu1 }
 0x1c0   : > { %v1225_v46 = vadd.f32 %v3425_v27, %v1161_v22  ;;  %v2885_v50 = vpop.f32.mrb[47].mxu1 }
 0x1c1   : > { %v1162_v48 = vld [vmem:[#allocation2 + $0x8] sm:$0xff]  ;;  %v3500_v51 = vpop.f32.mrb[48].mxu0 }
 0x1c2   : > { %1227 = vst.msk [vmem:[#allocation2] sm:$0xff] %vm646_vm4, %v1225_v46  ;;  %v1226_v25 = vadd.f32 %v3427_v29, %v1162_v48  ;;  %v2890_v55 = vpop.f32.mrb[49].mxu0  ;;  %v2263_v29 = vld [vmem:[%s3631_s7] sm:$0xff] }
 0x1c3   : > { %v3503_v58 = vpop.f32.mrb[50].mxu0  ;;  %2266 = vperm.xlu1 %2964, %v2263_v29  }
 0x1c4   : > { %1228 = vst.msk [vmem:[#allocation2 + $0x8] sm:$0xff] %vm646_vm4, %v1226_v25  ;;  %v2891_v27 = vpop.f32.mrb[51].mxu0 }
 0x1c5   : > { %v3511_v62 = vpop.f32.mrb[48].mxu1 }
 0x1c6   : > { %v2896_v1 = vpop.f32.mrb[49].mxu1 }
 0x1c7   : > { %v3514_v4 = vpop.f32.mrb[50].mxu1 }
 0x1c8   : > { %v2897_v8 = vpop.f32.mrb[51].mxu1 }
 0x1c9   : > { %v1232_v53 = vld [vmem:[#allocation2] sm:$0xff]  ;;  %v3519_v9 = vpop.f32.mrb[52].mxu0  ;;  %v2257_v8 = vpop.permute.xlu0 %2256 }
 0x1ca   : > { %v1288_v57 = vadd.f32 %v3429_v32, %v1232_v53  ;;  %v2902_v12 = vpop.f32.mrb[53].mxu0 }
 0x1cb   : > { %v1233_v60 = vld [vmem:[#allocation2 + $0x8] sm:$0xff]  ;;  %v3522_v16 = vpop.f32.mrb[54].mxu0 }
 0x1cc   : > { %1290 = vst.msk [vmem:[#allocation2] sm:$0xff] %vm710_vm5, %v1288_v57  ;;  %v1289_v61 = vadd.f32 %v3431_v36, %v1233_v60 }
 0x1ce   : > { %1291 = vst.msk [vmem:[#allocation2 + $0x8] sm:$0xff] %vm710_vm5, %v1289_v61 }
 0x1d3   : > { %v1295_v0 = vld [vmem:[#allocation2] sm:$0xff] }
 0x1d4   : > { %v1351_v32 = vadd.f32 %v3434_v39, %v1295_v0  ;;  %v2903_v39 = vpop.f32.mrb[55].mxu0 }
 0x1d5   : > { %v1296_v6 = vld [vmem:[#allocation2 + $0x8] sm:$0xff] }
 0x1d6   : > { %1353 = vst.msk [vmem:[#allocation2] sm:$0xff] %vm774_vm6, %v1351_v32  ;;  %v1352_v36 = vadd.f32 %v3437_v41, %v1296_v6 }
 0x1d8   : > { %1354 = vst.msk [vmem:[#allocation2 + $0x8] sm:$0xff] %vm774_vm6, %v1352_v36  ;;  %v2683_v36 = vld [vmem:[%s3627_s3] ss:$0 sm:$0xff] }
 0x1dd   : > { %v1358_v11 = vld [vmem:[#allocation2] sm:$0xff] }
 0x1de   : > { %v1414_v13 = vadd.f32 %v3439_v42, %v1358_v11 }
 0x1df   : > { %v1359_v17 = vld [vmem:[#allocation2 + $0x8] sm:$0xff] }
 0x1e0   : > { %1416 = vst.msk [vmem:[#allocation2] sm:$0xff] %vm838_vm7, %v1414_v13  ;;  %v1415_v20 = vadd.f32 %v3441_v45, %v1359_v17 }
 0x1e2   : > { %1417 = vst.msk [vmem:[#allocation2 + $0x8] sm:$0xff] %vm838_vm7, %v1415_v20 }
 0x1e7   : > { %v1421_v23 = vld [vmem:[#allocation2] sm:$0xff] }
 0x1e8   : > { %v1477_v41 = vadd.f32 %v3443_v49, %v1421_v23 }
 0x1e9   : > { %v1422_v15 = vld [vmem:[#allocation2 + $0x8] sm:$0xff] }
 0x1ea   : > { %1479 = vst.msk [vmem:[#allocation2] sm:$0xff] %vm902_vm8, %v1477_v41  ;;  %v1478_v26 = vadd.f32 %v3446_v52, %v1422_v15 }
 0x1ec   : > { %1480 = vst.msk [vmem:[#allocation2 + $0x8] sm:$0xff] %vm902_vm8, %v1478_v26  ;;  %v2261_v26 = vld [vmem:[%s3630_s6] sm:$0xf] }
 0x1f1   : > { %v1484_v42 = vld [vmem:[#allocation2] sm:$0xff] }
 0x1f2   : > { %v1540_v30 = vadd.f32 %v3449_v54, %v1484_v42 }
 0x1f3   : > { %v1485_v31 = vld [vmem:[#allocation2 + $0x8] sm:$0xff] }
 0x1f4   : > { %1542 = vst.msk [vmem:[#allocation2] sm:$0xff] %vm966_vm9, %v1540_v30  ;;  %v1541_v45 = vadd.f32 %v3451_v56, %v1485_v31 }
 0x1f6   : > { %1543 = vst.msk [vmem:[#allocation2 + $0x8] sm:$0xff] %vm966_vm9, %v1541_v45 }
 0x1fb   : > { %v1547_v33 = vld [vmem:[#allocation2] sm:$0xff] }
 0x1fc   : > { %v1603_v49 = vadd.f32 %v3453_v59, %v1547_v33 }
 0x1fd   : > { %v1548_v34 = vld [vmem:[#allocation2 + $0x8] sm:$0xff] }
 0x1fe   : > { %1605 = vst.msk [vmem:[#allocation2] sm:$0xff] %vm1030_vm10, %v1603_v49  ;;  %v1604_v52 = vadd.f32 %v3455_v63, %v1548_v34 }
 0x200   : > { %1606 = vst.msk [vmem:[#allocation2 + $0x8] sm:$0xff] %vm1030_vm10, %v1604_v52 }
 0x205   : > { %v1610_v35 = vld [vmem:[#allocation2] sm:$0xff] }
 0x206   : > { %v1666_v54 = vadd.f32 %v3459_v2, %v1610_v35 }
 0x207   : > { %v1611_v38 = vld [vmem:[#allocation2 + $0x8] sm:$0xff] }
 0x208   : > { %1668 = vst.msk [vmem:[#allocation2] sm:$0xff] %vm1094_vm11, %v1666_v54  ;;  %v1667_v56 = vadd.f32 %v3462_v5, %v1611_v38 }
 0x20a   : > { %1669 = vst.msk [vmem:[#allocation2 + $0x8] sm:$0xff] %vm1094_vm11, %v1667_v56 }
 0x20f   : > { %v1673_v3 = vld [vmem:[#allocation2] sm:$0xff] }
 0x210   : > { %v1727_v59 = vadd.f32 %v3464_v7, %v1673_v3 }
 0x211   : > { %v1674_v22 = vld [vmem:[#allocation2 + $0x8] sm:$0xff] }
 0x212   : > { %1729 = vst.msk [vmem:[#allocation2] sm:$0xff] %vm509_vm3, %v1727_v59  ;;  %v1728_v63 = vadd.f32 %v3466_v10, %v1674_v22 }
 0x214   : > { %1730 = vst.msk [vmem:[#allocation2 + $0x8] sm:$0xff] %vm509_vm3, %v1728_v63 }
 0x219   : > { %v1734_v44 = vld [vmem:[#allocation2] sm:$0xff] }
 0x21a   : > { %v1798_v2 = vadd.f32 %v3469_v14, %v1734_v44 }
 0x21b   : > { %v1735_v46 = vld [vmem:[#allocation2 + $0x8] sm:$0xff] }
 0x21c   : > { %1800 = vst.msk [vmem:[#allocation2] sm:$0xff] %vm646_vm4, %v1798_v2  ;;  %v1799_v5 = vadd.f32 %v3473_v19, %v1735_v46 }
 0x21e   : > { %1801 = vst.msk [vmem:[#allocation2 + $0x8] sm:$0xff] %vm646_vm4, %v1799_v5 }
 0x223   : > { %v1805_v48 = vld [vmem:[#allocation2] sm:$0xff] }
 0x224   : > { %v1861_v7 = vadd.f32 %v3476_v21, %v1805_v48 }
 0x225   : > { %v1806_v50 = vld [vmem:[#allocation2 + $0x8] sm:$0xff] }
 0x226   : > { %1863 = vst.msk [vmem:[#allocation2] sm:$0xff] %vm710_vm5, %v1861_v7  ;;  %v1862_v10 = vadd.f32 %v3478_v24, %v1806_v50 }
 0x228   : > { %1864 = vst.msk [vmem:[#allocation2 + $0x8] sm:$0xff] %vm710_vm5, %v1862_v10 }
 0x22d   : > { %v1868_v25 = vld [vmem:[#allocation2] sm:$0xff] }
 0x22e   : > { %v1924_v14 = vadd.f32 %v3480_v28, %v1868_v25 }
 0x22f   : > { %v1869_v53 = vld [vmem:[#allocation2 + $0x8] sm:$0xff] }
 0x230   : > { %1926 = vst.msk [vmem:[#allocation2] sm:$0xff] %vm774_vm6, %v1924_v14  ;;  %v1925_v19 = vadd.f32 %v3483_v18, %v1869_v53 }
 0x232   : > { %1927 = vst.msk [vmem:[#allocation2 + $0x8] sm:$0xff] %vm774_vm6, %v1925_v19 }
 0x237   : > { %v1931_v55 = vld [vmem:[#allocation2] sm:$0xff] }
 0x238   : > { %v1987_v21 = vadd.f32 %v3487_v37, %v1931_v55 }
 0x239   : > { %v1932_v57 = vld [vmem:[#allocation2 + $0x8] sm:$0xff] }
 0x23a   : > { %1989 = vst.msk [vmem:[#allocation2] sm:$0xff] %vm838_vm7, %v1987_v21  ;;  %v1988_v24 = vadd.f32 %v3490_v40, %v1932_v57 }
 0x23c   : > { %1990 = vst.msk [vmem:[#allocation2 + $0x8] sm:$0xff] %vm838_vm7, %v1988_v24 }
 0x241   : > { %v1994_v60 = vld [vmem:[#allocation2] sm:$0xff] }
 0x242   : > { %v2050_v28 = vadd.f32 %v3492_v43, %v1994_v60 }
 0x243   : > { %v1995_v27 = vld [vmem:[#allocation2 + $0x8] sm:$0xff] }
 0x244   : > { %2052 = vst.msk [vmem:[#allocation2] sm:$0xff] %vm902_vm8, %v2050_v28  ;;  %v2051_v18 = vadd.f32 %v3495_v47, %v1995_v27 }
 0x246   : > { %2053 = vst.msk [vmem:[#allocation2 + $0x8] sm:$0xff] %vm902_vm8, %v2051_v18 }
 0x24b   : > { %v2057_v61 = vld [vmem:[#allocation2] sm:$0xff] }
 0x24c   : > { %v2113_v37 = vadd.f32 %v3500_v51, %v2057_v61 }
 0x24d   : > { %v2058_v29 = vld [vmem:[#allocation2 + $0x8] sm:$0xff] }
 0x24e   : > { %2115 = vst.msk [vmem:[#allocation2] sm:$0xff] %vm966_vm9, %v2113_v37  ;;  %v2114_v40 = vadd.f32 %v3503_v58, %v2058_v29 }
 0x250   : > { %2116 = vst.msk [vmem:[#allocation2 + $0x8] sm:$0xff] %vm966_vm9, %v2114_v40 }
 0x255   : > { %v2120_v43 = vld [vmem:[#allocation2] sm:$0xff] }
 0x256   : > { %v2176_v0 = vadd.f32 %v3511_v62, %v2120_v43  ;;  %v2249_v62 = vpop.permute.xlu1 %2248 }
 0x257   : > { %v2121_v1 = vld [vmem:[#allocation2 + $0x8] sm:$0xff] }
 0x258   : > { %2178 = vst.msk [vmem:[#allocation2] sm:$0xff] %vm1030_vm10, %v2176_v0  ;;  %v2177_v47 = vadd.f32 %v3514_v4, %v2121_v1 }
 0x25a   : > { %2179 = vst.msk [vmem:[#allocation2 + $0x8] sm:$0xff] %vm1030_vm10, %v2177_v47  ;;  %v2267_v42 = vpop.permute.xlu1 %2266 }
 0x25f   : > { %v2183_v51 = vld [vmem:[#allocation2] sm:$0xff] }
 0x260   : > { %v2239_v32 = vadd.f32 %v3519_v9, %v2183_v51 }
 0x261   : > { %v2184_v6 = vld [vmem:[#allocation2 + $0x8] sm:$0xff] }
 0x262   : > { %2241 = vst.msk [vmem:[#allocation2] sm:$0xff] %vm1094_vm11, %v2239_v32  ;;  %v2240_v58 = vadd.f32 %v3522_v16, %v2184_v6 }
 0x264   : > { %2242 = vst.msk [vmem:[#allocation2 + $0x8] sm:$0xff] %vm1094_vm11, %v2240_v58 }
 0x269   : > { %v2244_v4 = vld [vmem:[#allocation2] sm:$0xff] }
 0x26a   : > { %v2251_v9 = vadd.f32 %v2249_v62, %v2244_v4 }
 0x26b   : > { %v2252_v11 = vld [vmem:[#allocation2 + $0x8] sm:$0xff] }
 0x26c   : > { %v2341_v12 = vpack.c.bf16 %v2251_v9, %v2251_v9  ;;  %v2259_v13 = vadd.f32 %v2257_v8, %v2252_v11  ;;  %v2329_v16 = vmul.f32 %v2683_v36, %v2251_v9 }
 0x26e   : > { %v2260_v17 = vmax.f32 %v2259_v13, 0.0  ;;  %v2330_v39 = vsel %vm509_vm3, %v2329_v16, 0.0  ;;  %v2335_v20 = vmul.f32 %v2329_v16, %v2251_v9  ;;  %2343 = vst.msk [vmem:[%s491_s14] sm:$0xf] %vm2342_vm12, %v2341_v12 }
 0x26f   : > { %2331 = vadd.xlane.f32.xlu0 %v2330_v39 }
 0x270   : > { %v2262_v23 = vpack.c.bf16 %v2260_v17, %v2260_v17  ;;  %v2336_v41 = vsel %vm509_vm3, %v2335_v20, 0.0 }
 0x271   : > { %2337 = vadd.xlane.f32.xlu1 %v2336_v41 }
 0x272   : > { %v2275_v15 = vsel %vm2273_vm13, %v2262_v23, 0 }
 0x273   : > { %2905 = vmatpush3.bf16.msra.mxu1 %v2275_v15 }
 0x276   : > { %2907 = vmatmul.mubr.msk.bf16.vlgmr.msra.gmra.mrb[52].mxu1 %vm2269_vm14, %v2261_v26 }
 0x2fc   : > { %v2332_v30 = vpop.xlane.xlu0 %2331 }
 0x2fd   : > { %2334 = vst.msk [vmem:[%s507_s29] sm:$0xff] %vm2333_vm15, %v2332_v30 }
 0x2fe   : > { %v2338_v31 = vpop.xlane.xlu1 %2337 }
 0x2ff   : > { %2340 = vst.msk [vmem:[%s507_s29] sm:$0xff] %vm2339_vm0, %v2338_v31 }
 0x349   : > { %v2311_v45 = vpop.f32.mrb[52].mxu1 }
 0x34a   : > { %v2312_v33 = vadd.f32 %v2311_v45, %v2267_v42  ;;  %v2908_v49 = vpop.f32.mrb[53].mxu1 }
 0x34b   : > { %v2314_v34 = vpop.f32.mrb[54].mxu1 }
 0x34c   : > { %v2317_v52 = vsub.f32 0.0, %v2312_v33  ;;  %v2909_v35 = vpop.f32.mrb[55].mxu1 }
 0x34e   : > { %v2318_v54 = vmul.f32 1.442695, %v2317_v52 }
 0x350   : > { %2992 = vpow2.f32 %v2318_v54 }
 0x35a   : > { %v2993_v38 = vpop.eup %2992 }
 0x35b   : > { %v2320_v56 = vadd.f32 1.0, %v2993_v38 }
 0x35d   : > { %2994 = vrcp.f32 %v2320_v56 }
 0x367   : > { %v2995_v3 = vpop.eup %2994 }
 0x368   : > { %v2322_v59 = vadd.f32 1.0, %v2995_v3 }
 0x36a   : > { %v2344_v22 = vpack.c.bf16 %v2322_v59, %v2322_v59 }
 0x36c   : > { %2345 = vst.msk [vmem:[%s499_s24] sm:$0xf] %vm2342_vm12, %v2344_v22 }
 0x36d PF: > { %s21_s17 = sadd.s32 1, %s3034_s17   ;;  %s3642_s13 = smov %s3026_s15 }
 0x36e   : > { %p18_p10 = scmp.ge.s32.totalorder %s21_s17, 18   ;;  %s3643_s14 = smov %s3030_s16 }
 0x36f   : > { %s3644_s15 = smov %s3647_s18  ;;  %s3645_s16 = smov %s3651_s19 }
 0x370   :  { %20 = sbr.rel (!%p18_p10) target bundleno = 4 (0x4), region = 138 }

</bundles_post_ra>
